<compile_context>
chip_gen: v5e
topology: v5e:2x2
jax: 0.10.0
libtpu: 0.0.40
codegen_flags: <defaults>
</compile_context>

<pallas_src>
import jax
import jax.numpy as jnp
from jax import lax
from jax.experimental import pallas as pl
from jax.experimental.pallas import tpu as pltpu


def _round_up(x, m):
    return (x + m - 1) // m * m


# --------------------------------------------------------------------------
# Kernels
# --------------------------------------------------------------------------
def _zca_kernel_single(x_ref, t_ref, b_ref, o_ref):
    """out tile = x_block @ T_tile^T - b_tile, with the full K in one MXU call.

    x_ref : (tm, Dp)   rows of the flattened input (full reduction dim)
    t_ref : (tn, Dp)   rows of T (== columns of T^T)
    b_ref : (1, tn)    precomputed bias  b = T @ m
    o_ref : (tm, tn)   output tile
    """
    acc = lax.dot_general(
        x_ref[...], t_ref[...],
        dimension_numbers=(((1,), (1,)), ((), ())),
        preferred_element_type=jnp.float32,
    )
    o_ref[...] = (acc - b_ref[...]).astype(o_ref.dtype)


def _zca_kernel_reduce_f32(x_ref, t_ref, b_ref, o_ref):
    """K-tiled reduction, accumulating directly into the f32 output block."""
    k = pl.program_id(2)

    @pl.when(k == 0)
    def _():
        o_ref[...] = jnp.zeros_like(o_ref)

    o_ref[...] += lax.dot_general(
        x_ref[...], t_ref[...],
        dimension_numbers=(((1,), (1,)), ((), ())),
        preferred_element_type=jnp.float32,
    )

    @pl.when(k == pl.num_programs(2) - 1)
    def _():
        o_ref[...] = o_ref[...] - b_ref[...]


def _zca_kernel_reduce_acc(x_ref, t_ref, b_ref, o_ref, acc_ref):
    """K-tiled reduction with an f32 scratch accumulator (non-f32 outputs)."""
    k = pl.program_id(2)

    @pl.when(k == 0)
    def _():
        acc_ref[...] = jnp.zeros_like(acc_ref)

    acc_ref[...] += lax.dot_general(
        x_ref[...], t_ref[...],
        dimension_numbers=(((1,), (1,)), ((), ())),
        preferred_element_type=jnp.float32,
    )

    @pl.when(k == pl.num_programs(2) - 1)
    def _():
        o_ref[...] = (acc_ref[...] - b_ref[...]).astype(o_ref.dtype)


# --------------------------------------------------------------------------
# Tile selection
# --------------------------------------------------------------------------
_TILE_CANDIDATES = (2048, 1024, 512, 256, 128)
_VMEM_BUDGET = 24 * 1024 * 1024   # conservative: fits v7x (64 MiB physical) easily


def _pick_tiles(n_rows, dp, itemsize):
    """Return (tm, tn, tk).  tk == dp means the reduction axis is collapsed."""
    tm = n_rows if n_rows <= 256 else 256
    divisors = [t for t in _TILE_CANDIDATES if t <= dp and dp % t == 0]
    if not divisors:               # dp is always >= 128 after padding; safeguard
        divisors = [dp]

    # Regime A: collapse K entirely — x streamed once, no accumulator phases.
    for tn in divisors:
        fp = 2 * itemsize * (tn * dp + tm * dp + tm * tn + 8 * tn)
        if fp <= _VMEM_BUDGET:
            return tm, tn, dp

    # Regime B: square-ish K tiling with a resident output accumulator.
    for t in divisors:
        fp = 2 * itemsize * (t * t + 2 * tm * t + 8 * t)
        if fp <= _VMEM_BUDGET:
            return tm, t, t
    return tm, divisors[-1], divisors[-1]


# --------------------------------------------------------------------------
# Wrapper
# --------------------------------------------------------------------------
@jax.jit
def zca_transform(x, zca_m, zca_T):
    """Apply ZCA whitening: ((x.reshape(N,-1) - m) @ T^T).reshape(x.shape)."""
    shape = x.shape
    n = shape[0]
    d = 1
    for s in shape[1:]:
        d *= s

    x_flat = x.reshape(n, d)

    # Fold the mean into a bias:  (x - m) @ T^T = x @ T^T - (T @ m).
    bias = jnp.dot(
        zca_T.astype(jnp.float32), zca_m.astype(jnp.float32),
        precision=lax.Precision.HIGHEST,
    ).reshape(1, d)

    itemsize = 4
    dp = _round_up(d, 256) if d >= 256 else _round_up(d, 128)
    tm, tn, tk = _pick_tiles(n, dp, itemsize)
    n_p = _round_up(n, tm)

    # Zero-pad to tile multiples; padded rows/cols are sliced off afterwards.
    T = zca_T
    if (n_p, dp) != (n, d):
        x_flat = jnp.pad(x_flat, ((0, n_p - n), (0, dp - d)))
    if dp != d:
        T = jnp.pad(T, ((0, dp - d), (0, dp - d)))
        bias = jnp.pad(bias, ((0, 0), (0, dp - d)))

    grid_n = n_p // tm
    grid_j = dp // tn

    cost = pl.CostEstimate(
        flops=2 * n_p * dp * dp,
        transcendentals=0,
        bytes_accessed=dp * dp * itemsize + 2 * n_p * dp * itemsize + dp * itemsize,
    )

    if tk == dp:
        # Single-pass regime: no reduction axis, no accumulator.
        grid = (grid_n, grid_j)
        in_specs = [
            pl.BlockSpec((tm, dp), lambda i, j: (i, 0)),   # x rows (full K, resident)
            pl.BlockSpec((tn, dp), lambda i, j: (j, 0)),   # T tile (rows of T)
            pl.BlockSpec((1, tn), lambda i, j: (0, j)),    # bias tile
        ]
        out_spec = pl.BlockSpec((tm, tn), lambda i, j: (i, j))
        kernel = _zca_kernel_single
        scratch = []
        dims = ("parallel", "parallel")
    else:
        # Reduction regime: k innermost, output block resident across k.
        grid_k = dp // tk
        grid = (grid_n, grid_j, grid_k)
        in_specs = [
            pl.BlockSpec((tm, tk), lambda i, j, k: (i, k)),
            pl.BlockSpec((tn, tk), lambda i, j, k: (j, k)),
            pl.BlockSpec((1, tn), lambda i, j, k: (0, j)),
        ]
        out_spec = pl.BlockSpec((tm, tn), lambda i, j, k: (i, j))
        if x.dtype == jnp.float32:
            kernel = _zca_kernel_reduce_f32
            scratch = []
        else:
            kernel = _zca_kernel_reduce_acc
            scratch = [pltpu.VMEM((tm, tn), jnp.float32)]
        dims = ("parallel", "parallel", "arbitrary")

    out_flat = pl.pallas_call(
        kernel,
        out_shape=jax.ShapeDtypeStruct((n_p, dp), x.dtype),
        grid=grid,
        in_specs=in_specs,
        out_specs=out_spec,
        scratch_shapes=scratch,
        compiler_params=pltpu.CompilerParams(
            dimension_semantics=dims,
            vmem_limit_bytes=48 * 1024 * 1024,
        ),
        cost_estimate=cost,
    )(x_flat, T, bias)

    if (n_p, dp) != (n, d):
        out_flat = out_flat[:n, :d]
    return out_flat.reshape(shape)


# --------------------------------------------------------------------------
# Synthetic parameter construction (mirrors load_zca_transform, no file I/O)
# --------------------------------------------------------------------------
def make_zca_params(key, d):
    """Build (mean, T) the same way load_zca_transform does, from synthetic data."""
    k_m, k_u, k_s = jax.random.split(key, 3)
    mean = jax.random.normal(k_m, (d,), dtype=jnp.float32) * 0.1
    u_raw = jax.random.normal(k_u, (d, d), dtype=jnp.float32)
    U, _ = jnp.linalg.qr(u_raw)
    S = jax.random.uniform(k_s, (d,), dtype=jnp.float32, minval=0.1, maxval=2.0)
    T = (U * (1.0 / (jnp.sqrt(S) + 1e-12))[None, :]) @ U.T
    return mean.astype(jnp.float32), T.astype(jnp.float32)


if __name__ == "__main__":
    key = jax.random.PRNGKey(0)
    k_x, k_p = jax.random.split(key)

    # Small shapes consistent with the module: NCHW image batch.
    N, C, H, W = 2, 4, 16, 16
    D = C * H * W  # 1024

    x = jax.random.normal(k_x, (N, C, H, W), dtype=jnp.float32)
    zca_m, zca_T = make_zca_params(k_p, D)

    out = zca_transform(x, zca_m, zca_T)
    out = jax.block_until_ready(out)

    # Pure-JAX reference of the PyTorch forward.
    ref = ((x.reshape(N, -1) - zca_m) @ zca_T.T).reshape(x.shape)
    assert out.shape == x.shape and out.dtype == x.dtype
    assert jnp.allclose(out, ref, atol=1e-3, rtol=1e-3), "mismatch vs reference"

    print("KERNEL_OK")
</pallas_src>

<mosaic_0001>
module attributes {stable_mosaic.version = 11 : i64} {
  func.func @_zca_kernel_single(%arg0: i32, %arg1: i32, %arg2: memref<2x1024xf32, #tpu.memory_space<vmem>>, %arg3: memref<1024x1024xf32, #tpu.memory_space<vmem>>, %arg4: memref<1x1024xf32, #tpu.memory_space<vmem>>, %arg5: memref<2x1024xf32, #tpu.memory_space<vmem>>) attributes {dimension_semantics = [#tpu.dimension_semantics<parallel>, #tpu.dimension_semantics<parallel>], iteration_bounds = array<i64: 1, 1>, scalar_prefetch = 0 : i64, scratch_operands = 0 : i64, tpu.core_type = #tpu.core_type<tc>, window_params = [{transform_indices = @transform_0, window_bounds = array<i64: 2, 1024>}, {transform_indices = @transform_1, window_bounds = array<i64: 1024, 1024>}, {transform_indices = @transform_2, window_bounds = array<i64: 1, 1024>}, {transform_indices = @transform_3, window_bounds = array<i64: 2, 1024>}]} {
    %c0 = arith.constant 0 : index
    %c0_0 = arith.constant 0 : index
    %0 = vector.load %arg2[%c0, %c0_0] : memref<2x1024xf32, #tpu.memory_space<vmem>>, vector<2x1024xf32>
    %c0_1 = arith.constant 0 : index
    %c0_2 = arith.constant 0 : index
    %1 = vector.load %arg3[%c0_1, %c0_2] : memref<1024x1024xf32, #tpu.memory_space<vmem>>, vector<1024x1024xf32>
    %cst = arith.constant dense<0.000000e+00> : vector<2x1024xf32>
    %2 = tpu.matmul %0, %1, %cst {dimension_numbers = #tpu.dot_dimension_numbers<[1], [1], [0], [0], [0, 0, 1, 0], [], []>} : vector<2x1024xf32>, vector<1024x1024xf32>, vector<2x1024xf32> -> vector<2x1024xf32>
    %c0_3 = arith.constant 0 : index
    %c0_4 = arith.constant 0 : index
    %3 = vector.load %arg4[%c0_3, %c0_4] : memref<1x1024xf32, #tpu.memory_space<vmem>>, vector<1x1024xf32>
    %4 = vector.broadcast %3 : vector<1x1024xf32> to vector<2x1024xf32>
    %5 = arith.subf %2, %4 : vector<2x1024xf32>
    %c0_5 = arith.constant 0 : index
    %c0_6 = arith.constant 0 : index
    %6 = vector.load %arg5[%c0_5, %c0_6] : memref<2x1024xf32, #tpu.memory_space<vmem>>, vector<2x1024xf32>
    tpu.vector_store %arg5[%c0_5, %c0_6], %5 {strides = array<i32>} : memref<2x1024xf32, #tpu.memory_space<vmem>>, vector<2x1024xf32>,
    return
  }
  func.func @transform_0(%arg0: i32, %arg1: i32) -> (i32, i32) {
    %c0_i32 = arith.constant 0 : i32
    %c0_i32_0 = arith.constant 0 : i32
    return %arg0, %c0_i32 : i32, i32
  }
  func.func @transform_1(%arg0: i32, %arg1: i32) -> (i32, i32) {
    %c0_i32 = arith.constant 0 : i32
    %c0_i32_0 = arith.constant 0 : i32
    return %arg1, %c0_i32 : i32, i32
  }
  func.func @transform_2(%arg0: i32, %arg1: i32) -> (i32, i32) {
    %c0_i32 = arith.constant 0 : i32
    %c0_i32_0 = arith.constant 0 : i32
    return %c0_i32, %arg1 : i32, i32
  }
  func.func @transform_3(%arg0: i32, %arg1: i32) -> (i32, i32) {
    %c0_i32 = arith.constant 0 : i32
    return %arg0, %arg1 : i32, i32
  }
}

</mosaic_0001>

<bundles_post_ra>
// kernel: zca_transform.1
= control target key start
LH: loop header
LB: loop body
LE: loop exit
PB: predicated region body
PF: predicated region fallthrough
CT: control target
= control target key end

     0   :  { %vm2381_vm0 = vcmask 1041408   ;;  %vm2383_vm1 = vcmask 1045508   ;;  %vm2385_vm2 = vcmask 1043456   ;;  %s5712_s1 = inlined_call_operand.vmem [shape: f32[1024,1024], index: 1, kind: input, shape index: {}]   ;;  %s5713_s0 = inlined_call_operand.vmem [shape: f32[2,1024], index: 0, kind: input, shape index: {}]   ;;  %s5714_s2 = inlined_call_operand.vmem [shape: f32[1,1024], index: 2, kind: input, shape index: {}]   ;;  %s5715_s3 = inlined_call_operand.vmem [shape: f32[2,1024], index: 3, kind: output, shape index: {}]  }
   0x1   :  { %v136_v0 = vld [vmem:[%s5712_s1 + $0x3c0] sm:$0xff]  ;;  %v138_v1 = vld [vmem:[%s5712_s1 + $0x3d0] sm:$0xff]  ;;  %v137_v2 = vld [vmem:[%s5712_s1 + $0x3c8] sm:$0xff] }
   0x2   :  { %1061 = vmatpush.xpose.msra.mxu0 %v136_v0  ;;  %1101 = vmatpush.xpose.msra.mxu2 %v138_v1  ;;  %v139_v3 = vld [vmem:[%s5712_s1 + $0x3d8] sm:$0xff]  ;;  %v128_v4 = vld [vmem:[%s5712_s1 + $0x380] sm:$0xff]  ;;  %v130_v5 = vld [vmem:[%s5712_s1 + $0x390] sm:$0xff] }
   0x3   :  { %1081 = vmatpush.xpose.msra.mxu1 %v137_v2  ;;  %1121 = vmatpush.xpose.msra.mxu3 %v139_v3  ;;  %v129_v6 = vld [vmem:[%s5712_s1 + $0x388] sm:$0xff]  ;;  %v131_v7 = vld [vmem:[%s5712_s1 + $0x398] sm:$0xff]  ;;  %v120_v8 = vld [vmem:[%s5712_s1 + $0x340] sm:$0xff] }
   0x4   :  { %v122_v9 = vld [vmem:[%s5712_s1 + $0x350] sm:$0xff]  ;;  %v121_v10 = vld [vmem:[%s5712_s1 + $0x348] sm:$0xff]  ;;  %v123_v11 = vld [vmem:[%s5712_s1 + $0x358] sm:$0xff] }
   0x5   :  { %v112_v12 = vld [vmem:[%s5712_s1 + $0x300] sm:$0xff]  ;;  %v114_v13 = vld [vmem:[%s5712_s1 + $0x310] sm:$0xff]  ;;  %v113_v14 = vld [vmem:[%s5712_s1 + $0x308] sm:$0xff] }
   0x6   :  { %1062 = vmatpush.xpose.msra.mxu0 %v128_v4  ;;  %1102 = vmatpush.xpose.msra.mxu2 %v130_v5  ;;  %v115_v15 = vld [vmem:[%s5712_s1 + $0x318] sm:$0xff]  ;;  %v104_v16 = vld [vmem:[%s5712_s1 + $0x2c0] sm:$0xff]  ;;  %v106_v17 = vld [vmem:[%s5712_s1 + $0x2d0] sm:$0xff] }
   0x7   :  { %1082 = vmatpush.xpose.msra.mxu1 %v129_v6  ;;  %1122 = vmatpush.xpose.msra.mxu3 %v131_v7  ;;  %v105_v18 = vld [vmem:[%s5712_s1 + $0x2c8] sm:$0xff]  ;;  %v107_v19 = vld [vmem:[%s5712_s1 + $0x2d8] sm:$0xff]  ;;  %v96_v20 = vld [vmem:[%s5712_s1 + $0x280] sm:$0xff] }
   0x8   :  { %v98_v21 = vld [vmem:[%s5712_s1 + $0x290] sm:$0xff]  ;;  %v97_v22 = vld [vmem:[%s5712_s1 + $0x288] sm:$0xff]  ;;  %v99_v23 = vld [vmem:[%s5712_s1 + $0x298] sm:$0xff] }
   0x9   :  { %v88_v24 = vld [vmem:[%s5712_s1 + $0x240] sm:$0xff]  ;;  %v90_v25 = vld [vmem:[%s5712_s1 + $0x250] sm:$0xff]  ;;  %v89_v26 = vld [vmem:[%s5712_s1 + $0x248] sm:$0xff] }
   0xa   :  { %1063 = vmatpush.xpose.msra.mxu0 %v120_v8  ;;  %1103 = vmatpush.xpose.msra.mxu2 %v122_v9  ;;  %v91_v27 = vld [vmem:[%s5712_s1 + $0x258] sm:$0xff]  ;;  %v80_v28 = vld [vmem:[%s5712_s1 + $0x200] sm:$0xff]  ;;  %v82_v29 = vld [vmem:[%s5712_s1 + $0x210] sm:$0xff] }
   0xb   :  { %1083 = vmatpush.xpose.msra.mxu1 %v121_v10  ;;  %1123 = vmatpush.xpose.msra.mxu3 %v123_v11  ;;  %v81_v30 = vld [vmem:[%s5712_s1 + $0x208] sm:$0xff]  ;;  %v83_v31 = vld [vmem:[%s5712_s1 + $0x218] sm:$0xff]  ;;  %v72_v32 = vld [vmem:[%s5712_s1 + $0x1c0] sm:$0xff] }
   0xc   :  { %v74_v33 = vld [vmem:[%s5712_s1 + $0x1d0] sm:$0xff]  ;;  %v73_v34 = vld [vmem:[%s5712_s1 + $0x1c8] sm:$0xff]  ;;  %v75_v35 = vld [vmem:[%s5712_s1 + $0x1d8] sm:$0xff] }
   0xd   :  { %v64_v36 = vld [vmem:[%s5712_s1 + $0x180] sm:$0xff]  ;;  %v66_v37 = vld [vmem:[%s5712_s1 + $0x190] sm:$0xff]  ;;  %v65_v38 = vld [vmem:[%s5712_s1 + $0x188] sm:$0xff] }
   0xe   :  { %1064 = vmatpush.xpose.msra.mxu0 %v112_v12  ;;  %1104 = vmatpush.xpose.msra.mxu2 %v114_v13  ;;  %v67_v39 = vld [vmem:[%s5712_s1 + $0x198] sm:$0xff]  ;;  %v56_v40 = vld [vmem:[%s5712_s1 + $0x140] sm:$0xff]  ;;  %v58_v41 = vld [vmem:[%s5712_s1 + $0x150] sm:$0xff] }
   0xf   :  { %1084 = vmatpush.xpose.msra.mxu1 %v113_v14  ;;  %1124 = vmatpush.xpose.msra.mxu3 %v115_v15  ;;  %v57_v42 = vld [vmem:[%s5712_s1 + $0x148] sm:$0xff]  ;;  %v59_v43 = vld [vmem:[%s5712_s1 + $0x158] sm:$0xff]  ;;  %v48_v44 = vld [vmem:[%s5712_s1 + $0x100] sm:$0xff] }
  0x10   :  { %v50_v45 = vld [vmem:[%s5712_s1 + $0x110] sm:$0xff]  ;;  %v49_v46 = vld [vmem:[%s5712_s1 + $0x108] sm:$0xff]  ;;  %v51_v47 = vld [vmem:[%s5712_s1 + $0x118] sm:$0xff] }
  0x11   :  { %v40_v48 = vld [vmem:[%s5712_s1 + $0xc0] sm:$0xff]  ;;  %v42_v49 = vld [vmem:[%s5712_s1 + $0xd0] sm:$0xff]  ;;  %v41_v50 = vld [vmem:[%s5712_s1 + $0xc8] sm:$0xff] }
  0x12   :  { %1065 = vmatpush.xpose.msra.mxu0 %v104_v16  ;;  %1105 = vmatpush.xpose.msra.mxu2 %v106_v17  ;;  %v43_v51 = vld [vmem:[%s5712_s1 + $0xd8] sm:$0xff]  ;;  %v32_v52 = vld [vmem:[%s5712_s1 + $0x80] sm:$0xff]  ;;  %v34_v53 = vld [vmem:[%s5712_s1 + $0x90] sm:$0xff] }
  0x13   :  { %1085 = vmatpush.xpose.msra.mxu1 %v105_v18  ;;  %1125 = vmatpush.xpose.msra.mxu3 %v107_v19  ;;  %v33_v54 = vld [vmem:[%s5712_s1 + $0x88] sm:$0xff]  ;;  %v35_v55 = vld [vmem:[%s5712_s1 + $0x98] sm:$0xff]  ;;  %v24_v56 = vld [vmem:[%s5712_s1 + $0x40] sm:$0xff] }
  0x14   :  { %v26_v57 = vld [vmem:[%s5712_s1 + $0x50] sm:$0xff]  ;;  %v25_v58 = vld [vmem:[%s5712_s1 + $0x48] sm:$0xff]  ;;  %v27_v59 = vld [vmem:[%s5712_s1 + $0x58] sm:$0xff] }
  0x15   :  { %v16_v60 = vld [vmem:[%s5712_s1] sm:$0xff]  ;;  %v18_v61 = vld [vmem:[%s5712_s1 + $0x10] sm:$0xff]  ;;  %v17_v0 = vld [vmem:[%s5712_s1 + $0x8] sm:$0xff] }
  0x16   :  { %1066 = vmatpush.xpose.msra.mxu0 %v96_v20  ;;  %1106 = vmatpush.xpose.msra.mxu2 %v98_v21  ;;  %v140_v62 = vld [vmem:[%s5712_s1 + $0x3e0] sm:$0xff]  ;;  %v142_v63 = vld [vmem:[%s5712_s1 + $0x3f0] sm:$0xff]  ;;  %v19_v1 = vld [vmem:[%s5712_s1 + $0x18] sm:$0xff] }
  0x17   :  { %1086 = vmatpush.xpose.msra.mxu1 %v97_v22  ;;  %1126 = vmatpush.xpose.msra.mxu3 %v99_v23  ;;  %v141_v2 = vld [vmem:[%s5712_s1 + $0x3e8] sm:$0xff]  ;;  %v143_v3 = vld [vmem:[%s5712_s1 + $0x3f8] sm:$0xff]  ;;  %v132_v4 = vld [vmem:[%s5712_s1 + $0x3a0] sm:$0xff] }
  0x18   :  { %v134_v5 = vld [vmem:[%s5712_s1 + $0x3b0] sm:$0xff]  ;;  %v133_v6 = vld [vmem:[%s5712_s1 + $0x3a8] sm:$0xff]  ;;  %v135_v7 = vld [vmem:[%s5712_s1 + $0x3b8] sm:$0xff] }
  0x19   :  { %v124_v8 = vld [vmem:[%s5712_s1 + $0x360] sm:$0xff]  ;;  %v126_v9 = vld [vmem:[%s5712_s1 + $0x370] sm:$0xff]  ;;  %v125_v10 = vld [vmem:[%s5712_s1 + $0x368] sm:$0xff] }
  0x1a   :  { %1067 = vmatpush.xpose.msra.mxu0 %v88_v24  ;;  %1107 = vmatpush.xpose.msra.mxu2 %v90_v25  ;;  %v127_v11 = vld [vmem:[%s5712_s1 + $0x378] sm:$0xff]  ;;  %v116_v12 = vld [vmem:[%s5712_s1 + $0x320] sm:$0xff]  ;;  %v118_v13 = vld [vmem:[%s5712_s1 + $0x330] sm:$0xff] }
  0x1b   :  { %1087 = vmatpush.xpose.msra.mxu1 %v89_v26  ;;  %1127 = vmatpush.xpose.msra.mxu3 %v91_v27  ;;  %v117_v14 = vld [vmem:[%s5712_s1 + $0x328] sm:$0xff]  ;;  %v119_v15 = vld [vmem:[%s5712_s1 + $0x338] sm:$0xff]  ;;  %v108_v16 = vld [vmem:[%s5712_s1 + $0x2e0] sm:$0xff] }
  0x1c   :  { %v110_v17 = vld [vmem:[%s5712_s1 + $0x2f0] sm:$0xff]  ;;  %v109_v18 = vld [vmem:[%s5712_s1 + $0x2e8] sm:$0xff]  ;;  %v111_v19 = vld [vmem:[%s5712_s1 + $0x2f8] sm:$0xff] }
  0x1d   :  { %v100_v20 = vld [vmem:[%s5712_s1 + $0x2a0] sm:$0xff]  ;;  %v102_v21 = vld [vmem:[%s5712_s1 + $0x2b0] sm:$0xff]  ;;  %v101_v23 = vld [vmem:[%s5712_s1 + $0x2a8] sm:$0xff] }
  0x1e   :  { %1068 = vmatpush.xpose.msra.mxu0 %v80_v28  ;;  %1108 = vmatpush.xpose.msra.mxu2 %v82_v29  ;;  %v14_v22 = vld [vmem:[%s5713_s0] sm:$0xff]  ;;  %v103_v24 = vld [vmem:[%s5712_s1 + $0x2b8] sm:$0xff]  ;;  %v94_v26 = vld [vmem:[%s5712_s1 + $0x270] sm:$0xff] }
  0x1f   :  { %1088 = vmatpush.xpose.msra.mxu1 %v81_v30  ;;  %1128 = vmatpush.xpose.msra.mxu3 %v83_v31  ;;  %1042 = vst [vmem:[#allocation1] ss:$4 sm:$0xff] %v14_v22  ;;  %v92_v25 = vld [vmem:[%s5712_s1 + $0x260] sm:$0xff]  ;;  %v93_v27 = vld [vmem:[%s5712_s1 + $0x268] sm:$0xff]  ;;  %v95_v28 = vld [vmem:[%s5712_s1 + $0x278] sm:$0xff] }
  0x20   :  { %v84_v29 = vld [vmem:[%s5712_s1 + $0x220] sm:$0xff]  ;;  %v86_v30 = vld [vmem:[%s5712_s1 + $0x230] sm:$0xff] }
  0x21   :  { %v240_v22 = vld [vmem:[%s5712_s1 + $0x700] sm:$0xff] }
  0x22   :  { %1069 = vmatpush.xpose.msra.mxu0 %v72_v32  ;;  %1109 = vmatpush.xpose.msra.mxu2 %v74_v33  ;;  %v15_v32 = vld [vmem:[%s5713_s0 + $0x8] sm:$0xff] }
  0x23   :  { %1089 = vmatpush.xpose.msra.mxu1 %v73_v34  ;;  %1129 = vmatpush.xpose.msra.mxu3 %v75_v35  ;;  %v85_v33 = vld [vmem:[%s5712_s1 + $0x228] sm:$0xff]  ;;  %v87_v34 = vld [vmem:[%s5712_s1 + $0x238] sm:$0xff]  ;;  %1044 = vst [vmem:[#allocation1 + $0x20] ss:$4 sm:$0xff] %v15_v32  ;;  %v226_v32 = vld [vmem:[%s5712_s1 + $0x690] sm:$0xff] }
  0x26   :  { %1070 = vmatpush.xpose.msra.mxu0 %v64_v36  ;;  %1110 = vmatpush.xpose.msra.mxu2 %v66_v37  ;;  %v2728_v31 = vld.sshfl [vmem:[#allocation1 + $0x10] sm:$0xff pattern:$0x73625140]  ;;  %v2740_v35 = vld.sshfl [vmem:[#allocation1] sm:$0xff pattern:$0x73625140] }
  0x27   :  { %1090 = vmatpush.xpose.msra.mxu1 %v65_v38  ;;  %1130 = vmatpush.xpose.msra.mxu3 %v67_v39  ;;  %v2742_v36 = vld.sshfl [vmem:[#allocation1 + $0x18] sm:$0xff pattern:$0x73625140]  ;;  %v76_v37 = vld [vmem:[%s5712_s1 + $0x1e0] sm:$0xff]  ;;  %v78_v38 = vld [vmem:[%s5712_s1 + $0x1f0] sm:$0xff] }
  0x28   :  { %v2752_v39 = vld.sshfl [vmem:[#allocation1 + $0x8] sm:$0xff pattern:$0x73625140] }
  0x2a   :  { %1071 = vmatpush.xpose.msra.mxu0 %v56_v40  ;;  %1111 = vmatpush.xpose.msra.mxu2 %v58_v41  ;;  %v77_v40 = vld [vmem:[%s5712_s1 + $0x1e8] sm:$0xff]  ;;  %v79_v41 = vld [vmem:[%s5712_s1 + $0x1f8] sm:$0xff] }
  0x2b   :  { %1091 = vmatpush.xpose.msra.mxu1 %v57_v42  ;;  %1131 = vmatpush.xpose.msra.mxu3 %v59_v43  ;;  %v68_v42 = vld [vmem:[%s5712_s1 + $0x1a0] sm:$0xff]  ;;  %v70_v43 = vld [vmem:[%s5712_s1 + $0x1b0] sm:$0xff] }
  0x2e   :  { %1072 = vmatpush.xpose.msra.mxu0 %v48_v44  ;;  %1112 = vmatpush.xpose.msra.mxu2 %v50_v45  ;;  %v69_v44 = vld [vmem:[%s5712_s1 + $0x1a8] sm:$0xff]  ;;  %v71_v45 = vld [vmem:[%s5712_s1 + $0x1b8] sm:$0xff] }
  0x2f   :  { %1092 = vmatpush.xpose.msra.mxu1 %v49_v46  ;;  %1132 = vmatpush.xpose.msra.mxu3 %v51_v47  ;;  %v60_v46 = vld [vmem:[%s5712_s1 + $0x160] sm:$0xff]  ;;  %v62_v47 = vld [vmem:[%s5712_s1 + $0x170] sm:$0xff] }
  0x32   :  { %1073 = vmatpush.xpose.msra.mxu0 %v40_v48  ;;  %1113 = vmatpush.xpose.msra.mxu2 %v42_v49  ;;  %v61_v48 = vld [vmem:[%s5712_s1 + $0x168] sm:$0xff]  ;;  %v63_v49 = vld [vmem:[%s5712_s1 + $0x178] sm:$0xff] }
  0x33   :  { %1093 = vmatpush.xpose.msra.mxu1 %v41_v50  ;;  %1133 = vmatpush.xpose.msra.mxu3 %v43_v51  ;;  %v52_v50 = vld [vmem:[%s5712_s1 + $0x120] sm:$0xff]  ;;  %v54_v51 = vld [vmem:[%s5712_s1 + $0x130] sm:$0xff] }
  0x36   :  { %1074 = vmatpush.xpose.msra.mxu0 %v32_v52  ;;  %1114 = vmatpush.xpose.msra.mxu2 %v34_v53  ;;  %v53_v52 = vld [vmem:[%s5712_s1 + $0x128] sm:$0xff]  ;;  %v55_v53 = vld [vmem:[%s5712_s1 + $0x138] sm:$0xff] }
  0x37   :  { %1094 = vmatpush.xpose.msra.mxu1 %v33_v54  ;;  %1134 = vmatpush.xpose.msra.mxu3 %v35_v55  ;;  %v44_v54 = vld [vmem:[%s5712_s1 + $0xe0] sm:$0xff]  ;;  %v46_v55 = vld [vmem:[%s5712_s1 + $0xf0] sm:$0xff] }
  0x3a   :  { %1075 = vmatpush.xpose.msra.mxu0 %v24_v56  ;;  %1115 = vmatpush.xpose.msra.mxu2 %v26_v57  ;;  %v45_v56 = vld [vmem:[%s5712_s1 + $0xe8] sm:$0xff]  ;;  %v47_v57 = vld [vmem:[%s5712_s1 + $0xf8] sm:$0xff] }
  0x3b   :  { %1095 = vmatpush.xpose.msra.mxu1 %v25_v58  ;;  %1135 = vmatpush.xpose.msra.mxu3 %v27_v59  ;;  %v36_v58 = vld [vmem:[%s5712_s1 + $0xa0] sm:$0xff]  ;;  %v38_v59 = vld [vmem:[%s5712_s1 + $0xb0] sm:$0xff] }
  0x3e   :  { %1076 = vmatpush.xpose.msra.mxu0 %v16_v60  ;;  %1116 = vmatpush.xpose.msra.mxu2 %v18_v61  ;;  %v37_v60 = vld [vmem:[%s5712_s1 + $0xa8] sm:$0xff]  ;;  %v39_v61 = vld [vmem:[%s5712_s1 + $0xb8] sm:$0xff] }
  0x3f   :  { %1096 = vmatpush.xpose.msra.mxu1 %v17_v0  ;;  %1136 = vmatpush.xpose.msra.mxu3 %v19_v1  ;;  %v29_v0 = vld [vmem:[%s5712_s1 + $0x68] sm:$0xff]  ;;  %v31_v1 = vld [vmem:[%s5712_s1 + $0x78] sm:$0xff] }
  0x41   :  { %1117 = vmatmul.f32.vlgmr.msra.gmra.mxu2 %v2728_v31  ;;  %1077 = vmatmul.f32.vlgmr.msra.gmra.mxu0 %v2740_v35 }
  0x42   :  { %1141 = vmatpush.xpose.msrb.mxu0 %v140_v62  ;;  %1181 = vmatpush.xpose.msrb.mxu2 %v142_v63  ;;  %v28_v62 = vld [vmem:[%s5712_s1 + $0x60] sm:$0xff]  ;;  %v30_v63 = vld [vmem:[%s5712_s1 + $0x70] sm:$0xff] }
  0x43   :  { %1161 = vmatpush.xpose.msrb.mxu1 %v141_v2  ;;  %1201 = vmatpush.xpose.msrb.mxu3 %v143_v3  ;;  %v20_v2 = vld [vmem:[%s5712_s1 + $0x20] sm:$0xff]  ;;  %v22_v3 = vld [vmem:[%s5712_s1 + $0x30] sm:$0xff] }
  0x44   :  { %1137 = vmatmul.f32.vlgmr.msra.gmra.mxu3 %v2742_v36  ;;  %1097 = vmatmul.f32.vlgmr.msra.gmra.mxu1 %v2752_v39 }
  0x46   :  { %1142 = vmatpush.xpose.msrb.mxu0 %v132_v4  ;;  %1182 = vmatpush.xpose.msrb.mxu2 %v134_v5  ;;  %v264_v4 = vld [vmem:[%s5712_s1 + $0x7c0] sm:$0xff]  ;;  %v266_v5 = vld [vmem:[%s5712_s1 + $0x7d0] sm:$0xff] }
  0x47   :  { %1162 = vmatpush.xpose.msrb.mxu1 %v133_v6  ;;  %1202 = vmatpush.xpose.msrb.mxu3 %v135_v7  ;;  %v21_v6 = vld [vmem:[%s5712_s1 + $0x28] sm:$0xff]  ;;  %v23_v7 = vld [vmem:[%s5712_s1 + $0x38] sm:$0xff] }
  0x4a   :  { %1143 = vmatpush.xpose.msrb.mxu0 %v124_v8  ;;  %1183 = vmatpush.xpose.msrb.mxu2 %v126_v9  ;;  %v265_v8 = vld [vmem:[%s5712_s1 + $0x7c8] sm:$0xff]  ;;  %v267_v9 = vld [vmem:[%s5712_s1 + $0x7d8] sm:$0xff] }
  0x4b   :  { %1163 = vmatpush.xpose.msrb.mxu1 %v125_v10  ;;  %1203 = vmatpush.xpose.msrb.mxu3 %v127_v11  ;;  %v2857_v10 = vld.sshfl [vmem:[#allocation1 + $0x30] sm:$0xff pattern:$0x73625140]  ;;  %v2859_v11 = vld.sshfl [vmem:[#allocation1 + $0x20] sm:$0xff pattern:$0x73625140] }
  0x4e   :  { %1144 = vmatpush.xpose.msrb.mxu0 %v116_v12  ;;  %1184 = vmatpush.xpose.msrb.mxu2 %v118_v13  ;;  %v256_v12 = vld [vmem:[%s5712_s1 + $0x780] sm:$0xff]  ;;  %v258_v13 = vld [vmem:[%s5712_s1 + $0x790] sm:$0xff] }
  0x4f   :  { %1164 = vmatpush.xpose.msrb.mxu1 %v117_v14  ;;  %1204 = vmatpush.xpose.msrb.mxu3 %v119_v15  ;;  %v2867_v14 = vld.sshfl [vmem:[#allocation1 + $0x38] sm:$0xff pattern:$0x73625140]  ;;  %v2869_v15 = vld.sshfl [vmem:[#allocation1 + $0x28] sm:$0xff pattern:$0x73625140] }
  0x52   :  { %1145 = vmatpush.xpose.msrb.mxu0 %v108_v16  ;;  %1185 = vmatpush.xpose.msrb.mxu2 %v110_v17  ;;  %v257_v16 = vld [vmem:[%s5712_s1 + $0x788] sm:$0xff]  ;;  %v259_v17 = vld [vmem:[%s5712_s1 + $0x798] sm:$0xff] }
  0x53   :  { %1165 = vmatpush.xpose.msrb.mxu1 %v109_v18  ;;  %1205 = vmatpush.xpose.msrb.mxu3 %v111_v19  ;;  %v248_v18 = vld [vmem:[%s5712_s1 + $0x740] sm:$0xff]  ;;  %v250_v19 = vld [vmem:[%s5712_s1 + $0x750] sm:$0xff] }
  0x56   :  { %1146 = vmatpush.xpose.msrb.mxu0 %v100_v20  ;;  %1186 = vmatpush.xpose.msrb.mxu2 %v102_v21  ;;  %v249_v20 = vld [vmem:[%s5712_s1 + $0x748] sm:$0xff]  ;;  %v251_v21 = vld [vmem:[%s5712_s1 + $0x758] sm:$0xff] }
  0x57   :  { %1166 = vmatpush.xpose.msrb.mxu1 %v101_v23  ;;  %1206 = vmatpush.xpose.msrb.mxu3 %v103_v24  ;;  %v242_v23 = vld [vmem:[%s5712_s1 + $0x710] sm:$0xff]  ;;  %v241_v24 = vld [vmem:[%s5712_s1 + $0x708] sm:$0xff] }
  0x5a   :  { %1147 = vmatpush.xpose.msrb.mxu0 %v92_v25  ;;  %1187 = vmatpush.xpose.msrb.mxu2 %v94_v26  ;;  %v243_v25 = vld [vmem:[%s5712_s1 + $0x718] sm:$0xff]  ;;  %v232_v26 = vld [vmem:[%s5712_s1 + $0x6c0] sm:$0xff] }
  0x5b   :  { %1167 = vmatpush.xpose.msrb.mxu1 %v93_v27  ;;  %1207 = vmatpush.xpose.msrb.mxu3 %v95_v28  ;;  %v234_v27 = vld [vmem:[%s5712_s1 + $0x6d0] sm:$0xff]  ;;  %v233_v28 = vld [vmem:[%s5712_s1 + $0x6c8] sm:$0xff] }
  0x5e   :  { %1148 = vmatpush.xpose.msrb.mxu0 %v84_v29  ;;  %1188 = vmatpush.xpose.msrb.mxu2 %v86_v30  ;;  %v235_v29 = vld [vmem:[%s5712_s1 + $0x6d8] sm:$0xff]  ;;  %v224_v30 = vld [vmem:[%s5712_s1 + $0x680] sm:$0xff] }
  0x5f   :  { %1168 = vmatpush.xpose.msrb.mxu1 %v85_v33  ;;  %1208 = vmatpush.xpose.msrb.mxu3 %v87_v34  ;;  %v225_v33 = vld [vmem:[%s5712_s1 + $0x688] sm:$0xff]  ;;  %v227_v34 = vld [vmem:[%s5712_s1 + $0x698] sm:$0xff] }
  0x62   :  { %1149 = vmatpush.xpose.msrb.mxu0 %v76_v37  ;;  %1189 = vmatpush.xpose.msrb.mxu2 %v78_v38  ;;  %v216_v37 = vld [vmem:[%s5712_s1 + $0x640] sm:$0xff]  ;;  %v218_v38 = vld [vmem:[%s5712_s1 + $0x650] sm:$0xff] }
  0x63   :  { %1169 = vmatpush.xpose.msrb.mxu1 %v77_v40  ;;  %1209 = vmatpush.xpose.msrb.mxu3 %v79_v41  ;;  %v217_v40 = vld [vmem:[%s5712_s1 + $0x648] sm:$0xff]  ;;  %v219_v41 = vld [vmem:[%s5712_s1 + $0x658] sm:$0xff] }
  0x66   :  { %1150 = vmatpush.xpose.msrb.mxu0 %v68_v42  ;;  %1190 = vmatpush.xpose.msrb.mxu2 %v70_v43  ;;  %v208_v42 = vld [vmem:[%s5712_s1 + $0x600] sm:$0xff]  ;;  %v210_v43 = vld [vmem:[%s5712_s1 + $0x610] sm:$0xff] }
  0x67   :  { %1170 = vmatpush.xpose.msrb.mxu1 %v69_v44  ;;  %1210 = vmatpush.xpose.msrb.mxu3 %v71_v45  ;;  %v209_v44 = vld [vmem:[%s5712_s1 + $0x608] sm:$0xff]  ;;  %v211_v45 = vld [vmem:[%s5712_s1 + $0x618] sm:$0xff] }
  0x6a   :  { %1151 = vmatpush.xpose.msrb.mxu0 %v60_v46  ;;  %1191 = vmatpush.xpose.msrb.mxu2 %v62_v47  ;;  %v200_v46 = vld [vmem:[%s5712_s1 + $0x5c0] sm:$0xff]  ;;  %v202_v47 = vld [vmem:[%s5712_s1 + $0x5d0] sm:$0xff] }
  0x6b   :  { %1171 = vmatpush.xpose.msrb.mxu1 %v61_v48  ;;  %1211 = vmatpush.xpose.msrb.mxu3 %v63_v49  ;;  %v201_v48 = vld [vmem:[%s5712_s1 + $0x5c8] sm:$0xff]  ;;  %v203_v49 = vld [vmem:[%s5712_s1 + $0x5d8] sm:$0xff] }
  0x6e   :  { %1152 = vmatpush.xpose.msrb.mxu0 %v52_v50  ;;  %1192 = vmatpush.xpose.msrb.mxu2 %v54_v51  ;;  %v192_v50 = vld [vmem:[%s5712_s1 + $0x580] sm:$0xff]  ;;  %v194_v51 = vld [vmem:[%s5712_s1 + $0x590] sm:$0xff] }
  0x6f   :  { %1172 = vmatpush.xpose.msrb.mxu1 %v53_v52  ;;  %1212 = vmatpush.xpose.msrb.mxu3 %v55_v53  ;;  %v193_v52 = vld [vmem:[%s5712_s1 + $0x588] sm:$0xff]  ;;  %v195_v53 = vld [vmem:[%s5712_s1 + $0x598] sm:$0xff] }
  0x72   :  { %1153 = vmatpush.xpose.msrb.mxu0 %v44_v54  ;;  %1193 = vmatpush.xpose.msrb.mxu2 %v46_v55  ;;  %v184_v54 = vld [vmem:[%s5712_s1 + $0x540] sm:$0xff]  ;;  %v186_v55 = vld [vmem:[%s5712_s1 + $0x550] sm:$0xff] }
  0x73   :  { %1173 = vmatpush.xpose.msrb.mxu1 %v45_v56  ;;  %1213 = vmatpush.xpose.msrb.mxu3 %v47_v57  ;;  %v185_v56 = vld [vmem:[%s5712_s1 + $0x548] sm:$0xff]  ;;  %v187_v57 = vld [vmem:[%s5712_s1 + $0x558] sm:$0xff] }
  0x76   :  { %1154 = vmatpush.xpose.msrb.mxu0 %v36_v58  ;;  %1194 = vmatpush.xpose.msrb.mxu2 %v38_v59  ;;  %v176_v58 = vld [vmem:[%s5712_s1 + $0x500] sm:$0xff]  ;;  %v178_v59 = vld [vmem:[%s5712_s1 + $0x510] sm:$0xff] }
  0x77   :  { %1174 = vmatpush.xpose.msrb.mxu1 %v37_v60  ;;  %1214 = vmatpush.xpose.msrb.mxu3 %v39_v61  ;;  %v177_v60 = vld [vmem:[%s5712_s1 + $0x508] sm:$0xff]  ;;  %v179_v61 = vld [vmem:[%s5712_s1 + $0x518] sm:$0xff] }
  0x7a   :  { %1155 = vmatpush.xpose.msrb.mxu0 %v28_v62  ;;  %1195 = vmatpush.xpose.msrb.mxu2 %v30_v63  ;;  %v168_v62 = vld [vmem:[%s5712_s1 + $0x4c0] sm:$0xff]  ;;  %v170_v63 = vld [vmem:[%s5712_s1 + $0x4d0] sm:$0xff] }
  0x7b   :  { %1175 = vmatpush.xpose.msrb.mxu1 %v29_v0  ;;  %1215 = vmatpush.xpose.msrb.mxu3 %v31_v1  ;;  %v169_v0 = vld [vmem:[%s5712_s1 + $0x4c8] sm:$0xff]  ;;  %v171_v1 = vld [vmem:[%s5712_s1 + $0x4d8] sm:$0xff] }
  0x7e   :  { %1156 = vmatpush.xpose.msrb.mxu0 %v20_v2  ;;  %1196 = vmatpush.xpose.msrb.mxu2 %v22_v3  ;;  %v160_v2 = vld [vmem:[%s5712_s1 + $0x480] sm:$0xff]  ;;  %v162_v3 = vld [vmem:[%s5712_s1 + $0x490] sm:$0xff] }
  0x7f   :  { %1176 = vmatpush.xpose.msrb.mxu1 %v21_v6  ;;  %1216 = vmatpush.xpose.msrb.mxu3 %v23_v7  ;;  %v152_v6 = vld [vmem:[%s5712_s1 + $0x440] sm:$0xff]  ;;  %v154_v7 = vld [vmem:[%s5712_s1 + $0x450] sm:$0xff] }
  0x81   :  { %1197 = vmatmul.f32.vlgmr.msrb.gmra.mxu2 %v2857_v10  ;;  %1157 = vmatmul.f32.vlgmr.msrb.gmra.mxu0 %v2859_v11 }
  0x82   :  { %1221 = vmatpush.xpose.msra.mxu0 %v264_v4  ;;  %1261 = vmatpush.xpose.msra.mxu2 %v266_v5  ;;  %v161_v4 = vld [vmem:[%s5712_s1 + $0x488] sm:$0xff]  ;;  %v163_v5 = vld [vmem:[%s5712_s1 + $0x498] sm:$0xff] }
  0x83   :  { %1241 = vmatpush.xpose.msra.mxu1 %v265_v8  ;;  %1281 = vmatpush.xpose.msra.mxu3 %v267_v9  ;;  %v153_v8 = vld [vmem:[%s5712_s1 + $0x448] sm:$0xff]  ;;  %v155_v9 = vld [vmem:[%s5712_s1 + $0x458] sm:$0xff] }
  0x84   :  { %1217 = vmatmul.f32.vlgmr.msrb.gmra.mxu3 %v2867_v14  ;;  %1177 = vmatmul.f32.vlgmr.msrb.gmra.mxu1 %v2869_v15 }
  0x86   :  { %1222 = vmatpush.xpose.msra.mxu0 %v256_v12  ;;  %1262 = vmatpush.xpose.msra.mxu2 %v258_v13  ;;  %v144_v12 = vld [vmem:[%s5712_s1 + $0x400] sm:$0xff]  ;;  %v146_v13 = vld [vmem:[%s5712_s1 + $0x410] sm:$0xff] }
  0x87   :  { %1242 = vmatpush.xpose.msra.mxu1 %v257_v16  ;;  %1282 = vmatpush.xpose.msra.mxu3 %v259_v17  ;;  %v268_v16 = vld [vmem:[%s5712_s1 + $0x7e0] sm:$0xff]  ;;  %v270_v17 = vld [vmem:[%s5712_s1 + $0x7f0] sm:$0xff] }
  0x8a   :  { %1223 = vmatpush.xpose.msra.mxu0 %v248_v18  ;;  %1263 = vmatpush.xpose.msra.mxu2 %v250_v19  ;;  %v145_v18 = vld [vmem:[%s5712_s1 + $0x408] sm:$0xff]  ;;  %v147_v19 = vld [vmem:[%s5712_s1 + $0x418] sm:$0xff] }
  0x8b   :  { %1243 = vmatpush.xpose.msra.mxu1 %v249_v20  ;;  %1283 = vmatpush.xpose.msra.mxu3 %v251_v21  ;;  %v269_v20 = vld [vmem:[%s5712_s1 + $0x7e8] sm:$0xff]  ;;  %v271_v21 = vld [vmem:[%s5712_s1 + $0x7f8] sm:$0xff] }
  0x8e   :  { %1224 = vmatpush.xpose.msra.mxu0 %v240_v22  ;;  %1264 = vmatpush.xpose.msra.mxu2 %v242_v23  ;;  %v260_v22 = vld [vmem:[%s5712_s1 + $0x7a0] sm:$0xff]  ;;  %v262_v23 = vld [vmem:[%s5712_s1 + $0x7b0] sm:$0xff] }
  0x8f   :  { %1244 = vmatpush.xpose.msra.mxu1 %v241_v24  ;;  %1284 = vmatpush.xpose.msra.mxu3 %v243_v25  ;;  %v261_v24 = vld [vmem:[%s5712_s1 + $0x7a8] sm:$0xff]  ;;  %v263_v25 = vld [vmem:[%s5712_s1 + $0x7b8] sm:$0xff] }
  0x92   :  { %1225 = vmatpush.xpose.msra.mxu0 %v232_v26  ;;  %1265 = vmatpush.xpose.msra.mxu2 %v234_v27  ;;  %v252_v26 = vld [vmem:[%s5712_s1 + $0x760] sm:$0xff]  ;;  %v254_v27 = vld [vmem:[%s5712_s1 + $0x770] sm:$0xff] }
  0x93   :  { %1245 = vmatpush.xpose.msra.mxu1 %v233_v28  ;;  %1285 = vmatpush.xpose.msra.mxu3 %v235_v29  ;;  %v253_v28 = vld [vmem:[%s5712_s1 + $0x768] sm:$0xff]  ;;  %v255_v29 = vld [vmem:[%s5712_s1 + $0x778] sm:$0xff] }
  0x96   :  { %1226 = vmatpush.xpose.msra.mxu0 %v224_v30  ;;  %1266 = vmatpush.xpose.msra.mxu2 %v226_v32  ;;  %v244_v30 = vld [vmem:[%s5712_s1 + $0x720] sm:$0xff]  ;;  %v246_v32 = vld [vmem:[%s5712_s1 + $0x730] sm:$0xff] }
  0x97   :  { %1246 = vmatpush.xpose.msra.mxu1 %v225_v33  ;;  %1286 = vmatpush.xpose.msra.mxu3 %v227_v34  ;;  %v245_v33 = vld [vmem:[%s5712_s1 + $0x728] sm:$0xff]  ;;  %v247_v34 = vld [vmem:[%s5712_s1 + $0x738] sm:$0xff] }
  0x9a   :  { %1227 = vmatpush.xpose.msra.mxu0 %v216_v37  ;;  %1267 = vmatpush.xpose.msra.mxu2 %v218_v38  ;;  %v236_v37 = vld [vmem:[%s5712_s1 + $0x6e0] sm:$0xff]  ;;  %v238_v38 = vld [vmem:[%s5712_s1 + $0x6f0] sm:$0xff] }
  0x9b   :  { %1247 = vmatpush.xpose.msra.mxu1 %v217_v40  ;;  %1287 = vmatpush.xpose.msra.mxu3 %v219_v41  ;;  %v237_v40 = vld [vmem:[%s5712_s1 + $0x6e8] sm:$0xff]  ;;  %v239_v41 = vld [vmem:[%s5712_s1 + $0x6f8] sm:$0xff] }
  0x9e   :  { %1228 = vmatpush.xpose.msra.mxu0 %v208_v42  ;;  %1268 = vmatpush.xpose.msra.mxu2 %v210_v43  ;;  %v228_v42 = vld [vmem:[%s5712_s1 + $0x6a0] sm:$0xff]  ;;  %v230_v43 = vld [vmem:[%s5712_s1 + $0x6b0] sm:$0xff] }
  0x9f   :  { %1248 = vmatpush.xpose.msra.mxu1 %v209_v44  ;;  %1288 = vmatpush.xpose.msra.mxu3 %v211_v45  ;;  %v229_v44 = vld [vmem:[%s5712_s1 + $0x6a8] sm:$0xff]  ;;  %v231_v45 = vld [vmem:[%s5712_s1 + $0x6b8] sm:$0xff] }
  0xa2   :  { %1229 = vmatpush.xpose.msra.mxu0 %v200_v46  ;;  %1269 = vmatpush.xpose.msra.mxu2 %v202_v47  ;;  %v220_v46 = vld [vmem:[%s5712_s1 + $0x660] sm:$0xff]  ;;  %v222_v47 = vld [vmem:[%s5712_s1 + $0x670] sm:$0xff] }
  0xa3   :  { %1249 = vmatpush.xpose.msra.mxu1 %v201_v48  ;;  %1289 = vmatpush.xpose.msra.mxu3 %v203_v49  ;;  %v221_v48 = vld [vmem:[%s5712_s1 + $0x668] sm:$0xff]  ;;  %v223_v49 = vld [vmem:[%s5712_s1 + $0x678] sm:$0xff] }
  0xa6   :  { %1230 = vmatpush.xpose.msra.mxu0 %v192_v50  ;;  %1270 = vmatpush.xpose.msra.mxu2 %v194_v51  ;;  %v212_v50 = vld [vmem:[%s5712_s1 + $0x620] sm:$0xff]  ;;  %v214_v51 = vld [vmem:[%s5712_s1 + $0x630] sm:$0xff] }
  0xa7   :  { %1250 = vmatpush.xpose.msra.mxu1 %v193_v52  ;;  %1290 = vmatpush.xpose.msra.mxu3 %v195_v53  ;;  %v213_v52 = vld [vmem:[%s5712_s1 + $0x628] sm:$0xff]  ;;  %v215_v53 = vld [vmem:[%s5712_s1 + $0x638] sm:$0xff] }
  0xaa   :  { %1231 = vmatpush.xpose.msra.mxu0 %v184_v54  ;;  %1271 = vmatpush.xpose.msra.mxu2 %v186_v55  ;;  %v204_v54 = vld [vmem:[%s5712_s1 + $0x5e0] sm:$0xff]  ;;  %v206_v55 = vld [vmem:[%s5712_s1 + $0x5f0] sm:$0xff] }
  0xab   :  { %1251 = vmatpush.xpose.msra.mxu1 %v185_v56  ;;  %1291 = vmatpush.xpose.msra.mxu3 %v187_v57  ;;  %v205_v56 = vld [vmem:[%s5712_s1 + $0x5e8] sm:$0xff]  ;;  %v207_v57 = vld [vmem:[%s5712_s1 + $0x5f8] sm:$0xff] }
  0xae   :  { %1232 = vmatpush.xpose.msra.mxu0 %v176_v58  ;;  %1272 = vmatpush.xpose.msra.mxu2 %v178_v59  ;;  %v196_v58 = vld [vmem:[%s5712_s1 + $0x5a0] sm:$0xff]  ;;  %v198_v59 = vld [vmem:[%s5712_s1 + $0x5b0] sm:$0xff] }
  0xaf   :  { %1252 = vmatpush.xpose.msra.mxu1 %v177_v60  ;;  %1292 = vmatpush.xpose.msra.mxu3 %v179_v61  ;;  %v197_v60 = vld [vmem:[%s5712_s1 + $0x5a8] sm:$0xff]  ;;  %v199_v61 = vld [vmem:[%s5712_s1 + $0x5b8] sm:$0xff] }
  0xb2   :  { %1233 = vmatpush.xpose.msra.mxu0 %v168_v62  ;;  %1273 = vmatpush.xpose.msra.mxu2 %v170_v63  ;;  %v188_v62 = vld [vmem:[%s5712_s1 + $0x560] sm:$0xff]  ;;  %v190_v63 = vld [vmem:[%s5712_s1 + $0x570] sm:$0xff] }
  0xb3   :  { %1253 = vmatpush.xpose.msra.mxu1 %v169_v0  ;;  %1293 = vmatpush.xpose.msra.mxu3 %v171_v1  ;;  %v189_v0 = vld [vmem:[%s5712_s1 + $0x568] sm:$0xff]  ;;  %v191_v1 = vld [vmem:[%s5712_s1 + $0x578] sm:$0xff] }
  0xb6   :  { %1234 = vmatpush.xpose.msra.mxu0 %v160_v2  ;;  %1274 = vmatpush.xpose.msra.mxu2 %v162_v3  ;;  %v180_v2 = vld [vmem:[%s5712_s1 + $0x520] sm:$0xff]  ;;  %v182_v3 = vld [vmem:[%s5712_s1 + $0x530] sm:$0xff] }
  0xb7   :  { %1254 = vmatpush.xpose.msra.mxu1 %v161_v4  ;;  %1294 = vmatpush.xpose.msra.mxu3 %v163_v5  ;;  %v181_v4 = vld [vmem:[%s5712_s1 + $0x528] sm:$0xff]  ;;  %v183_v5 = vld [vmem:[%s5712_s1 + $0x538] sm:$0xff] }
  0xba   :  { %1235 = vmatpush.xpose.msra.mxu0 %v152_v6  ;;  %1275 = vmatpush.xpose.msra.mxu2 %v154_v7  ;;  %v172_v6 = vld [vmem:[%s5712_s1 + $0x4e0] sm:$0xff]  ;;  %v174_v7 = vld [vmem:[%s5712_s1 + $0x4f0] sm:$0xff] }
  0xbb   :  { %1255 = vmatpush.xpose.msra.mxu1 %v153_v8  ;;  %1295 = vmatpush.xpose.msra.mxu3 %v155_v9  ;;  %v173_v8 = vld [vmem:[%s5712_s1 + $0x4e8] sm:$0xff]  ;;  %v175_v9 = vld [vmem:[%s5712_s1 + $0x4f8] sm:$0xff] }
  0xbe   :  { %1236 = vmatpush.xpose.msra.mxu0 %v144_v12  ;;  %1276 = vmatpush.xpose.msra.mxu2 %v146_v13  ;;  %v164_v12 = vld [vmem:[%s5712_s1 + $0x4a0] sm:$0xff]  ;;  %v166_v13 = vld [vmem:[%s5712_s1 + $0x4b0] sm:$0xff] }
  0xbf   :  { %1256 = vmatpush.xpose.msra.mxu1 %v145_v18  ;;  %1296 = vmatpush.xpose.msra.mxu3 %v147_v19  ;;  %v156_v18 = vld [vmem:[%s5712_s1 + $0x460] sm:$0xff]  ;;  %v158_v19 = vld [vmem:[%s5712_s1 + $0x470] sm:$0xff] }
  0xc1   :  { %1277 = vmatmul.f32.vlgmr.msra.gmra.mxu2 %v2728_v31  ;;  %1237 = vmatmul.f32.vlgmr.msra.gmra.mxu0 %v2740_v35 }
  0xc2   :  { %1301 = vmatpush.xpose.msrb.mxu0 %v268_v16  ;;  %1341 = vmatpush.xpose.msrb.mxu2 %v270_v17  ;;  %v165_v16 = vld [vmem:[%s5712_s1 + $0x4a8] sm:$0xff]  ;;  %v167_v17 = vld [vmem:[%s5712_s1 + $0x4b8] sm:$0xff] }
  0xc3   :  { %1321 = vmatpush.xpose.msrb.mxu1 %v269_v20  ;;  %1361 = vmatpush.xpose.msrb.mxu3 %v271_v21  ;;  %v157_v20 = vld [vmem:[%s5712_s1 + $0x468] sm:$0xff]  ;;  %v159_v21 = vld [vmem:[%s5712_s1 + $0x478] sm:$0xff] }
  0xc4   :  { %1297 = vmatmul.f32.vlgmr.msra.gmra.mxu3 %v2742_v36  ;;  %1257 = vmatmul.f32.vlgmr.msra.gmra.mxu1 %v2752_v39 }
  0xc6   :  { %1302 = vmatpush.xpose.msrb.mxu0 %v260_v22  ;;  %1342 = vmatpush.xpose.msrb.mxu2 %v262_v23  ;;  %v148_v22 = vld [vmem:[%s5712_s1 + $0x420] sm:$0xff]  ;;  %v150_v23 = vld [vmem:[%s5712_s1 + $0x430] sm:$0xff] }
  0xc7   :  { %1322 = vmatpush.xpose.msrb.mxu1 %v261_v24  ;;  %1362 = vmatpush.xpose.msrb.mxu3 %v263_v25  ;;  %v392_v24 = vld [vmem:[%s5712_s1 + $0xbc0] sm:$0xff]  ;;  %v394_v25 = vld [vmem:[%s5712_s1 + $0xbd0] sm:$0xff] }
  0xca   :  { %1303 = vmatpush.xpose.msrb.mxu0 %v252_v26  ;;  %1343 = vmatpush.xpose.msrb.mxu2 %v254_v27  ;;  %v149_v26 = vld [vmem:[%s5712_s1 + $0x428] sm:$0xff]  ;;  %v151_v27 = vld [vmem:[%s5712_s1 + $0x438] sm:$0xff] }
  0xcb   :  { %1323 = vmatpush.xpose.msrb.mxu1 %v253_v28  ;;  %1363 = vmatpush.xpose.msrb.mxu3 %v255_v29  ;;  %v393_v28 = vld [vmem:[%s5712_s1 + $0xbc8] sm:$0xff]  ;;  %v395_v29 = vld [vmem:[%s5712_s1 + $0xbd8] sm:$0xff] }
  0xce   :  { %1304 = vmatpush.xpose.msrb.mxu0 %v244_v30  ;;  %1344 = vmatpush.xpose.msrb.mxu2 %v246_v32  ;;  %v384_v30 = vld [vmem:[%s5712_s1 + $0xb80] sm:$0xff]  ;;  %v386_v32 = vld [vmem:[%s5712_s1 + $0xb90] sm:$0xff] }
  0xcf   :  { %1324 = vmatpush.xpose.msrb.mxu1 %v245_v33  ;;  %1364 = vmatpush.xpose.msrb.mxu3 %v247_v34  ;;  %v385_v33 = vld [vmem:[%s5712_s1 + $0xb88] sm:$0xff]  ;;  %v387_v34 = vld [vmem:[%s5712_s1 + $0xb98] sm:$0xff] }
  0xd2   :  { %1305 = vmatpush.xpose.msrb.mxu0 %v236_v37  ;;  %1345 = vmatpush.xpose.msrb.mxu2 %v238_v38  ;;  %v379_v37 = vld [vmem:[%s5712_s1 + $0xb58] sm:$0xff]  ;;  %v370_v38 = vld [vmem:[%s5712_s1 + $0xb10] sm:$0xff] }
  0xd3   :  { %1325 = vmatpush.xpose.msrb.mxu1 %v237_v40  ;;  %1365 = vmatpush.xpose.msrb.mxu3 %v239_v41  ;;  %v369_v40 = vld [vmem:[%s5712_s1 + $0xb08] sm:$0xff]  ;;  %v371_v41 = vld [vmem:[%s5712_s1 + $0xb18] sm:$0xff] }
  0xd6   :  { %1306 = vmatpush.xpose.msrb.mxu0 %v228_v42  ;;  %1346 = vmatpush.xpose.msrb.mxu2 %v230_v43  ;;  %v360_v42 = vld [vmem:[%s5712_s1 + $0xac0] sm:$0xff]  ;;  %v362_v43 = vld [vmem:[%s5712_s1 + $0xad0] sm:$0xff] }
  0xd7   :  { %1326 = vmatpush.xpose.msrb.mxu1 %v229_v44  ;;  %1366 = vmatpush.xpose.msrb.mxu3 %v231_v45  ;;  %v361_v44 = vld [vmem:[%s5712_s1 + $0xac8] sm:$0xff]  ;;  %v363_v45 = vld [vmem:[%s5712_s1 + $0xad8] sm:$0xff] }
  0xda   :  { %1307 = vmatpush.xpose.msrb.mxu0 %v220_v46  ;;  %1347 = vmatpush.xpose.msrb.mxu2 %v222_v47  ;;  %v352_v46 = vld [vmem:[%s5712_s1 + $0xa80] sm:$0xff]  ;;  %v354_v47 = vld [vmem:[%s5712_s1 + $0xa90] sm:$0xff] }
  0xdb   :  { %1327 = vmatpush.xpose.msrb.mxu1 %v221_v48  ;;  %1367 = vmatpush.xpose.msrb.mxu3 %v223_v49  ;;  %v353_v48 = vld [vmem:[%s5712_s1 + $0xa88] sm:$0xff]  ;;  %v355_v49 = vld [vmem:[%s5712_s1 + $0xa98] sm:$0xff] }
  0xde   :  { %1308 = vmatpush.xpose.msrb.mxu0 %v212_v50  ;;  %1348 = vmatpush.xpose.msrb.mxu2 %v214_v51  ;;  %v344_v50 = vld [vmem:[%s5712_s1 + $0xa40] sm:$0xff]  ;;  %v346_v51 = vld [vmem:[%s5712_s1 + $0xa50] sm:$0xff] }
  0xdf   :  { %1328 = vmatpush.xpose.msrb.mxu1 %v213_v52  ;;  %1368 = vmatpush.xpose.msrb.mxu3 %v215_v53  ;;  %v345_v52 = vld [vmem:[%s5712_s1 + $0xa48] sm:$0xff]  ;;  %v347_v53 = vld [vmem:[%s5712_s1 + $0xa58] sm:$0xff] }
  0xe2   :  { %1309 = vmatpush.xpose.msrb.mxu0 %v204_v54  ;;  %1349 = vmatpush.xpose.msrb.mxu2 %v206_v55  ;;  %v336_v54 = vld [vmem:[%s5712_s1 + $0xa00] sm:$0xff]  ;;  %v338_v55 = vld [vmem:[%s5712_s1 + $0xa10] sm:$0xff] }
  0xe3   :  { %1329 = vmatpush.xpose.msrb.mxu1 %v205_v56  ;;  %1369 = vmatpush.xpose.msrb.mxu3 %v207_v57  ;;  %v337_v56 = vld [vmem:[%s5712_s1 + $0xa08] sm:$0xff]  ;;  %v339_v57 = vld [vmem:[%s5712_s1 + $0xa18] sm:$0xff] }
  0xe6   :  { %1310 = vmatpush.xpose.msrb.mxu0 %v196_v58  ;;  %1350 = vmatpush.xpose.msrb.mxu2 %v198_v59  ;;  %v328_v58 = vld [vmem:[%s5712_s1 + $0x9c0] sm:$0xff]  ;;  %v330_v59 = vld [vmem:[%s5712_s1 + $0x9d0] sm:$0xff] }
  0xe7   :  { %1330 = vmatpush.xpose.msrb.mxu1 %v197_v60  ;;  %1370 = vmatpush.xpose.msrb.mxu3 %v199_v61  ;;  %v329_v60 = vld [vmem:[%s5712_s1 + $0x9c8] sm:$0xff]  ;;  %v331_v61 = vld [vmem:[%s5712_s1 + $0x9d8] sm:$0xff] }
  0xea   :  { %1311 = vmatpush.xpose.msrb.mxu0 %v188_v62  ;;  %1351 = vmatpush.xpose.msrb.mxu2 %v190_v63  ;;  %v320_v62 = vld [vmem:[%s5712_s1 + $0x980] sm:$0xff]  ;;  %v322_v63 = vld [vmem:[%s5712_s1 + $0x990] sm:$0xff] }
  0xeb   :  { %1331 = vmatpush.xpose.msrb.mxu1 %v189_v0  ;;  %1371 = vmatpush.xpose.msrb.mxu3 %v191_v1  ;;  %v321_v0 = vld [vmem:[%s5712_s1 + $0x988] sm:$0xff]  ;;  %v323_v1 = vld [vmem:[%s5712_s1 + $0x998] sm:$0xff] }
  0xee   :  { %1312 = vmatpush.xpose.msrb.mxu0 %v180_v2  ;;  %1352 = vmatpush.xpose.msrb.mxu2 %v182_v3  ;;  %v312_v2 = vld [vmem:[%s5712_s1 + $0x940] sm:$0xff]  ;;  %v314_v3 = vld [vmem:[%s5712_s1 + $0x950] sm:$0xff] }
  0xef   :  { %1332 = vmatpush.xpose.msrb.mxu1 %v181_v4  ;;  %1372 = vmatpush.xpose.msrb.mxu3 %v183_v5  ;;  %v313_v4 = vld [vmem:[%s5712_s1 + $0x948] sm:$0xff]  ;;  %v315_v5 = vld [vmem:[%s5712_s1 + $0x958] sm:$0xff] }
  0xf2   :  { %1313 = vmatpush.xpose.msrb.mxu0 %v172_v6  ;;  %1353 = vmatpush.xpose.msrb.mxu2 %v174_v7  ;;  %v304_v6 = vld [vmem:[%s5712_s1 + $0x900] sm:$0xff]  ;;  %v306_v7 = vld [vmem:[%s5712_s1 + $0x910] sm:$0xff] }
  0xf3   :  { %1333 = vmatpush.xpose.msrb.mxu1 %v173_v8  ;;  %1373 = vmatpush.xpose.msrb.mxu3 %v175_v9  ;;  %v305_v8 = vld [vmem:[%s5712_s1 + $0x908] sm:$0xff]  ;;  %v307_v9 = vld [vmem:[%s5712_s1 + $0x918] sm:$0xff] }
  0xf6   :  { %1314 = vmatpush.xpose.msrb.mxu0 %v164_v12  ;;  %1354 = vmatpush.xpose.msrb.mxu2 %v166_v13  ;;  %v296_v12 = vld [vmem:[%s5712_s1 + $0x8c0] sm:$0xff]  ;;  %v298_v13 = vld [vmem:[%s5712_s1 + $0x8d0] sm:$0xff] }
  0xf7   :  { %1334 = vmatpush.xpose.msrb.mxu1 %v165_v16  ;;  %1374 = vmatpush.xpose.msrb.mxu3 %v167_v17  ;;  %v297_v16 = vld [vmem:[%s5712_s1 + $0x8c8] sm:$0xff]  ;;  %v299_v17 = vld [vmem:[%s5712_s1 + $0x8d8] sm:$0xff] }
  0xfa   :  { %1315 = vmatpush.xpose.msrb.mxu0 %v156_v18  ;;  %1355 = vmatpush.xpose.msrb.mxu2 %v158_v19  ;;  %v288_v18 = vld [vmem:[%s5712_s1 + $0x880] sm:$0xff]  ;;  %v290_v19 = vld [vmem:[%s5712_s1 + $0x890] sm:$0xff] }
  0xfb   :  { %1335 = vmatpush.xpose.msrb.mxu1 %v157_v20  ;;  %1375 = vmatpush.xpose.msrb.mxu3 %v159_v21  ;;  %v289_v20 = vld [vmem:[%s5712_s1 + $0x888] sm:$0xff]  ;;  %v291_v21 = vld [vmem:[%s5712_s1 + $0x898] sm:$0xff] }
  0xfe   :  { %1316 = vmatpush.xpose.msrb.mxu0 %v148_v22  ;;  %1356 = vmatpush.xpose.msrb.mxu2 %v150_v23  ;;  %v280_v22 = vld [vmem:[%s5712_s1 + $0x840] sm:$0xff]  ;;  %v282_v23 = vld [vmem:[%s5712_s1 + $0x850] sm:$0xff] }
  0xff   :  { %1336 = vmatpush.xpose.msrb.mxu1 %v149_v26  ;;  %1376 = vmatpush.xpose.msrb.mxu3 %v151_v27  ;;  %v272_v26 = vld [vmem:[%s5712_s1 + $0x800] sm:$0xff]  ;;  %v274_v27 = vld [vmem:[%s5712_s1 + $0x810] sm:$0xff] }
 0x101   :  { %1357 = vmatmul.f32.vlgmr.msrb.gmra.mxu2 %v2857_v10  ;;  %1317 = vmatmul.f32.vlgmr.msrb.gmra.mxu0 %v2859_v11  ;;  %v376_v10 = vld [vmem:[%s5712_s1 + $0xb40] sm:$0xff]  ;;  %v378_v11 = vld [vmem:[%s5712_s1 + $0xb50] sm:$0xff] }
 0x102   :  { %1381 = vmatpush.xpose.msra.mxu0 %v392_v24  ;;  %1421 = vmatpush.xpose.msra.mxu2 %v394_v25  ;;  %v281_v24 = vld [vmem:[%s5712_s1 + $0x848] sm:$0xff]  ;;  %v283_v25 = vld [vmem:[%s5712_s1 + $0x858] sm:$0xff] }
 0x103   :  { %1401 = vmatpush.xpose.msra.mxu1 %v393_v28  ;;  %1441 = vmatpush.xpose.msra.mxu3 %v395_v29  ;;  %v396_v28 = vld [vmem:[%s5712_s1 + $0xbe0] sm:$0xff]  ;;  %v398_v29 = vld [vmem:[%s5712_s1 + $0xbf0] sm:$0xff] }
 0x104   :  { %1377 = vmatmul.f32.vlgmr.msrb.gmra.mxu3 %v2867_v14  ;;  %1337 = vmatmul.f32.vlgmr.msrb.gmra.mxu1 %v2869_v15  ;;  %v377_v14 = vld [vmem:[%s5712_s1 + $0xb48] sm:$0xff]  ;;  %v368_v15 = vld [vmem:[%s5712_s1 + $0xb00] sm:$0xff] }
 0x106   :  { %1382 = vmatpush.xpose.msra.mxu0 %v384_v30  ;;  %1422 = vmatpush.xpose.msra.mxu2 %v386_v32  ;;  %v273_v30 = vld [vmem:[%s5712_s1 + $0x808] sm:$0xff]  ;;  %v275_v32 = vld [vmem:[%s5712_s1 + $0x818] sm:$0xff] }
 0x107   :  { %1402 = vmatpush.xpose.msra.mxu1 %v385_v33  ;;  %1442 = vmatpush.xpose.msra.mxu3 %v387_v34  ;;  %v397_v33 = vld [vmem:[%s5712_s1 + $0xbe8] sm:$0xff]  ;;  %v399_v34 = vld [vmem:[%s5712_s1 + $0xbf8] sm:$0xff] }
 0x10a   :  { %1383 = vmatpush.xpose.msra.mxu0 %v376_v10  ;;  %1423 = vmatpush.xpose.msra.mxu2 %v378_v11  ;;  %v388_v10 = vld [vmem:[%s5712_s1 + $0xba0] sm:$0xff]  ;;  %v390_v11 = vld [vmem:[%s5712_s1 + $0xbb0] sm:$0xff] }
 0x10b   :  { %1403 = vmatpush.xpose.msra.mxu1 %v377_v14  ;;  %1443 = vmatpush.xpose.msra.mxu3 %v379_v37  ;;  %v389_v14 = vld [vmem:[%s5712_s1 + $0xba8] sm:$0xff]  ;;  %v391_v37 = vld [vmem:[%s5712_s1 + $0xbb8] sm:$0xff] }
 0x10e   :  { %1384 = vmatpush.xpose.msra.mxu0 %v368_v15  ;;  %1424 = vmatpush.xpose.msra.mxu2 %v370_v38  ;;  %v380_v15 = vld [vmem:[%s5712_s1 + $0xb60] sm:$0xff]  ;;  %v382_v38 = vld [vmem:[%s5712_s1 + $0xb70] sm:$0xff] }
 0x10f   :  { %1404 = vmatpush.xpose.msra.mxu1 %v369_v40  ;;  %1444 = vmatpush.xpose.msra.mxu3 %v371_v41  ;;  %v373_v40 = vld [vmem:[%s5712_s1 + $0xb28] sm:$0xff]  ;;  %v375_v41 = vld [vmem:[%s5712_s1 + $0xb38] sm:$0xff] }
 0x112   :  { %1385 = vmatpush.xpose.msra.mxu0 %v360_v42  ;;  %1425 = vmatpush.xpose.msra.mxu2 %v362_v43  ;;  %v364_v42 = vld [vmem:[%s5712_s1 + $0xae0] sm:$0xff]  ;;  %v366_v43 = vld [vmem:[%s5712_s1 + $0xaf0] sm:$0xff] }
 0x113   :  { %1405 = vmatpush.xpose.msra.mxu1 %v361_v44  ;;  %1445 = vmatpush.xpose.msra.mxu3 %v363_v45  ;;  %v365_v44 = vld [vmem:[%s5712_s1 + $0xae8] sm:$0xff]  ;;  %v367_v45 = vld [vmem:[%s5712_s1 + $0xaf8] sm:$0xff] }
 0x116   :  { %1386 = vmatpush.xpose.msra.mxu0 %v352_v46  ;;  %1426 = vmatpush.xpose.msra.mxu2 %v354_v47  ;;  %v356_v46 = vld [vmem:[%s5712_s1 + $0xaa0] sm:$0xff]  ;;  %v358_v47 = vld [vmem:[%s5712_s1 + $0xab0] sm:$0xff] }
 0x117   :  { %1406 = vmatpush.xpose.msra.mxu1 %v353_v48  ;;  %1446 = vmatpush.xpose.msra.mxu3 %v355_v49  ;;  %v357_v48 = vld [vmem:[%s5712_s1 + $0xaa8] sm:$0xff]  ;;  %v359_v49 = vld [vmem:[%s5712_s1 + $0xab8] sm:$0xff] }
 0x11a   :  { %1387 = vmatpush.xpose.msra.mxu0 %v344_v50  ;;  %1427 = vmatpush.xpose.msra.mxu2 %v346_v51  ;;  %v348_v50 = vld [vmem:[%s5712_s1 + $0xa60] sm:$0xff]  ;;  %v350_v51 = vld [vmem:[%s5712_s1 + $0xa70] sm:$0xff] }
 0x11b   :  { %1407 = vmatpush.xpose.msra.mxu1 %v345_v52  ;;  %1447 = vmatpush.xpose.msra.mxu3 %v347_v53  ;;  %v349_v52 = vld [vmem:[%s5712_s1 + $0xa68] sm:$0xff]  ;;  %v351_v53 = vld [vmem:[%s5712_s1 + $0xa78] sm:$0xff] }
 0x11e   :  { %1388 = vmatpush.xpose.msra.mxu0 %v336_v54  ;;  %1428 = vmatpush.xpose.msra.mxu2 %v338_v55  ;;  %v340_v54 = vld [vmem:[%s5712_s1 + $0xa20] sm:$0xff]  ;;  %v342_v55 = vld [vmem:[%s5712_s1 + $0xa30] sm:$0xff] }
 0x11f   :  { %1408 = vmatpush.xpose.msra.mxu1 %v337_v56  ;;  %1448 = vmatpush.xpose.msra.mxu3 %v339_v57  ;;  %v341_v56 = vld [vmem:[%s5712_s1 + $0xa28] sm:$0xff]  ;;  %v343_v57 = vld [vmem:[%s5712_s1 + $0xa38] sm:$0xff] }
 0x122   :  { %1389 = vmatpush.xpose.msra.mxu0 %v328_v58  ;;  %1429 = vmatpush.xpose.msra.mxu2 %v330_v59  ;;  %v332_v58 = vld [vmem:[%s5712_s1 + $0x9e0] sm:$0xff]  ;;  %v334_v59 = vld [vmem:[%s5712_s1 + $0x9f0] sm:$0xff] }
 0x123   :  { %1409 = vmatpush.xpose.msra.mxu1 %v329_v60  ;;  %1449 = vmatpush.xpose.msra.mxu3 %v331_v61  ;;  %v333_v60 = vld [vmem:[%s5712_s1 + $0x9e8] sm:$0xff]  ;;  %v335_v61 = vld [vmem:[%s5712_s1 + $0x9f8] sm:$0xff] }
 0x126   :  { %1390 = vmatpush.xpose.msra.mxu0 %v320_v62  ;;  %1430 = vmatpush.xpose.msra.mxu2 %v322_v63  ;;  %v324_v62 = vld [vmem:[%s5712_s1 + $0x9a0] sm:$0xff]  ;;  %v326_v63 = vld [vmem:[%s5712_s1 + $0x9b0] sm:$0xff] }
 0x127   :  { %1410 = vmatpush.xpose.msra.mxu1 %v321_v0  ;;  %1450 = vmatpush.xpose.msra.mxu3 %v323_v1  ;;  %v325_v0 = vld [vmem:[%s5712_s1 + $0x9a8] sm:$0xff]  ;;  %v327_v1 = vld [vmem:[%s5712_s1 + $0x9b8] sm:$0xff] }
 0x12a   :  { %1391 = vmatpush.xpose.msra.mxu0 %v312_v2  ;;  %1431 = vmatpush.xpose.msra.mxu2 %v314_v3  ;;  %v316_v2 = vld [vmem:[%s5712_s1 + $0x960] sm:$0xff]  ;;  %v318_v3 = vld [vmem:[%s5712_s1 + $0x970] sm:$0xff] }
 0x12b   :  { %1411 = vmatpush.xpose.msra.mxu1 %v313_v4  ;;  %1451 = vmatpush.xpose.msra.mxu3 %v315_v5  ;;  %v317_v4 = vld [vmem:[%s5712_s1 + $0x968] sm:$0xff]  ;;  %v319_v5 = vld [vmem:[%s5712_s1 + $0x978] sm:$0xff] }
 0x12e   :  { %1392 = vmatpush.xpose.msra.mxu0 %v304_v6  ;;  %1432 = vmatpush.xpose.msra.mxu2 %v306_v7  ;;  %v308_v6 = vld [vmem:[%s5712_s1 + $0x920] sm:$0xff]  ;;  %v310_v7 = vld [vmem:[%s5712_s1 + $0x930] sm:$0xff] }
 0x12f   :  { %1412 = vmatpush.xpose.msra.mxu1 %v305_v8  ;;  %1452 = vmatpush.xpose.msra.mxu3 %v307_v9  ;;  %v309_v8 = vld [vmem:[%s5712_s1 + $0x928] sm:$0xff]  ;;  %v311_v9 = vld [vmem:[%s5712_s1 + $0x938] sm:$0xff] }
 0x132   :  { %1393 = vmatpush.xpose.msra.mxu0 %v296_v12  ;;  %1433 = vmatpush.xpose.msra.mxu2 %v298_v13  ;;  %v300_v12 = vld [vmem:[%s5712_s1 + $0x8e0] sm:$0xff]  ;;  %v302_v13 = vld [vmem:[%s5712_s1 + $0x8f0] sm:$0xff] }
 0x133   :  { %1413 = vmatpush.xpose.msra.mxu1 %v297_v16  ;;  %1453 = vmatpush.xpose.msra.mxu3 %v299_v17  ;;  %v301_v16 = vld [vmem:[%s5712_s1 + $0x8e8] sm:$0xff]  ;;  %v303_v17 = vld [vmem:[%s5712_s1 + $0x8f8] sm:$0xff] }
 0x136   :  { %1394 = vmatpush.xpose.msra.mxu0 %v288_v18  ;;  %1434 = vmatpush.xpose.msra.mxu2 %v290_v19  ;;  %v292_v18 = vld [vmem:[%s5712_s1 + $0x8a0] sm:$0xff]  ;;  %v294_v19 = vld [vmem:[%s5712_s1 + $0x8b0] sm:$0xff] }
 0x137   :  { %1414 = vmatpush.xpose.msra.mxu1 %v289_v20  ;;  %1454 = vmatpush.xpose.msra.mxu3 %v291_v21  ;;  %v293_v20 = vld [vmem:[%s5712_s1 + $0x8a8] sm:$0xff]  ;;  %v295_v21 = vld [vmem:[%s5712_s1 + $0x8b8] sm:$0xff] }
 0x13a   :  { %1395 = vmatpush.xpose.msra.mxu0 %v280_v22  ;;  %1435 = vmatpush.xpose.msra.mxu2 %v282_v23  ;;  %v284_v22 = vld [vmem:[%s5712_s1 + $0x860] sm:$0xff]  ;;  %v286_v23 = vld [vmem:[%s5712_s1 + $0x870] sm:$0xff] }
 0x13b   :  { %1415 = vmatpush.xpose.msra.mxu1 %v281_v24  ;;  %1455 = vmatpush.xpose.msra.mxu3 %v283_v25  ;;  %v285_v24 = vld [vmem:[%s5712_s1 + $0x868] sm:$0xff]  ;;  %v287_v25 = vld [vmem:[%s5712_s1 + $0x878] sm:$0xff] }
 0x13e   :  { %1396 = vmatpush.xpose.msra.mxu0 %v272_v26  ;;  %1436 = vmatpush.xpose.msra.mxu2 %v274_v27  ;;  %v276_v26 = vld [vmem:[%s5712_s1 + $0x820] sm:$0xff]  ;;  %v278_v27 = vld [vmem:[%s5712_s1 + $0x830] sm:$0xff] }
 0x13f   :  { %1416 = vmatpush.xpose.msra.mxu1 %v273_v30  ;;  %1456 = vmatpush.xpose.msra.mxu3 %v275_v32  ;;  %v277_v30 = vld [vmem:[%s5712_s1 + $0x828] sm:$0xff]  ;;  %v279_v32 = vld [vmem:[%s5712_s1 + $0x838] sm:$0xff] }
 0x141   :  { %1437 = vmatmul.f32.vlgmr.msra.gmra.mxu2 %v2728_v31  ;;  %1397 = vmatmul.f32.vlgmr.msra.gmra.mxu0 %v2740_v35  ;;  %v381_v31 = vld [vmem:[%s5712_s1 + $0xb68] sm:$0xff]  ;;  %v372_v35 = vld [vmem:[%s5712_s1 + $0xb20] sm:$0xff] }
 0x142   :  { %1461 = vmatpush.xpose.msrb.mxu0 %v396_v28  ;;  %1501 = vmatpush.xpose.msrb.mxu2 %v398_v29  ;;  %v520_v28 = vld [vmem:[%s5712_s1 + $0xfc0] sm:$0xff]  ;;  %v522_v29 = vld [vmem:[%s5712_s1 + $0xfd0] sm:$0xff] }
 0x143   :  { %1481 = vmatpush.xpose.msrb.mxu1 %v397_v33  ;;  %1521 = vmatpush.xpose.msrb.mxu3 %v399_v34  ;;  %v521_v33 = vld [vmem:[%s5712_s1 + $0xfc8] sm:$0xff]  ;;  %v523_v34 = vld [vmem:[%s5712_s1 + $0xfd8] sm:$0xff] }
 0x144   :  { %1417 = vmatmul.f32.vlgmr.msra.gmra.mxu1 %v2752_v39  ;;  %1457 = vmatmul.f32.vlgmr.msra.gmra.mxu3 %v2742_v36  ;;  %v383_v39 = vld [vmem:[%s5712_s1 + $0xb78] sm:$0xff]  ;;  %v374_v36 = vld [vmem:[%s5712_s1 + $0xb30] sm:$0xff] }
 0x146   :  { %1462 = vmatpush.xpose.msrb.mxu0 %v388_v10  ;;  %1502 = vmatpush.xpose.msrb.mxu2 %v390_v11  ;;  %v512_v10 = vld [vmem:[%s5712_s1 + $0xf80] sm:$0xff]  ;;  %v514_v11 = vld [vmem:[%s5712_s1 + $0xf90] sm:$0xff] }
 0x147   :  { %1482 = vmatpush.xpose.msrb.mxu1 %v389_v14  ;;  %1522 = vmatpush.xpose.msrb.mxu3 %v391_v37  ;;  %v3655_v14 = vld.sshfl [vmem:[#allocation1 + $0x30] sm:$0xff pattern:$0x73625140]  ;;  %v513_v37 = vld [vmem:[%s5712_s1 + $0xf88] sm:$0xff] }
 0x14a   :  { %1463 = vmatpush.xpose.msrb.mxu0 %v380_v15  ;;  %1503 = vmatpush.xpose.msrb.mxu2 %v382_v38  ;;  %v515_v15 = vld [vmem:[%s5712_s1 + $0xf98] sm:$0xff]  ;;  %v3664_v38 = vld.sshfl [vmem:[#allocation1 + $0x28] sm:$0xff pattern:$0x73625140] }
 0x14b   :  { %1483 = vmatpush.xpose.msrb.mxu1 %v381_v31  ;;  %1523 = vmatpush.xpose.msrb.mxu3 %v383_v39  ;;  %v3667_v31 = vld.sshfl [vmem:[#allocation1 + $0x20] sm:$0xff pattern:$0x73625140] }
 0x14c   :  { %v504_v39 = vld [vmem:[%s5712_s1 + $0xf40] sm:$0xff] }
 0x14e   :  { %1464 = vmatpush.xpose.msrb.mxu0 %v372_v35  ;;  %1504 = vmatpush.xpose.msrb.mxu2 %v374_v36  ;;  %v3673_v35 = vld.sshfl [vmem:[#allocation1 + $0x38] sm:$0xff pattern:$0x73625140]  ;;  %v506_v36 = vld [vmem:[%s5712_s1 + $0xf50] sm:$0xff] }
 0x14f   :  { %1484 = vmatpush.xpose.msrb.mxu1 %v373_v40  ;;  %1524 = vmatpush.xpose.msrb.mxu3 %v375_v41  ;;  %v505_v40 = vld [vmem:[%s5712_s1 + $0xf48] sm:$0xff]  ;;  %v507_v41 = vld [vmem:[%s5712_s1 + $0xf58] sm:$0xff] }
 0x152   :  { %1465 = vmatpush.xpose.msrb.mxu0 %v364_v42  ;;  %1505 = vmatpush.xpose.msrb.mxu2 %v366_v43  ;;  %v496_v42 = vld [vmem:[%s5712_s1 + $0xf00] sm:$0xff]  ;;  %v498_v43 = vld [vmem:[%s5712_s1 + $0xf10] sm:$0xff] }
 0x153   :  { %1485 = vmatpush.xpose.msrb.mxu1 %v365_v44  ;;  %1525 = vmatpush.xpose.msrb.mxu3 %v367_v45  ;;  %v497_v44 = vld [vmem:[%s5712_s1 + $0xf08] sm:$0xff]  ;;  %v499_v45 = vld [vmem:[%s5712_s1 + $0xf18] sm:$0xff] }
 0x156   :  { %1466 = vmatpush.xpose.msrb.mxu0 %v356_v46  ;;  %1506 = vmatpush.xpose.msrb.mxu2 %v358_v47  ;;  %v488_v46 = vld [vmem:[%s5712_s1 + $0xec0] sm:$0xff]  ;;  %v490_v47 = vld [vmem:[%s5712_s1 + $0xed0] sm:$0xff] }
 0x157   :  { %1486 = vmatpush.xpose.msrb.mxu1 %v357_v48  ;;  %1526 = vmatpush.xpose.msrb.mxu3 %v359_v49  ;;  %v489_v48 = vld [vmem:[%s5712_s1 + $0xec8] sm:$0xff]  ;;  %v491_v49 = vld [vmem:[%s5712_s1 + $0xed8] sm:$0xff] }
 0x15a   :  { %1467 = vmatpush.xpose.msrb.mxu0 %v348_v50  ;;  %1507 = vmatpush.xpose.msrb.mxu2 %v350_v51  ;;  %v480_v50 = vld [vmem:[%s5712_s1 + $0xe80] sm:$0xff]  ;;  %v482_v51 = vld [vmem:[%s5712_s1 + $0xe90] sm:$0xff] }
 0x15b   :  { %1487 = vmatpush.xpose.msrb.mxu1 %v349_v52  ;;  %1527 = vmatpush.xpose.msrb.mxu3 %v351_v53  ;;  %v481_v52 = vld [vmem:[%s5712_s1 + $0xe88] sm:$0xff]  ;;  %v483_v53 = vld [vmem:[%s5712_s1 + $0xe98] sm:$0xff] }
 0x15e   :  { %1468 = vmatpush.xpose.msrb.mxu0 %v340_v54  ;;  %1508 = vmatpush.xpose.msrb.mxu2 %v342_v55  ;;  %v472_v54 = vld [vmem:[%s5712_s1 + $0xe40] sm:$0xff]  ;;  %v474_v55 = vld [vmem:[%s5712_s1 + $0xe50] sm:$0xff] }
 0x15f   :  { %1488 = vmatpush.xpose.msrb.mxu1 %v341_v56  ;;  %1528 = vmatpush.xpose.msrb.mxu3 %v343_v57  ;;  %v473_v56 = vld [vmem:[%s5712_s1 + $0xe48] sm:$0xff]  ;;  %v475_v57 = vld [vmem:[%s5712_s1 + $0xe58] sm:$0xff] }
 0x162   :  { %1469 = vmatpush.xpose.msrb.mxu0 %v332_v58  ;;  %1509 = vmatpush.xpose.msrb.mxu2 %v334_v59  ;;  %v464_v58 = vld [vmem:[%s5712_s1 + $0xe00] sm:$0xff]  ;;  %v466_v59 = vld [vmem:[%s5712_s1 + $0xe10] sm:$0xff] }
 0x163   :  { %1489 = vmatpush.xpose.msrb.mxu1 %v333_v60  ;;  %1529 = vmatpush.xpose.msrb.mxu3 %v335_v61  ;;  %v465_v60 = vld [vmem:[%s5712_s1 + $0xe08] sm:$0xff]  ;;  %v467_v61 = vld [vmem:[%s5712_s1 + $0xe18] sm:$0xff] }
 0x166   :  { %1470 = vmatpush.xpose.msrb.mxu0 %v324_v62  ;;  %1510 = vmatpush.xpose.msrb.mxu2 %v326_v63  ;;  %v456_v62 = vld [vmem:[%s5712_s1 + $0xdc0] sm:$0xff]  ;;  %v458_v63 = vld [vmem:[%s5712_s1 + $0xdd0] sm:$0xff] }
 0x167   :  { %1490 = vmatpush.xpose.msrb.mxu1 %v325_v0  ;;  %1530 = vmatpush.xpose.msrb.mxu3 %v327_v1  ;;  %v457_v0 = vld [vmem:[%s5712_s1 + $0xdc8] sm:$0xff]  ;;  %v459_v1 = vld [vmem:[%s5712_s1 + $0xdd8] sm:$0xff] }
 0x16a   :  { %1471 = vmatpush.xpose.msrb.mxu0 %v316_v2  ;;  %1511 = vmatpush.xpose.msrb.mxu2 %v318_v3  ;;  %v448_v2 = vld [vmem:[%s5712_s1 + $0xd80] sm:$0xff]  ;;  %v450_v3 = vld [vmem:[%s5712_s1 + $0xd90] sm:$0xff] }
 0x16b   :  { %1491 = vmatpush.xpose.msrb.mxu1 %v317_v4  ;;  %1531 = vmatpush.xpose.msrb.mxu3 %v319_v5  ;;  %v449_v4 = vld [vmem:[%s5712_s1 + $0xd88] sm:$0xff]  ;;  %v451_v5 = vld [vmem:[%s5712_s1 + $0xd98] sm:$0xff] }
 0x16e   :  { %1472 = vmatpush.xpose.msrb.mxu0 %v308_v6  ;;  %1512 = vmatpush.xpose.msrb.mxu2 %v310_v7  ;;  %v440_v6 = vld [vmem:[%s5712_s1 + $0xd40] sm:$0xff]  ;;  %v442_v7 = vld [vmem:[%s5712_s1 + $0xd50] sm:$0xff] }
 0x16f   :  { %1492 = vmatpush.xpose.msrb.mxu1 %v309_v8  ;;  %1532 = vmatpush.xpose.msrb.mxu3 %v311_v9  ;;  %v441_v8 = vld [vmem:[%s5712_s1 + $0xd48] sm:$0xff]  ;;  %v443_v9 = vld [vmem:[%s5712_s1 + $0xd58] sm:$0xff] }
 0x172   :  { %1473 = vmatpush.xpose.msrb.mxu0 %v300_v12  ;;  %1513 = vmatpush.xpose.msrb.mxu2 %v302_v13  ;;  %v432_v12 = vld [vmem:[%s5712_s1 + $0xd00] sm:$0xff]  ;;  %v434_v13 = vld [vmem:[%s5712_s1 + $0xd10] sm:$0xff] }
 0x173   :  { %1493 = vmatpush.xpose.msrb.mxu1 %v301_v16  ;;  %1533 = vmatpush.xpose.msrb.mxu3 %v303_v17  ;;  %v433_v16 = vld [vmem:[%s5712_s1 + $0xd08] sm:$0xff]  ;;  %v435_v17 = vld [vmem:[%s5712_s1 + $0xd18] sm:$0xff] }
 0x176   :  { %1474 = vmatpush.xpose.msrb.mxu0 %v292_v18  ;;  %1514 = vmatpush.xpose.msrb.mxu2 %v294_v19  ;;  %v424_v18 = vld [vmem:[%s5712_s1 + $0xcc0] sm:$0xff]  ;;  %v426_v19 = vld [vmem:[%s5712_s1 + $0xcd0] sm:$0xff] }
 0x177   :  { %1494 = vmatpush.xpose.msrb.mxu1 %v293_v20  ;;  %1534 = vmatpush.xpose.msrb.mxu3 %v295_v21  ;;  %v425_v20 = vld [vmem:[%s5712_s1 + $0xcc8] sm:$0xff]  ;;  %v427_v21 = vld [vmem:[%s5712_s1 + $0xcd8] sm:$0xff] }
 0x17a   :  { %1475 = vmatpush.xpose.msrb.mxu0 %v284_v22  ;;  %1515 = vmatpush.xpose.msrb.mxu2 %v286_v23  ;;  %v416_v22 = vld [vmem:[%s5712_s1 + $0xc80] sm:$0xff]  ;;  %v418_v23 = vld [vmem:[%s5712_s1 + $0xc90] sm:$0xff] }
 0x17b   :  { %1495 = vmatpush.xpose.msrb.mxu1 %v285_v24  ;;  %1535 = vmatpush.xpose.msrb.mxu3 %v287_v25  ;;  %v417_v24 = vld [vmem:[%s5712_s1 + $0xc88] sm:$0xff]  ;;  %v419_v25 = vld [vmem:[%s5712_s1 + $0xc98] sm:$0xff] }
 0x17e   :  { %1476 = vmatpush.xpose.msrb.mxu0 %v276_v26  ;;  %1516 = vmatpush.xpose.msrb.mxu2 %v278_v27  ;;  %v408_v26 = vld [vmem:[%s5712_s1 + $0xc40] sm:$0xff]  ;;  %v410_v27 = vld [vmem:[%s5712_s1 + $0xc50] sm:$0xff] }
 0x17f   :  { %1496 = vmatpush.xpose.msrb.mxu1 %v277_v30  ;;  %1536 = vmatpush.xpose.msrb.mxu3 %v279_v32  ;;  %v400_v30 = vld [vmem:[%s5712_s1 + $0xc00] sm:$0xff]  ;;  %v402_v32 = vld [vmem:[%s5712_s1 + $0xc10] sm:$0xff] }
 0x181   :  { %1517 = vmatmul.f32.vlgmr.msrb.gmra.mxu2 %v3655_v14  ;;  %1477 = vmatmul.f32.vlgmr.msrb.gmra.mxu0 %v3667_v31 }
 0x182   :  { %1541 = vmatpush.xpose.msra.mxu0 %v520_v28  ;;  %1581 = vmatpush.xpose.msra.mxu2 %v522_v29  ;;  %v409_v28 = vld [vmem:[%s5712_s1 + $0xc48] sm:$0xff]  ;;  %v411_v29 = vld [vmem:[%s5712_s1 + $0xc58] sm:$0xff] }
 0x183   :  { %1561 = vmatpush.xpose.msra.mxu1 %v521_v33  ;;  %1601 = vmatpush.xpose.msra.mxu3 %v523_v34  ;;  %v524_v33 = vld [vmem:[%s5712_s1 + $0xfe0] sm:$0xff]  ;;  %v526_v34 = vld [vmem:[%s5712_s1 + $0xff0] sm:$0xff] }
 0x184   :  { %1497 = vmatmul.f32.vlgmr.msrb.gmra.mxu1 %v3664_v38  ;;  %1537 = vmatmul.f32.vlgmr.msrb.gmra.mxu3 %v3673_v35 }
 0x186   :  { %1542 = vmatpush.xpose.msra.mxu0 %v512_v10  ;;  %1582 = vmatpush.xpose.msra.mxu2 %v514_v11  ;;  %v401_v10 = vld [vmem:[%s5712_s1 + $0xc08] sm:$0xff]  ;;  %v403_v11 = vld [vmem:[%s5712_s1 + $0xc18] sm:$0xff] }
 0x187   :  { %1562 = vmatpush.xpose.msra.mxu1 %v513_v37  ;;  %1602 = vmatpush.xpose.msra.mxu3 %v515_v15  ;;  %v525_v37 = vld [vmem:[%s5712_s1 + $0xfe8] sm:$0xff]  ;;  %v527_v15 = vld [vmem:[%s5712_s1 + $0xff8] sm:$0xff] }
 0x18a   :  { %1543 = vmatpush.xpose.msra.mxu0 %v504_v39  ;;  %1583 = vmatpush.xpose.msra.mxu2 %v506_v36  ;;  %v516_v39 = vld [vmem:[%s5712_s1 + $0xfa0] sm:$0xff]  ;;  %v518_v36 = vld [vmem:[%s5712_s1 + $0xfb0] sm:$0xff] }
 0x18b   :  { %1563 = vmatpush.xpose.msra.mxu1 %v505_v40  ;;  %1603 = vmatpush.xpose.msra.mxu3 %v507_v41  ;;  %v517_v40 = vld [vmem:[%s5712_s1 + $0xfa8] sm:$0xff]  ;;  %v3862_v41 = vld.sshfl [vmem:[#allocation1 + $0x10] sm:$0xff pattern:$0x73625140] }
 0x18e   :  { %1544 = vmatpush.xpose.msra.mxu0 %v496_v42  ;;  %1584 = vmatpush.xpose.msra.mxu2 %v498_v43  ;;  %v519_v42 = vld [vmem:[%s5712_s1 + $0xfb8] sm:$0xff]  ;;  %v3868_v43 = vld.sshfl [vmem:[#allocation1 + $0x8] sm:$0xff pattern:$0x73625140] }
 0x18f   :  { %1564 = vmatpush.xpose.msra.mxu1 %v497_v44  ;;  %1604 = vmatpush.xpose.msra.mxu3 %v499_v45  ;;  %v508_v44 = vld [vmem:[%s5712_s1 + $0xf60] sm:$0xff] }
 0x190   :  { %v3874_v45 = vld.sshfl [vmem:[#allocation1] sm:$0xff pattern:$0x73625140] }
 0x192   :  { %1545 = vmatpush.xpose.msra.mxu0 %v488_v46  ;;  %1585 = vmatpush.xpose.msra.mxu2 %v490_v47  ;;  %v510_v46 = vld [vmem:[%s5712_s1 + $0xf70] sm:$0xff]  ;;  %v3880_v47 = vld.sshfl [vmem:[#allocation1 + $0x18] sm:$0xff pattern:$0x73625140] }
 0x193   :  { %1565 = vmatpush.xpose.msra.mxu1 %v489_v48  ;;  %1605 = vmatpush.xpose.msra.mxu3 %v491_v49  ;;  %v509_v48 = vld [vmem:[%s5712_s1 + $0xf68] sm:$0xff]  ;;  %v511_v49 = vld [vmem:[%s5712_s1 + $0xf78] sm:$0xff] }
 0x196   :  { %1546 = vmatpush.xpose.msra.mxu0 %v480_v50  ;;  %1586 = vmatpush.xpose.msra.mxu2 %v482_v51  ;;  %v500_v50 = vld [vmem:[%s5712_s1 + $0xf20] sm:$0xff]  ;;  %v502_v51 = vld [vmem:[%s5712_s1 + $0xf30] sm:$0xff] }
 0x197   :  { %1566 = vmatpush.xpose.msra.mxu1 %v481_v52  ;;  %1606 = vmatpush.xpose.msra.mxu3 %v483_v53  ;;  %v501_v52 = vld [vmem:[%s5712_s1 + $0xf28] sm:$0xff]  ;;  %v503_v53 = vld [vmem:[%s5712_s1 + $0xf38] sm:$0xff] }
 0x19a   :  { %1547 = vmatpush.xpose.msra.mxu0 %v472_v54  ;;  %1587 = vmatpush.xpose.msra.mxu2 %v474_v55  ;;  %v492_v54 = vld [vmem:[%s5712_s1 + $0xee0] sm:$0xff]  ;;  %v494_v55 = vld [vmem:[%s5712_s1 + $0xef0] sm:$0xff] }
 0x19b   :  { %1567 = vmatpush.xpose.msra.mxu1 %v473_v56  ;;  %1607 = vmatpush.xpose.msra.mxu3 %v475_v57  ;;  %v493_v56 = vld [vmem:[%s5712_s1 + $0xee8] sm:$0xff]  ;;  %v495_v57 = vld [vmem:[%s5712_s1 + $0xef8] sm:$0xff] }
 0x19e   :  { %1548 = vmatpush.xpose.msra.mxu0 %v464_v58  ;;  %1588 = vmatpush.xpose.msra.mxu2 %v466_v59  ;;  %v484_v58 = vld [vmem:[%s5712_s1 + $0xea0] sm:$0xff]  ;;  %v486_v59 = vld [vmem:[%s5712_s1 + $0xeb0] sm:$0xff] }
 0x19f   :  { %1568 = vmatpush.xpose.msra.mxu1 %v465_v60  ;;  %1608 = vmatpush.xpose.msra.mxu3 %v467_v61  ;;  %v485_v60 = vld [vmem:[%s5712_s1 + $0xea8] sm:$0xff]  ;;  %v487_v61 = vld [vmem:[%s5712_s1 + $0xeb8] sm:$0xff] }
 0x1a2   :  { %1549 = vmatpush.xpose.msra.mxu0 %v456_v62  ;;  %1589 = vmatpush.xpose.msra.mxu2 %v458_v63  ;;  %v476_v62 = vld [vmem:[%s5712_s1 + $0xe60] sm:$0xff]  ;;  %v478_v63 = vld [vmem:[%s5712_s1 + $0xe70] sm:$0xff] }
 0x1a3   :  { %1569 = vmatpush.xpose.msra.mxu1 %v457_v0  ;;  %1609 = vmatpush.xpose.msra.mxu3 %v459_v1  ;;  %v477_v0 = vld [vmem:[%s5712_s1 + $0xe68] sm:$0xff]  ;;  %v479_v1 = vld [vmem:[%s5712_s1 + $0xe78] sm:$0xff] }
 0x1a6   :  { %1550 = vmatpush.xpose.msra.mxu0 %v448_v2  ;;  %1590 = vmatpush.xpose.msra.mxu2 %v450_v3  ;;  %v468_v2 = vld [vmem:[%s5712_s1 + $0xe20] sm:$0xff]  ;;  %v470_v3 = vld [vmem:[%s5712_s1 + $0xe30] sm:$0xff] }
 0x1a7   :  { %1570 = vmatpush.xpose.msra.mxu1 %v449_v4  ;;  %1610 = vmatpush.xpose.msra.mxu3 %v451_v5  ;;  %v469_v4 = vld [vmem:[%s5712_s1 + $0xe28] sm:$0xff]  ;;  %v471_v5 = vld [vmem:[%s5712_s1 + $0xe38] sm:$0xff] }
 0x1aa   :  { %1551 = vmatpush.xpose.msra.mxu0 %v440_v6  ;;  %1591 = vmatpush.xpose.msra.mxu2 %v442_v7  ;;  %v460_v6 = vld [vmem:[%s5712_s1 + $0xde0] sm:$0xff]  ;;  %v462_v7 = vld [vmem:[%s5712_s1 + $0xdf0] sm:$0xff] }
 0x1ab   :  { %1571 = vmatpush.xpose.msra.mxu1 %v441_v8  ;;  %1611 = vmatpush.xpose.msra.mxu3 %v443_v9  ;;  %v461_v8 = vld [vmem:[%s5712_s1 + $0xde8] sm:$0xff]  ;;  %v463_v9 = vld [vmem:[%s5712_s1 + $0xdf8] sm:$0xff] }
 0x1ae   :  { %1552 = vmatpush.xpose.msra.mxu0 %v432_v12  ;;  %1592 = vmatpush.xpose.msra.mxu2 %v434_v13  ;;  %v452_v12 = vld [vmem:[%s5712_s1 + $0xda0] sm:$0xff]  ;;  %v454_v13 = vld [vmem:[%s5712_s1 + $0xdb0] sm:$0xff] }
 0x1af   :  { %1572 = vmatpush.xpose.msra.mxu1 %v433_v16  ;;  %1612 = vmatpush.xpose.msra.mxu3 %v435_v17  ;;  %v453_v16 = vld [vmem:[%s5712_s1 + $0xda8] sm:$0xff]  ;;  %v455_v17 = vld [vmem:[%s5712_s1 + $0xdb8] sm:$0xff] }
 0x1b2   :  { %1553 = vmatpush.xpose.msra.mxu0 %v424_v18  ;;  %1593 = vmatpush.xpose.msra.mxu2 %v426_v19  ;;  %v444_v18 = vld [vmem:[%s5712_s1 + $0xd60] sm:$0xff]  ;;  %v446_v19 = vld [vmem:[%s5712_s1 + $0xd70] sm:$0xff] }
 0x1b3   :  { %1573 = vmatpush.xpose.msra.mxu1 %v425_v20  ;;  %1613 = vmatpush.xpose.msra.mxu3 %v427_v21  ;;  %v445_v20 = vld [vmem:[%s5712_s1 + $0xd68] sm:$0xff]  ;;  %v447_v21 = vld [vmem:[%s5712_s1 + $0xd78] sm:$0xff] }
 0x1b6   :  { %1554 = vmatpush.xpose.msra.mxu0 %v416_v22  ;;  %1594 = vmatpush.xpose.msra.mxu2 %v418_v23  ;;  %v436_v22 = vld [vmem:[%s5712_s1 + $0xd20] sm:$0xff]  ;;  %v438_v23 = vld [vmem:[%s5712_s1 + $0xd30] sm:$0xff] }
 0x1b7   :  { %1574 = vmatpush.xpose.msra.mxu1 %v417_v24  ;;  %1614 = vmatpush.xpose.msra.mxu3 %v419_v25  ;;  %v437_v24 = vld [vmem:[%s5712_s1 + $0xd28] sm:$0xff]  ;;  %v439_v25 = vld [vmem:[%s5712_s1 + $0xd38] sm:$0xff] }
 0x1ba   :  { %1555 = vmatpush.xpose.msra.mxu0 %v408_v26  ;;  %1595 = vmatpush.xpose.msra.mxu2 %v410_v27  ;;  %v428_v26 = vld [vmem:[%s5712_s1 + $0xce0] sm:$0xff]  ;;  %v430_v27 = vld [vmem:[%s5712_s1 + $0xcf0] sm:$0xff] }
 0x1bb   :  { %1575 = vmatpush.xpose.msra.mxu1 %v409_v28  ;;  %1615 = vmatpush.xpose.msra.mxu3 %v411_v29  ;;  %v429_v28 = vld [vmem:[%s5712_s1 + $0xce8] sm:$0xff]  ;;  %v431_v29 = vld [vmem:[%s5712_s1 + $0xcf8] sm:$0xff] }
 0x1be   :  { %1556 = vmatpush.xpose.msra.mxu0 %v400_v30  ;;  %1596 = vmatpush.xpose.msra.mxu2 %v402_v32  ;;  %v420_v30 = vld [vmem:[%s5712_s1 + $0xca0] sm:$0xff]  ;;  %v422_v32 = vld [vmem:[%s5712_s1 + $0xcb0] sm:$0xff] }
 0x1bf   :  { %1576 = vmatpush.xpose.msra.mxu1 %v401_v10  ;;  %1616 = vmatpush.xpose.msra.mxu3 %v403_v11  ;;  %v412_v10 = vld [vmem:[%s5712_s1 + $0xc60] sm:$0xff]  ;;  %v414_v11 = vld [vmem:[%s5712_s1 + $0xc70] sm:$0xff] }
 0x1c1   :  { %1597 = vmatmul.f32.vlgmr.msra.gmra.mxu2 %v3862_v41  ;;  %1557 = vmatmul.f32.vlgmr.msra.gmra.mxu0 %v3874_v45 }
 0x1c2   :  { %1621 = vmatpush.xpose.msrb.mxu0 %v524_v33  ;;  %1661 = vmatpush.xpose.msrb.mxu2 %v526_v34  ;;  %v421_v33 = vld [vmem:[%s5712_s1 + $0xca8] sm:$0xff]  ;;  %v423_v34 = vld [vmem:[%s5712_s1 + $0xcb8] sm:$0xff] }
 0x1c3   :  { %1641 = vmatpush.xpose.msrb.mxu1 %v525_v37  ;;  %1681 = vmatpush.xpose.msrb.mxu3 %v527_v15  ;;  %v413_v37 = vld [vmem:[%s5712_s1 + $0xc68] sm:$0xff]  ;;  %v415_v15 = vld [vmem:[%s5712_s1 + $0xc78] sm:$0xff] }
 0x1c4   :  { %1577 = vmatmul.f32.vlgmr.msra.gmra.mxu1 %v3868_v43  ;;  %1617 = vmatmul.f32.vlgmr.msra.gmra.mxu3 %v3880_v47 }
 0x1c6   :  { %1622 = vmatpush.xpose.msrb.mxu0 %v516_v39  ;;  %1662 = vmatpush.xpose.msrb.mxu2 %v518_v36  ;;  %v404_v39 = vld [vmem:[%s5712_s1 + $0xc20] sm:$0xff]  ;;  %v406_v36 = vld [vmem:[%s5712_s1 + $0xc30] sm:$0xff] }
 0x1c7   :  { %1642 = vmatpush.xpose.msrb.mxu1 %v517_v40  ;;  %1682 = vmatpush.xpose.msrb.mxu3 %v519_v42  ;;  %v648_v40 = vld [vmem:[%s5712_s1 + $0x13c0] sm:$0xff]  ;;  %v650_v42 = vld [vmem:[%s5712_s1 + $0x13d0] sm:$0xff] }
 0x1ca   :  { %1623 = vmatpush.xpose.msrb.mxu0 %v508_v44  ;;  %1663 = vmatpush.xpose.msrb.mxu2 %v510_v46  ;;  %v405_v44 = vld [vmem:[%s5712_s1 + $0xc28] sm:$0xff]  ;;  %v407_v46 = vld [vmem:[%s5712_s1 + $0xc38] sm:$0xff] }
 0x1cb   :  { %1643 = vmatpush.xpose.msrb.mxu1 %v509_v48  ;;  %1683 = vmatpush.xpose.msrb.mxu3 %v511_v49  ;;  %v649_v48 = vld [vmem:[%s5712_s1 + $0x13c8] sm:$0xff]  ;;  %v651_v49 = vld [vmem:[%s5712_s1 + $0x13d8] sm:$0xff] }
 0x1ce   :  { %1624 = vmatpush.xpose.msrb.mxu0 %v500_v50  ;;  %1664 = vmatpush.xpose.msrb.mxu2 %v502_v51  ;;  %v640_v50 = vld [vmem:[%s5712_s1 + $0x1380] sm:$0xff]  ;;  %v642_v51 = vld [vmem:[%s5712_s1 + $0x1390] sm:$0xff] }
 0x1cf   :  { %1644 = vmatpush.xpose.msrb.mxu1 %v501_v52  ;;  %1684 = vmatpush.xpose.msrb.mxu3 %v503_v53  ;;  %v641_v52 = vld [vmem:[%s5712_s1 + $0x1388] sm:$0xff]  ;;  %v643_v53 = vld [vmem:[%s5712_s1 + $0x1398] sm:$0xff] }
 0x1d2   :  { %1625 = vmatpush.xpose.msrb.mxu0 %v492_v54  ;;  %1665 = vmatpush.xpose.msrb.mxu2 %v494_v55  ;;  %v624_v54 = vld [vmem:[%s5712_s1 + $0x1300] sm:$0xff]  ;;  %v626_v55 = vld [vmem:[%s5712_s1 + $0x1310] sm:$0xff] }
 0x1d3   :  { %1645 = vmatpush.xpose.msrb.mxu1 %v493_v56  ;;  %1685 = vmatpush.xpose.msrb.mxu3 %v495_v57  ;;  %v625_v56 = vld [vmem:[%s5712_s1 + $0x1308] sm:$0xff]  ;;  %v627_v57 = vld [vmem:[%s5712_s1 + $0x1318] sm:$0xff] }
 0x1d6   :  { %1626 = vmatpush.xpose.msrb.mxu0 %v484_v58  ;;  %1666 = vmatpush.xpose.msrb.mxu2 %v486_v59  ;;  %v616_v58 = vld [vmem:[%s5712_s1 + $0x12c0] sm:$0xff]  ;;  %v618_v59 = vld [vmem:[%s5712_s1 + $0x12d0] sm:$0xff] }
 0x1d7   :  { %1646 = vmatpush.xpose.msrb.mxu1 %v485_v60  ;;  %1686 = vmatpush.xpose.msrb.mxu3 %v487_v61  ;;  %v617_v60 = vld [vmem:[%s5712_s1 + $0x12c8] sm:$0xff]  ;;  %v619_v61 = vld [vmem:[%s5712_s1 + $0x12d8] sm:$0xff] }
 0x1da   :  { %1627 = vmatpush.xpose.msrb.mxu0 %v476_v62  ;;  %1667 = vmatpush.xpose.msrb.mxu2 %v478_v63  ;;  %v608_v62 = vld [vmem:[%s5712_s1 + $0x1280] sm:$0xff]  ;;  %v610_v63 = vld [vmem:[%s5712_s1 + $0x1290] sm:$0xff] }
 0x1db   :  { %1647 = vmatpush.xpose.msrb.mxu1 %v477_v0  ;;  %1687 = vmatpush.xpose.msrb.mxu3 %v479_v1  ;;  %v609_v0 = vld [vmem:[%s5712_s1 + $0x1288] sm:$0xff]  ;;  %v611_v1 = vld [vmem:[%s5712_s1 + $0x1298] sm:$0xff] }
 0x1de   :  { %1628 = vmatpush.xpose.msrb.mxu0 %v468_v2  ;;  %1668 = vmatpush.xpose.msrb.mxu2 %v470_v3  ;;  %v600_v2 = vld [vmem:[%s5712_s1 + $0x1240] sm:$0xff]  ;;  %v602_v3 = vld [vmem:[%s5712_s1 + $0x1250] sm:$0xff] }
 0x1df   :  { %1648 = vmatpush.xpose.msrb.mxu1 %v469_v4  ;;  %1688 = vmatpush.xpose.msrb.mxu3 %v471_v5  ;;  %v601_v4 = vld [vmem:[%s5712_s1 + $0x1248] sm:$0xff]  ;;  %v603_v5 = vld [vmem:[%s5712_s1 + $0x1258] sm:$0xff] }
 0x1e2   :  { %1629 = vmatpush.xpose.msrb.mxu0 %v460_v6  ;;  %1669 = vmatpush.xpose.msrb.mxu2 %v462_v7  ;;  %v592_v6 = vld [vmem:[%s5712_s1 + $0x1200] sm:$0xff]  ;;  %v594_v7 = vld [vmem:[%s5712_s1 + $0x1210] sm:$0xff] }
 0x1e3   :  { %1649 = vmatpush.xpose.msrb.mxu1 %v461_v8  ;;  %1689 = vmatpush.xpose.msrb.mxu3 %v463_v9  ;;  %v593_v8 = vld [vmem:[%s5712_s1 + $0x1208] sm:$0xff]  ;;  %v595_v9 = vld [vmem:[%s5712_s1 + $0x1218] sm:$0xff] }
 0x1e6   :  { %1630 = vmatpush.xpose.msrb.mxu0 %v452_v12  ;;  %1670 = vmatpush.xpose.msrb.mxu2 %v454_v13  ;;  %v584_v12 = vld [vmem:[%s5712_s1 + $0x11c0] sm:$0xff]  ;;  %v586_v13 = vld [vmem:[%s5712_s1 + $0x11d0] sm:$0xff] }
 0x1e7   :  { %1650 = vmatpush.xpose.msrb.mxu1 %v453_v16  ;;  %1690 = vmatpush.xpose.msrb.mxu3 %v455_v17  ;;  %v585_v16 = vld [vmem:[%s5712_s1 + $0x11c8] sm:$0xff]  ;;  %v587_v17 = vld [vmem:[%s5712_s1 + $0x11d8] sm:$0xff] }
 0x1ea   :  { %1631 = vmatpush.xpose.msrb.mxu0 %v444_v18  ;;  %1671 = vmatpush.xpose.msrb.mxu2 %v446_v19  ;;  %v576_v18 = vld [vmem:[%s5712_s1 + $0x1180] sm:$0xff]  ;;  %v578_v19 = vld [vmem:[%s5712_s1 + $0x1190] sm:$0xff] }
 0x1eb   :  { %1651 = vmatpush.xpose.msrb.mxu1 %v445_v20  ;;  %1691 = vmatpush.xpose.msrb.mxu3 %v447_v21  ;;  %v577_v20 = vld [vmem:[%s5712_s1 + $0x1188] sm:$0xff]  ;;  %v579_v21 = vld [vmem:[%s5712_s1 + $0x1198] sm:$0xff] }
 0x1ee   :  { %1632 = vmatpush.xpose.msrb.mxu0 %v436_v22  ;;  %1672 = vmatpush.xpose.msrb.mxu2 %v438_v23  ;;  %v568_v22 = vld [vmem:[%s5712_s1 + $0x1140] sm:$0xff]  ;;  %v570_v23 = vld [vmem:[%s5712_s1 + $0x1150] sm:$0xff] }
 0x1ef   :  { %1652 = vmatpush.xpose.msrb.mxu1 %v437_v24  ;;  %1692 = vmatpush.xpose.msrb.mxu3 %v439_v25  ;;  %v569_v24 = vld [vmem:[%s5712_s1 + $0x1148] sm:$0xff]  ;;  %v571_v25 = vld [vmem:[%s5712_s1 + $0x1158] sm:$0xff] }
 0x1f2   :  { %1633 = vmatpush.xpose.msrb.mxu0 %v428_v26  ;;  %1673 = vmatpush.xpose.msrb.mxu2 %v430_v27  ;;  %v560_v26 = vld [vmem:[%s5712_s1 + $0x1100] sm:$0xff]  ;;  %v562_v27 = vld [vmem:[%s5712_s1 + $0x1110] sm:$0xff] }
 0x1f3   :  { %1653 = vmatpush.xpose.msrb.mxu1 %v429_v28  ;;  %1693 = vmatpush.xpose.msrb.mxu3 %v431_v29  ;;  %v561_v28 = vld [vmem:[%s5712_s1 + $0x1108] sm:$0xff]  ;;  %v563_v29 = vld [vmem:[%s5712_s1 + $0x1118] sm:$0xff] }
 0x1f6   :  { %1634 = vmatpush.xpose.msrb.mxu0 %v420_v30  ;;  %1674 = vmatpush.xpose.msrb.mxu2 %v422_v32  ;;  %v552_v30 = vld [vmem:[%s5712_s1 + $0x10c0] sm:$0xff]  ;;  %v554_v32 = vld [vmem:[%s5712_s1 + $0x10d0] sm:$0xff] }
 0x1f7   :  { %1654 = vmatpush.xpose.msrb.mxu1 %v421_v33  ;;  %1694 = vmatpush.xpose.msrb.mxu3 %v423_v34  ;;  %v553_v33 = vld [vmem:[%s5712_s1 + $0x10c8] sm:$0xff]  ;;  %v555_v34 = vld [vmem:[%s5712_s1 + $0x10d8] sm:$0xff] }
 0x1fa   :  { %1635 = vmatpush.xpose.msrb.mxu0 %v412_v10  ;;  %1675 = vmatpush.xpose.msrb.mxu2 %v414_v11  ;;  %v544_v10 = vld [vmem:[%s5712_s1 + $0x1080] sm:$0xff]  ;;  %v546_v11 = vld [vmem:[%s5712_s1 + $0x1090] sm:$0xff] }
 0x1fb   :  { %1655 = vmatpush.xpose.msrb.mxu1 %v413_v37  ;;  %1695 = vmatpush.xpose.msrb.mxu3 %v415_v15  ;;  %v545_v37 = vld [vmem:[%s5712_s1 + $0x1088] sm:$0xff]  ;;  %v547_v15 = vld [vmem:[%s5712_s1 + $0x1098] sm:$0xff] }
 0x1fe   :  { %1636 = vmatpush.xpose.msrb.mxu0 %v404_v39  ;;  %1676 = vmatpush.xpose.msrb.mxu2 %v406_v36  ;;  %v536_v39 = vld [vmem:[%s5712_s1 + $0x1040] sm:$0xff]  ;;  %v538_v36 = vld [vmem:[%s5712_s1 + $0x1050] sm:$0xff] }
 0x1ff   :  { %1656 = vmatpush.xpose.msrb.mxu1 %v405_v44  ;;  %1696 = vmatpush.xpose.msrb.mxu3 %v407_v46  ;;  %v528_v44 = vld [vmem:[%s5712_s1 + $0x1000] sm:$0xff]  ;;  %v530_v46 = vld [vmem:[%s5712_s1 + $0x1010] sm:$0xff] }
 0x201   :  { %1677 = vmatmul.f32.vlgmr.msrb.gmra.mxu2 %v3655_v14  ;;  %1637 = vmatmul.f32.vlgmr.msrb.gmra.mxu0 %v3667_v31  ;;  %v632_v14 = vld [vmem:[%s5712_s1 + $0x1340] sm:$0xff]  ;;  %v634_v31 = vld [vmem:[%s5712_s1 + $0x1350] sm:$0xff] }
 0x202   :  { %1701 = vmatpush.xpose.msra.mxu0 %v648_v40  ;;  %1741 = vmatpush.xpose.msra.mxu2 %v650_v42  ;;  %v537_v40 = vld [vmem:[%s5712_s1 + $0x1048] sm:$0xff]  ;;  %v539_v42 = vld [vmem:[%s5712_s1 + $0x1058] sm:$0xff] }
 0x203   :  { %1721 = vmatpush.xpose.msra.mxu1 %v649_v48  ;;  %1761 = vmatpush.xpose.msra.mxu3 %v651_v49  ;;  %v652_v48 = vld [vmem:[%s5712_s1 + $0x13e0] sm:$0xff]  ;;  %v654_v49 = vld [vmem:[%s5712_s1 + $0x13f0] sm:$0xff] }
 0x204   :  { %1657 = vmatmul.f32.vlgmr.msrb.gmra.mxu1 %v3664_v38  ;;  %1697 = vmatmul.f32.vlgmr.msrb.gmra.mxu3 %v3673_v35  ;;  %v633_v38 = vld [vmem:[%s5712_s1 + $0x1348] sm:$0xff]  ;;  %v635_v35 = vld [vmem:[%s5712_s1 + $0x1358] sm:$0xff] }
 0x206   :  { %1702 = vmatpush.xpose.msra.mxu0 %v640_v50  ;;  %1742 = vmatpush.xpose.msra.mxu2 %v642_v51  ;;  %v529_v50 = vld [vmem:[%s5712_s1 + $0x1008] sm:$0xff]  ;;  %v4244_v51 = vpop.f32.mrf.mxu1 }
 0x207   :  { %1722 = vmatpush.xpose.msra.mxu1 %v641_v52  ;;  %1762 = vmatpush.xpose.msra.mxu3 %v643_v53  ;;  %v531_v52 = vld [vmem:[%s5712_s1 + $0x1018] sm:$0xff]  ;;  %v653_v53 = vld [vmem:[%s5712_s1 + $0x13e8] sm:$0xff] }
 0x20a   :  { %1703 = vmatpush.xpose.msra.mxu0 %v632_v14  ;;  %1743 = vmatpush.xpose.msra.mxu2 %v634_v31  ;;  %v655_v14 = vld [vmem:[%s5712_s1 + $0x13f8] sm:$0xff]  ;;  %v4255_v31 = vpop.f32.mrf.mxu0 }
 0x20b   :  { %1723 = vmatpush.xpose.msra.mxu1 %v633_v38  ;;  %1763 = vmatpush.xpose.msra.mxu3 %v635_v35  ;;  %v644_v38 = vld [vmem:[%s5712_s1 + $0x13a0] sm:$0xff]  ;;  %v646_v35 = vld [vmem:[%s5712_s1 + $0x13b0] sm:$0xff] }
 0x20e   :  { %1704 = vmatpush.xpose.msra.mxu0 %v624_v54  ;;  %1744 = vmatpush.xpose.msra.mxu2 %v626_v55  ;;  %v4263_v54 = vpop.f32.mrf.mxu2  ;;  %v645_v55 = vld [vmem:[%s5712_s1 + $0x13a8] sm:$0xff] }
 0x20f   :  { %1724 = vmatpush.xpose.msra.mxu1 %v625_v56  ;;  %1764 = vmatpush.xpose.msra.mxu3 %v627_v57  ;;  %v647_v56 = vld [vmem:[%s5712_s1 + $0x13b8] sm:$0xff]  ;;  %v636_v57 = vld [vmem:[%s5712_s1 + $0x1360] sm:$0xff] }
 0x212   :  { %1705 = vmatpush.xpose.msra.mxu0 %v616_v58  ;;  %1745 = vmatpush.xpose.msra.mxu2 %v618_v59  ;;  %v638_v58 = vld [vmem:[%s5712_s1 + $0x1370] sm:$0xff]  ;;  %v639_v59 = vld [vmem:[%s5712_s1 + $0x1378] sm:$0xff] }
 0x213   :  { %1725 = vmatpush.xpose.msra.mxu1 %v617_v60  ;;  %1765 = vmatpush.xpose.msra.mxu3 %v619_v61  ;;  %v628_v60 = vld [vmem:[%s5712_s1 + $0x1320] sm:$0xff]  ;;  %v4297_v61 = vpop.f32.mrf.mxu0 }
 0x216   :  { %1706 = vmatpush.xpose.msra.mxu0 %v608_v62  ;;  %1746 = vmatpush.xpose.msra.mxu2 %v610_v63  ;;  %v629_v62 = vld [vmem:[%s5712_s1 + $0x1328] sm:$0xff]  ;;  %v631_v63 = vld [vmem:[%s5712_s1 + $0x1338] sm:$0xff] }
 0x217   :  { %1726 = vmatpush.xpose.msra.mxu1 %v609_v0  ;;  %1766 = vmatpush.xpose.msra.mxu3 %v611_v1  ;;  %v4305_v0 = vpop.f32.mrf.mxu2  ;;  %v620_v1 = vld [vmem:[%s5712_s1 + $0x12e0] sm:$0xff] }
 0x21a   :  { %1707 = vmatpush.xpose.msra.mxu0 %v600_v2  ;;  %1747 = vmatpush.xpose.msra.mxu2 %v602_v3  ;;  %v622_v2 = vld [vmem:[%s5712_s1 + $0x12f0] sm:$0xff]  ;;  %v621_v3 = vld [vmem:[%s5712_s1 + $0x12e8] sm:$0xff] }
 0x21b   :  { %1727 = vmatpush.xpose.msra.mxu1 %v601_v4  ;;  %1767 = vmatpush.xpose.msra.mxu3 %v603_v5  ;;  %v623_v4 = vld [vmem:[%s5712_s1 + $0x12f8] sm:$0xff] }
 0x21e   :  { %1708 = vmatpush.xpose.msra.mxu0 %v592_v6  ;;  %1748 = vmatpush.xpose.msra.mxu2 %v594_v7  ;;  %v612_v7 = vld [vmem:[%s5712_s1 + $0x12a0] sm:$0xff] }
 0x21f   :  { %1728 = vmatpush.xpose.msra.mxu1 %v593_v8  ;;  %1768 = vmatpush.xpose.msra.mxu3 %v595_v9  ;;  %v614_v8 = vld [vmem:[%s5712_s1 + $0x12b0] sm:$0xff]  ;;  %v4329_v9 = vpop.f32.mrf.mxu0 }
 0x222   :  { %1709 = vmatpush.xpose.msra.mxu0 %v584_v12  ;;  %1749 = vmatpush.xpose.msra.mxu2 %v586_v13  ;;  %v613_v12 = vld [vmem:[%s5712_s1 + $0x12a8] sm:$0xff]  ;;  %v615_v13 = vld [vmem:[%s5712_s1 + $0x12b8] sm:$0xff] }
 0x223   :  { %1729 = vmatpush.xpose.msra.mxu1 %v585_v16  ;;  %1769 = vmatpush.xpose.msra.mxu3 %v587_v17  ;;  %v4337_v16 = vpop.f32.mrf.mxu2  ;;  %v604_v17 = vld [vmem:[%s5712_s1 + $0x1260] sm:$0xff] }
 0x226   :  { %1710 = vmatpush.xpose.msra.mxu0 %v576_v18  ;;  %1750 = vmatpush.xpose.msra.mxu2 %v578_v19  ;;  %v606_v18 = vld [vmem:[%s5712_s1 + $0x1270] sm:$0xff]  ;;  %v605_v19 = vld [vmem:[%s5712_s1 + $0x1268] sm:$0xff] }
 0x227   :  { %1730 = vmatpush.xpose.msra.mxu1 %v577_v20  ;;  %1770 = vmatpush.xpose.msra.mxu3 %v579_v21  ;;  %v607_v20 = vld [vmem:[%s5712_s1 + $0x1278] sm:$0xff] }
 0x22a   :  { %1711 = vmatpush.xpose.msra.mxu0 %v568_v22  ;;  %1751 = vmatpush.xpose.msra.mxu2 %v570_v23  ;;  %v596_v22 = vld [vmem:[%s5712_s1 + $0x1220] sm:$0xff]  ;;  %v598_v23 = vld [vmem:[%s5712_s1 + $0x1230] sm:$0xff] }
 0x22b   :  { %1731 = vmatpush.xpose.msra.mxu1 %v569_v24  ;;  %1771 = vmatpush.xpose.msra.mxu3 %v571_v25  ;;  %v597_v25 = vld [vmem:[%s5712_s1 + $0x1228] sm:$0xff] }
 0x22e   :  { %1712 = vmatpush.xpose.msra.mxu0 %v560_v26  ;;  %1752 = vmatpush.xpose.msra.mxu2 %v562_v27  ;;  %v599_v26 = vld [vmem:[%s5712_s1 + $0x1238] sm:$0xff]  ;;  %v4367_v27 = vpop.f32.mrf.mxu0 }
 0x22f   :  { %1732 = vmatpush.xpose.msra.mxu1 %v561_v28  ;;  %1772 = vmatpush.xpose.msra.mxu3 %v563_v29  ;;  %v588_v28 = vld [vmem:[%s5712_s1 + $0x11e0] sm:$0xff]  ;;  %v590_v29 = vld [vmem:[%s5712_s1 + $0x11f0] sm:$0xff] }
 0x232   :  { %1713 = vmatpush.xpose.msra.mxu0 %v552_v30  ;;  %1753 = vmatpush.xpose.msra.mxu2 %v554_v32  ;;  %v4375_v30 = vpop.f32.mrf.mxu2  ;;  %v589_v32 = vld [vmem:[%s5712_s1 + $0x11e8] sm:$0xff] }
 0x233   :  { %1733 = vmatpush.xpose.msra.mxu1 %v553_v33  ;;  %1773 = vmatpush.xpose.msra.mxu3 %v555_v34  ;;  %v591_v33 = vld [vmem:[%s5712_s1 + $0x11f8] sm:$0xff]  ;;  %v580_v34 = vld [vmem:[%s5712_s1 + $0x11a0] sm:$0xff] }
 0x236   :  { %1714 = vmatpush.xpose.msra.mxu0 %v544_v10  ;;  %1754 = vmatpush.xpose.msra.mxu2 %v546_v11  ;;  %v582_v10 = vld [vmem:[%s5712_s1 + $0x11b0] sm:$0xff] }
 0x237   :  { %1734 = vmatpush.xpose.msra.mxu1 %v545_v37  ;;  %1774 = vmatpush.xpose.msra.mxu3 %v547_v15  ;;  %v581_v15 = vld [vmem:[%s5712_s1 + $0x11a8] sm:$0xff] }
 0x23a   :  { %1715 = vmatpush.xpose.msra.mxu0 %v536_v39  ;;  %1755 = vmatpush.xpose.msra.mxu2 %v538_v36  ;;  %v583_v39 = vld [vmem:[%s5712_s1 + $0x11b8] sm:$0xff]  ;;  %v1398_v36 = vpop.f32.mrf.mxu0 }
 0x23b   :  { %1735 = vmatpush.xpose.msra.mxu1 %v537_v40  ;;  %1775 = vmatpush.xpose.msra.mxu3 %v539_v42  ;;  %v572_v40 = vld [vmem:[%s5712_s1 + $0x1160] sm:$0xff]  ;;  %v574_v42 = vld [vmem:[%s5712_s1 + $0x1170] sm:$0xff] }
 0x23e   :  { %1716 = vmatpush.xpose.msra.mxu0 %v528_v44  ;;  %1756 = vmatpush.xpose.msra.mxu2 %v530_v46  ;;  %v1438_v44 = vpop.f32.mrf.mxu2  ;;  %v573_v46 = vld [vmem:[%s5712_s1 + $0x1168] sm:$0xff] }
 0x23f   :  { %1736 = vmatpush.xpose.msra.mxu1 %v529_v50  ;;  %1776 = vmatpush.xpose.msra.mxu3 %v531_v52  ;;  %v566_v50 = vld [vmem:[%s5712_s1 + $0x1130] sm:$0xff] }
 0x241   :  { %1757 = vmatmul.f32.vlgmr.msra.gmra.mxu2 %v3862_v41  ;;  %1717 = vmatmul.f32.vlgmr.msra.gmra.mxu0 %v3874_v45  ;;  %v4281_v41 = vpop.f32.mrf.mxu3  ;;  %v4289_v45 = vpop.f32.mrf.mxu1 }
 0x242   :  { %1781 = vmatpush.xpose.msrb.mxu0 %v652_v48  ;;  %1821 = vmatpush.xpose.msrb.mxu2 %v654_v49  ;;  %v575_v48 = vld [vmem:[%s5712_s1 + $0x1178] sm:$0xff]  ;;  %v564_v49 = vld [vmem:[%s5712_s1 + $0x1120] sm:$0xff] }
 0x243   :  { %1801 = vmatpush.xpose.msrb.mxu1 %v653_v53  ;;  %1841 = vmatpush.xpose.msrb.mxu3 %v655_v14  ;;  %v565_v53 = vld [vmem:[%s5712_s1 + $0x1128] sm:$0xff]  ;;  %v567_v14 = vld [vmem:[%s5712_s1 + $0x1138] sm:$0xff] }
 0x244   :  { %1737 = vmatmul.f32.vlgmr.msra.gmra.mxu1 %v3868_v43  ;;  %1777 = vmatmul.f32.vlgmr.msra.gmra.mxu3 %v3880_v47  ;;  %v637_v43 = vld [vmem:[%s5712_s1 + $0x1368] sm:$0xff]  ;;  %v630_v47 = vld [vmem:[%s5712_s1 + $0x1330] sm:$0xff] }
 0x246   :  { %1782 = vmatpush.xpose.msrb.mxu0 %v644_v38  ;;  %1822 = vmatpush.xpose.msrb.mxu2 %v646_v35 }
 0x247   :  { %1802 = vmatpush.xpose.msrb.mxu1 %v645_v55  ;;  %1842 = vmatpush.xpose.msrb.mxu3 %v647_v56  ;;  %v556_v55 = vld [vmem:[%s5712_s1 + $0x10e0] sm:$0xff]  ;;  %v558_v56 = vld [vmem:[%s5712_s1 + $0x10f0] sm:$0xff] }
 0x249   :  { %v4319_v5 = vpop.f32.mrf.mxu3  ;;  %v4321_v6 = vpop.f32.mrf.mxu1 }
 0x24a   :  { %1783 = vmatpush.xpose.msrb.mxu0 %v636_v57  ;;  %1823 = vmatpush.xpose.msrb.mxu2 %v638_v58  ;;  %v1259_v38 = vadd.f32 %v4321_v6, %v4329_v9  ;;  %v1478_v58 = vpop.f32.mrf.mxu0 }
 0x24b   :  { %1803 = vmatpush.xpose.msrb.mxu1 %v637_v43  ;;  %1843 = vmatpush.xpose.msrb.mxu3 %v639_v59  ;;  %v557_v43 = vld [vmem:[%s5712_s1 + $0x10e8] sm:$0xff]  ;;  %v559_v59 = vld [vmem:[%s5712_s1 + $0x10f8] sm:$0xff] }
 0x24e   :  { %1784 = vmatpush.xpose.msrb.mxu0 %v628_v60  ;;  %1824 = vmatpush.xpose.msrb.mxu2 %v630_v47  ;;  %v1279_v60 = vadd.f32 %v4337_v16, %v1259_v38  ;;  %v4438_v47 = vpop.f32.mrf.mxu2  ;;  %v2341_v38 = vld [vmem:[%s5714_s2] sm:$0xff] }
 0x24f   :  { %1804 = vmatpush.xpose.msrb.mxu1 %v629_v62  ;;  %1844 = vmatpush.xpose.msrb.mxu3 %v631_v63  ;;  %v548_v62 = vld [vmem:[%s5712_s1 + $0x10a0] sm:$0xff]  ;;  %v550_v63 = vld [vmem:[%s5712_s1 + $0x10b0] sm:$0xff] }
 0x251   :  { %v4351_v21 = vpop.f32.mrf.mxu3  ;;  %v4359_v24 = vpop.f32.mrf.mxu1 }
 0x252   :  { %1785 = vmatpush.xpose.msrb.mxu0 %v620_v1  ;;  %1825 = vmatpush.xpose.msrb.mxu2 %v622_v2  ;;  %v1099_v1 = vadd.f32 %v4244_v51, %v4255_v31  ;;  %v1299_v6 = vadd.f32 %v4351_v21, %v1279_v60  ;;  %v540_v51 = vld [vmem:[%s5712_s1 + $0x1060] sm:$0xff]  ;;  %v1558_v16 = vpop.f32.mrf.mxu0  ;;  %v534_v21 = vld [vmem:[%s5712_s1 + $0x1030] sm:$0xff] }
 0x253   :  { %1805 = vmatpush.xpose.msrb.mxu1 %v621_v3  ;;  %1845 = vmatpush.xpose.msrb.mxu3 %v623_v4  ;;  %v549_v3 = vld [vmem:[%s5712_s1 + $0x10a8] sm:$0xff]  ;;  %v551_v4 = vld [vmem:[%s5712_s1 + $0x10b8] sm:$0xff] }
 0x254   :  { %v1119_v9 = vadd.f32 %v4263_v54, %v1099_v1  ;;  %v532_v54 = vld [vmem:[%s5712_s1 + $0x1020] sm:$0xff] }
 0x256   :  { %1786 = vmatpush.xpose.msrb.mxu0 %v612_v7  ;;  %1826 = vmatpush.xpose.msrb.mxu2 %v614_v8  ;;  %v542_v8 = vld [vmem:[%s5712_s1 + $0x1070] sm:$0xff] }
 0x257   :  { %1806 = vmatpush.xpose.msrb.mxu1 %v613_v12  ;;  %1846 = vmatpush.xpose.msrb.mxu3 %v615_v13  ;;  %v541_v13 = vld [vmem:[%s5712_s1 + $0x1068] sm:$0xff] }
 0x259   :  { %v4389_v11 = vpop.f32.mrf.mxu3  ;;  %v1418_v37 = vpop.f32.mrf.mxu1 }
 0x25a   :  { %1787 = vmatpush.xpose.msrb.mxu0 %v604_v17  ;;  %1827 = vmatpush.xpose.msrb.mxu2 %v606_v18  ;;  %v1419_v57 = vadd.f32 %v1418_v37, %v1398_v36  ;;  %v543_v17 = vld [vmem:[%s5712_s1 + $0x1078] sm:$0xff]  ;;  %v4505_v36 = vld.sshfl [vmem:[#allocation1 + $0x30] sm:$0xff pattern:$0x73625140] }
 0x25b   :  { %1807 = vmatpush.xpose.msrb.mxu1 %v605_v19  ;;  %1847 = vmatpush.xpose.msrb.mxu3 %v607_v20  ;;  %v1319_v19 = vadd.f32 %v4367_v27, %v1299_v6  ;;  %v1598_v20 = vpop.f32.mrf.mxu2  ;;  %v533_v27 = vld [vmem:[%s5712_s1 + $0x1028] sm:$0xff]  ;;  %v744_v6 = vld [vmem:[%s5712_s1 + $0x16c0] sm:$0xff] }
 0x25c   :  { %v1439_v2 = vadd.f32 %v1438_v44, %v1419_v57  ;;  %v4515_v44 = vld.sshfl [vmem:[#allocation1 + $0x28] sm:$0xff pattern:$0x73625140]  ;;  %v763_v57 = vld [vmem:[%s5712_s1 + $0x1758] sm:$0xff] }
 0x25e   :  { %1788 = vmatpush.xpose.msrb.mxu0 %v596_v22  ;;  %1828 = vmatpush.xpose.msrb.mxu2 %v598_v23  ;;  %v776_v22 = vld [vmem:[%s5712_s1 + $0x17c0] sm:$0xff]  ;;  %v1139_v23 = vadd.f32 %v4281_v41, %v1119_v9  ;;  %v746_v9 = vld [vmem:[%s5712_s1 + $0x16d0] sm:$0xff] }
 0x25f   :  { %1808 = vmatpush.xpose.msrb.mxu1 %v597_v25  ;;  %1848 = vmatpush.xpose.msrb.mxu3 %v599_v26  ;;  %v778_v26 = vld [vmem:[%s5712_s1 + $0x17d0] sm:$0xff] }
 0x260   :  { %v1159_v37 = vadd.f32 %v4297_v61, %v1139_v23 }
 0x261   :  { %v1458_v52 = vpop.f32.mrf.mxu3  ;;  %v4423_v35 = vpop.f32.mrf.mxu1 }
 0x262   :  { %1789 = vmatpush.xpose.msrb.mxu0 %v588_v28  ;;  %1829 = vmatpush.xpose.msrb.mxu2 %v590_v29  ;;  %v1459_v12 = vadd.f32 %v1458_v52, %v1439_v2  ;;  %v535_v28 = vld [vmem:[%s5712_s1 + $0x1038] sm:$0xff]  ;;  %v777_v29 = vld [vmem:[%s5712_s1 + $0x17c8] sm:$0xff] }
 0x263   :  { %1809 = vmatpush.xpose.msrb.mxu1 %v589_v32  ;;  %1849 = vmatpush.xpose.msrb.mxu3 %v591_v33  ;;  %v1339_v32 = vadd.f32 %v4359_v24, %v1319_v19  ;;  %v779_v33 = vld [vmem:[%s5712_s1 + $0x17d8] sm:$0xff]  ;;  %v770_v24 = vld [vmem:[%s5712_s1 + $0x1790] sm:$0xff] }
 0x264   :  { %v1479_v25 = vadd.f32 %v1478_v58, %v1459_v12  ;;  %v4526_v52 = vld.sshfl [vmem:[#allocation1 + $0x38] sm:$0xff pattern:$0x73625140]  ;;  %v745_v12 = vld [vmem:[%s5712_s1 + $0x16c8] sm:$0xff] }
 0x265   :  { %v1359_v61 = vadd.f32 %v4375_v30, %v1339_v32  ;;  %v1179_v30 = vadd.f32 %v4289_v45, %v1159_v37  ;;  %v761_v45 = vld [vmem:[%s5712_s1 + $0x1748] sm:$0xff]  ;;  %v720_v32 = vld [vmem:[%s5712_s1 + $0x1600] sm:$0xff] }
 0x266   :  { %1790 = vmatpush.xpose.msrb.mxu0 %v580_v34  ;;  %1830 = vmatpush.xpose.msrb.mxu2 %v582_v10  ;;  %v768_v10 = vld [vmem:[%s5712_s1 + $0x1780] sm:$0xff] }
 0x267   :  { %1810 = vmatpush.xpose.msrb.mxu1 %v581_v15  ;;  %1850 = vmatpush.xpose.msrb.mxu3 %v583_v39  ;;  %v1499_v15 = vadd.f32 %v4423_v35, %v1479_v25  ;;  %v739_v25 = vld [vmem:[%s5712_s1 + $0x1698] sm:$0xff]  ;;  %v712_v37 = vld [vmem:[%s5712_s1 + $0x15c0] sm:$0xff] }
 0x269   :  { %v4455_v7 = vpop.f32.mrf.mxu3  ;;  %v1578_v31 = vpop.f32.mrf.mxu1 }
 0x26a   :  { %1791 = vmatpush.xpose.msrb.mxu0 %v572_v40  ;;  %1831 = vmatpush.xpose.msrb.mxu2 %v574_v42  ;;  %v1579_v18 = vadd.f32 %v1578_v31, %v1558_v16  ;;  %v769_v40 = vld [vmem:[%s5712_s1 + $0x1788] sm:$0xff]  ;;  %v771_v42 = vld [vmem:[%s5712_s1 + $0x1798] sm:$0xff] }
 0x26b   :  { %1811 = vmatpush.xpose.msrb.mxu1 %v573_v46  ;;  %1851 = vmatpush.xpose.msrb.mxu3 %v575_v48  ;;  %v4518_v46 = vld.sshfl [vmem:[#allocation1 + $0x20] sm:$0xff pattern:$0x73625140] }
 0x26c   :  { %v1599_v41 = vadd.f32 %v1598_v20, %v1579_v18  ;;  %v760_v48 = vld [vmem:[%s5712_s1 + $0x1740] sm:$0xff]  ;;  %v738_v20 = vld [vmem:[%s5712_s1 + $0x1690] sm:$0xff] }
 0x26e   :  { %1792 = vmatpush.xpose.msrb.mxu0 %v564_v49  ;;  %1832 = vmatpush.xpose.msrb.mxu2 %v566_v50  ;;  %v1519_v49 = vadd.f32 %v4438_v47, %v1499_v15  ;;  %v2345_v47 = vperm.slane %v2341_v38, 2  ;;  %v714_v15 = vld [vmem:[%s5712_s1 + $0x15d0] sm:$0xff] }
 0x26f   :  { %1812 = vmatpush.xpose.msrb.mxu1 %v565_v53  ;;  %1852 = vmatpush.xpose.msrb.mxu3 %v567_v14  ;;  %v762_v53 = vld [vmem:[%s5712_s1 + $0x1750] sm:$0xff] }
 0x270   :  { %v1539_v60 = vadd.f32 %v4455_v7, %v1519_v49  ;;  %v698_v49 = vld [vmem:[%s5712_s1 + $0x1550] sm:$0xff] }
 0x271   :  { %v1618_v34 = vpop.f32.mrf.mxu3 }
 0x272   :  { %1793 = vmatpush.xpose.msrb.mxu0 %v556_v55  ;;  %1833 = vmatpush.xpose.msrb.mxu2 %v558_v56  ;;  %v1619_v39 = vadd.f32 %v1618_v34, %v1599_v41  ;;  %v1379_v55 = vadd.f32 %v4389_v11, %v1359_v61  ;;  %v2344_v56 = vperm.slane %v2341_v38, 1  ;;  %v754_v11 = vld [vmem:[%s5712_s1 + $0x1710] sm:$0xff]  ;;  %v2361_v31 = vsub.f32 %v1539_v60, %v2345_v47  ;;  %v731_v41 = vld [vmem:[%s5712_s1 + $0x1658] sm:$0xff]  ;;  %v721_v34 = vld [vmem:[%s5712_s1 + $0x1608] sm:$0xff] }
 0x273   :  { %1813 = vmatpush.xpose.msrb.mxu1 %v557_v43  ;;  %1853 = vmatpush.xpose.msrb.mxu3 %v559_v59  ;;  %v752_v43 = vld [vmem:[%s5712_s1 + $0x1700] sm:$0xff]  ;;  %v1199_v59 = vadd.f32 %v4305_v0, %v1179_v30  ;;  %v755_v0 = vld [vmem:[%s5712_s1 + $0x1718] sm:$0xff]  ;;  %v706_v61 = vld [vmem:[%s5712_s1 + $0x1590] sm:$0xff] }
 0x274   :  { %v2360_v1 = vsub.f32 %v1379_v55, %v2344_v56  ;;  %v2376_v19 = vrot.slane %v2361_v31, 4  ;;  %v696_v30 = vld [vmem:[%s5712_s1 + $0x1540] sm:$0xff]  ;;  %v682_v56 = vld [vmem:[%s5712_s1 + $0x14d0] sm:$0xff]  ;;  %v673_v60 = vld [vmem:[%s5712_s1 + $0x1488] sm:$0xff] }
 0x275   :  { %v1219_v7 = vadd.f32 %v4319_v5, %v1199_v59  ;;  %v747_v5 = vld [vmem:[%s5712_s1 + $0x16d8] sm:$0xff]  ;;  %v680_v55 = vld [vmem:[%s5712_s1 + $0x14c0] sm:$0xff]  ;;  %v674_v59 = vld [vmem:[%s5712_s1 + $0x1490] sm:$0xff] }
 0x276   :  { %1794 = vmatpush.xpose.msrb.mxu0 %v548_v62  ;;  %1834 = vmatpush.xpose.msrb.mxu2 %v550_v63  ;;  %v753_v63 = vld [vmem:[%s5712_s1 + $0x1708] sm:$0xff]  ;;  %v675_v47 = vld [vmem:[%s5712_s1 + $0x1498] sm:$0xff] }
 0x277   :  { %1814 = vmatpush.xpose.msrb.mxu1 %v549_v3  ;;  %1854 = vmatpush.xpose.msrb.mxu3 %v551_v4  ;;  %v2346_v3 = vperm.slane %v2341_v38, 3  ;;  %v783_v31 = vld [vmem:[%s5712_s1 + $0x17f8] sm:$0xff] }
 0x27a   :  { %1795 = vmatpush.xpose.msrb.mxu0 %v540_v51  ;;  %1835 = vmatpush.xpose.msrb.mxu2 %v542_v8  ;;  %v2343_v51 = vperm.slane %v2341_v38, 0  ;;  %v690_v38 = vld [vmem:[%s5712_s1 + $0x1510] sm:$0xff] }
 0x27b   :  { %1815 = vmatpush.xpose.msrb.mxu1 %v541_v13  ;;  %1855 = vmatpush.xpose.msrb.mxu3 %v543_v17  ;;  %v2375_v13 = vrot.slane %v2360_v1, 6  ;;  %v736_v17 = vld [vmem:[%s5712_s1 + $0x1680] sm:$0xff]  ;;  %v667_v1 = vld [vmem:[%s5712_s1 + $0x1458] sm:$0xff] }
 0x27c   :  { %v2359_v18 = vsub.f32 %v1219_v7, %v2343_v51  ;;  %v659_v7 = vld [vmem:[%s5712_s1 + $0x1418] sm:$0xff]  ;;  %v781_v51 = vld [vmem:[%s5712_s1 + $0x17e8] sm:$0xff] }
 0x27e   :  { %1796 = vmatpush.xpose.msrb.mxu0 %v532_v54  ;;  %1836 = vmatpush.xpose.msrb.mxu2 %v534_v21  ;;  %v1638_v50 = vpop.f32.mrf.mxu0  ;;  %v737_v21 = vld [vmem:[%s5712_s1 + $0x1688] sm:$0xff] }
 0x27f   :  { %1816 = vmatpush.xpose.msrb.mxu1 %v533_v27  ;;  %1856 = vmatpush.xpose.msrb.mxu3 %v535_v28  ;;  %v1639_v35 = vadd.f32 %v1638_v50, %v1619_v39  ;;  %v728_v27 = vld [vmem:[%s5712_s1 + $0x1640] sm:$0xff]  ;;  %v730_v28 = vld [vmem:[%s5712_s1 + $0x1650] sm:$0xff]  ;;  %v715_v39 = vld [vmem:[%s5712_s1 + $0x15d8] sm:$0xff] }
 0x280   :  { %v697_v50 = vld [vmem:[%s5712_s1 + $0x1548] sm:$0xff] }
 0x281   :  { %1837 = vmatmul.f32.vlgmr.msrb.gmra.mxu2 %v4505_v36  ;;  %1797 = vmatmul.f32.vlgmr.msrb.gmra.mxu0 %v4518_v46  ;;  %v1658_v14 = vpop.f32.mrf.mxu1 }
 0x282   :  { %1861 = vmatpush.xpose.msra.mxu0 %v776_v22  ;;  %1901 = vmatpush.xpose.msra.mxu2 %v778_v26  ;;  %v1659_v58 = vadd.f32 %v1658_v14, %v1639_v35  ;;  %v2382_v22 = vsel %vm2381_vm0, %v2359_v18, %v2375_v13  ;;  %v688_v14 = vld [vmem:[%s5712_s1 + $0x1500] sm:$0xff]  ;;  %v689_v35 = vld [vmem:[%s5712_s1 + $0x1508] sm:$0xff]  ;;  %v4728_v13 = vld.sshfl [vmem:[#allocation1 + $0x10] sm:$0xff pattern:$0x73625140] }
 0x283   :  { %1881 = vmatpush.xpose.msra.mxu1 %v777_v29  ;;  %1921 = vmatpush.xpose.msra.mxu3 %v779_v33  ;;  %v729_v29 = vld [vmem:[%s5712_s1 + $0x1648] sm:$0xff]  ;;  %v722_v33 = vld [vmem:[%s5712_s1 + $0x1610] sm:$0xff]  ;;  %v4740_v18 = vld.sshfl [vmem:[#allocation1] sm:$0xff pattern:$0x73625140] }
 0x284   :  { %1817 = vmatmul.f32.vlgmr.msrb.gmra.mxu1 %v4515_v44  ;;  %1857 = vmatmul.f32.vlgmr.msrb.gmra.mxu3 %v4526_v52  ;;  %v1678_v62 = vpop.f32.mrf.mxu2 }
 0x285   :  { %v1679_v2 = vadd.f32 %v1678_v62, %v1659_v58  ;;  %v683_v58 = vld [vmem:[%s5712_s1 + $0x14d8] sm:$0xff]  ;;  %v666_v62 = vld [vmem:[%s5712_s1 + $0x1450] sm:$0xff] }
 0x286   :  { %1862 = vmatpush.xpose.msra.mxu0 %v768_v10  ;;  %1902 = vmatpush.xpose.msra.mxu2 %v770_v24  ;;  %v723_v10 = vld [vmem:[%s5712_s1 + $0x1618] sm:$0xff]  ;;  %v713_v24 = vld [vmem:[%s5712_s1 + $0x15c8] sm:$0xff] }
 0x287   :  { %1882 = vmatpush.xpose.msra.mxu1 %v769_v40  ;;  %1922 = vmatpush.xpose.msra.mxu3 %v771_v42  ;;  %v1698_v4 = vpop.f32.mrf.mxu3  ;;  %v704_v40 = vld [vmem:[%s5712_s1 + $0x1580] sm:$0xff]  ;;  %v705_v42 = vld [vmem:[%s5712_s1 + $0x1588] sm:$0xff] }
 0x288   :  { %v1699_v8 = vadd.f32 %v1698_v4, %v1679_v2  ;;  %v656_v2 = vld [vmem:[%s5712_s1 + $0x1400] sm:$0xff]  ;;  %v782_v4 = vld [vmem:[%s5712_s1 + $0x17f0] sm:$0xff] }
 0x28a   :  { %1863 = vmatpush.xpose.msra.mxu0 %v760_v48  ;;  %1903 = vmatpush.xpose.msra.mxu2 %v762_v53  ;;  %v2362_v16 = vsub.f32 %v1699_v8, %v2346_v3  ;;  %v707_v48 = vld [vmem:[%s5712_s1 + $0x1598] sm:$0xff]  ;;  %v658_v3 = vld [vmem:[%s5712_s1 + $0x1410] sm:$0xff]  ;;  %v772_v8 = vld [vmem:[%s5712_s1 + $0x17a0] sm:$0xff] }
 0x28b   :  { %1883 = vmatpush.xpose.msra.mxu1 %v761_v45  ;;  %1923 = vmatpush.xpose.msra.mxu3 %v763_v57  ;;  %v699_v53 = vld [vmem:[%s5712_s1 + $0x1558] sm:$0xff]  ;;  %v681_v57 = vld [vmem:[%s5712_s1 + $0x14c8] sm:$0xff] }
 0x28c   :  { %v2377_v54 = vrot.slane %v2362_v16, 2  ;;  %v691_v45 = vld [vmem:[%s5712_s1 + $0x1518] sm:$0xff] }
 0x28d   :  { %v775_v16 = vld [vmem:[%s5712_s1 + $0x17b8] sm:$0xff] }
 0x28e   :  { %1864 = vmatpush.xpose.msra.mxu0 %v752_v43  ;;  %1904 = vmatpush.xpose.msra.mxu2 %v754_v11  ;;  %v2384_v23 = vsel %vm2383_vm1, %v2376_v19, %v2377_v54  ;;  %v672_v43 = vld [vmem:[%s5712_s1 + $0x1480] sm:$0xff]  ;;  %v766_v19 = vld [vmem:[%s5712_s1 + $0x1770] sm:$0xff]  ;;  %v4746_v54 = vld.sshfl [vmem:[#allocation1 + $0x18] sm:$0xff pattern:$0x73625140] }
 0x28f   :  { %1884 = vmatpush.xpose.msra.mxu1 %v753_v63  ;;  %1924 = vmatpush.xpose.msra.mxu3 %v755_v0  ;;  %v2386_v26 = vsel %vm2385_vm2, %v2382_v22, %v2384_v23  ;;  %v664_v11 = vld [vmem:[%s5712_s1 + $0x1440] sm:$0xff]  ;;  %v665_v63 = vld [vmem:[%s5712_s1 + $0x1448] sm:$0xff]  ;;  %v758_v23 = vld [vmem:[%s5712_s1 + $0x1730] sm:$0xff] }
 0x290   :  { %2392 = vst [vmem:[%s5715_s3] sm:$0xff] %v2386_v26  ;;  %v780_v0 = vld [vmem:[%s5712_s1 + $0x17e0] sm:$0xff]  ;;  %v759_v26 = vld [vmem:[%s5712_s1 + $0x1738] sm:$0xff] }
 0x291   :  { %v756_v22 = vld [vmem:[%s5712_s1 + $0x1720] sm:$0xff] }
 0x292   :  { %1865 = vmatpush.xpose.msra.mxu0 %v744_v6  ;;  %1905 = vmatpush.xpose.msra.mxu2 %v746_v9  ;;  %v657_v6 = vld [vmem:[%s5712_s1 + $0x1408] sm:$0xff]  ;;  %v774_v9 = vld [vmem:[%s5712_s1 + $0x17b0] sm:$0xff] }
 0x293   :  { %1885 = vmatpush.xpose.msra.mxu1 %v745_v12  ;;  %1925 = vmatpush.xpose.msra.mxu3 %v747_v5  ;;  %v773_v12 = vld [vmem:[%s5712_s1 + $0x17a8] sm:$0xff] }
 0x294   :  { %v4734_v5 = vld.sshfl [vmem:[#allocation1 + $0x8] sm:$0xff pattern:$0x73625140] }
 0x296   :  { %1866 = vmatpush.xpose.msra.mxu0 %v736_v17  ;;  %1906 = vmatpush.xpose.msra.mxu2 %v738_v20  ;;  %v764_v17 = vld [vmem:[%s5712_s1 + $0x1760] sm:$0xff]  ;;  %v765_v20 = vld [vmem:[%s5712_s1 + $0x1768] sm:$0xff] }
 0x297   :  { %1886 = vmatpush.xpose.msra.mxu1 %v737_v21  ;;  %1926 = vmatpush.xpose.msra.mxu3 %v739_v25  ;;  %v767_v21 = vld [vmem:[%s5712_s1 + $0x1778] sm:$0xff]  ;;  %v757_v25 = vld [vmem:[%s5712_s1 + $0x1728] sm:$0xff] }
 0x29a   :  { %1867 = vmatpush.xpose.msra.mxu0 %v728_v27  ;;  %1907 = vmatpush.xpose.msra.mxu2 %v730_v28  ;;  %v748_v27 = vld [vmem:[%s5712_s1 + $0x16e0] sm:$0xff]  ;;  %v750_v28 = vld [vmem:[%s5712_s1 + $0x16f0] sm:$0xff] }
 0x29b   :  { %1887 = vmatpush.xpose.msra.mxu1 %v729_v29  ;;  %1927 = vmatpush.xpose.msra.mxu3 %v731_v41  ;;  %v749_v29 = vld [vmem:[%s5712_s1 + $0x16e8] sm:$0xff]  ;;  %v751_v41 = vld [vmem:[%s5712_s1 + $0x16f8] sm:$0xff] }
 0x29e   :  { %1868 = vmatpush.xpose.msra.mxu0 %v720_v32  ;;  %1908 = vmatpush.xpose.msra.mxu2 %v722_v33  ;;  %v740_v32 = vld [vmem:[%s5712_s1 + $0x16a0] sm:$0xff]  ;;  %v742_v33 = vld [vmem:[%s5712_s1 + $0x16b0] sm:$0xff] }
 0x29f   :  { %1888 = vmatpush.xpose.msra.mxu1 %v721_v34  ;;  %1928 = vmatpush.xpose.msra.mxu3 %v723_v10  ;;  %v741_v34 = vld [vmem:[%s5712_s1 + $0x16a8] sm:$0xff]  ;;  %v743_v10 = vld [vmem:[%s5712_s1 + $0x16b8] sm:$0xff] }
 0x2a2   :  { %1869 = vmatpush.xpose.msra.mxu0 %v712_v37  ;;  %1909 = vmatpush.xpose.msra.mxu2 %v714_v15  ;;  %v732_v37 = vld [vmem:[%s5712_s1 + $0x1660] sm:$0xff]  ;;  %v734_v15 = vld [vmem:[%s5712_s1 + $0x1670] sm:$0xff] }
 0x2a3   :  { %1889 = vmatpush.xpose.msra.mxu1 %v713_v24  ;;  %1929 = vmatpush.xpose.msra.mxu3 %v715_v39  ;;  %v733_v24 = vld [vmem:[%s5712_s1 + $0x1668] sm:$0xff]  ;;  %v735_v39 = vld [vmem:[%s5712_s1 + $0x1678] sm:$0xff] }
 0x2a6   :  { %1870 = vmatpush.xpose.msra.mxu0 %v704_v40  ;;  %1910 = vmatpush.xpose.msra.mxu2 %v706_v61  ;;  %v724_v40 = vld [vmem:[%s5712_s1 + $0x1620] sm:$0xff]  ;;  %v726_v61 = vld [vmem:[%s5712_s1 + $0x1630] sm:$0xff] }
 0x2a7   :  { %1890 = vmatpush.xpose.msra.mxu1 %v705_v42  ;;  %1930 = vmatpush.xpose.msra.mxu3 %v707_v48  ;;  %v725_v42 = vld [vmem:[%s5712_s1 + $0x1628] sm:$0xff]  ;;  %v727_v48 = vld [vmem:[%s5712_s1 + $0x1638] sm:$0xff] }
 0x2aa   :  { %1871 = vmatpush.xpose.msra.mxu0 %v696_v30  ;;  %1911 = vmatpush.xpose.msra.mxu2 %v698_v49  ;;  %v716_v30 = vld [vmem:[%s5712_s1 + $0x15e0] sm:$0xff]  ;;  %v718_v49 = vld [vmem:[%s5712_s1 + $0x15f0] sm:$0xff] }
 0x2ab   :  { %1891 = vmatpush.xpose.msra.mxu1 %v697_v50  ;;  %1931 = vmatpush.xpose.msra.mxu3 %v699_v53  ;;  %v717_v50 = vld [vmem:[%s5712_s1 + $0x15e8] sm:$0xff]  ;;  %v719_v53 = vld [vmem:[%s5712_s1 + $0x15f8] sm:$0xff] }
 0x2ae   :  { %1872 = vmatpush.xpose.msra.mxu0 %v688_v14  ;;  %1912 = vmatpush.xpose.msra.mxu2 %v690_v38  ;;  %v708_v14 = vld [vmem:[%s5712_s1 + $0x15a0] sm:$0xff]  ;;  %v710_v38 = vld [vmem:[%s5712_s1 + $0x15b0] sm:$0xff] }
 0x2af   :  { %1892 = vmatpush.xpose.msra.mxu1 %v689_v35  ;;  %1932 = vmatpush.xpose.msra.mxu3 %v691_v45  ;;  %v709_v35 = vld [vmem:[%s5712_s1 + $0x15a8] sm:$0xff]  ;;  %v711_v45 = vld [vmem:[%s5712_s1 + $0x15b8] sm:$0xff] }
 0x2b2   :  { %1873 = vmatpush.xpose.msra.mxu0 %v680_v55  ;;  %1913 = vmatpush.xpose.msra.mxu2 %v682_v56  ;;  %v700_v55 = vld [vmem:[%s5712_s1 + $0x1560] sm:$0xff]  ;;  %v702_v56 = vld [vmem:[%s5712_s1 + $0x1570] sm:$0xff] }
 0x2b3   :  { %1893 = vmatpush.xpose.msra.mxu1 %v681_v57  ;;  %1933 = vmatpush.xpose.msra.mxu3 %v683_v58  ;;  %v701_v57 = vld [vmem:[%s5712_s1 + $0x1568] sm:$0xff]  ;;  %v703_v58 = vld [vmem:[%s5712_s1 + $0x1578] sm:$0xff] }
 0x2b6   :  { %1874 = vmatpush.xpose.msra.mxu0 %v672_v43  ;;  %1914 = vmatpush.xpose.msra.mxu2 %v674_v59  ;;  %v692_v43 = vld [vmem:[%s5712_s1 + $0x1520] sm:$0xff]  ;;  %v694_v59 = vld [vmem:[%s5712_s1 + $0x1530] sm:$0xff] }
 0x2b7   :  { %1894 = vmatpush.xpose.msra.mxu1 %v673_v60  ;;  %1934 = vmatpush.xpose.msra.mxu3 %v675_v47  ;;  %v693_v60 = vld [vmem:[%s5712_s1 + $0x1528] sm:$0xff]  ;;  %v695_v47 = vld [vmem:[%s5712_s1 + $0x1538] sm:$0xff] }
 0x2ba   :  { %1875 = vmatpush.xpose.msra.mxu0 %v664_v11  ;;  %1915 = vmatpush.xpose.msra.mxu2 %v666_v62  ;;  %v684_v11 = vld [vmem:[%s5712_s1 + $0x14e0] sm:$0xff]  ;;  %v686_v62 = vld [vmem:[%s5712_s1 + $0x14f0] sm:$0xff] }
 0x2bb   :  { %1895 = vmatpush.xpose.msra.mxu1 %v665_v63  ;;  %1935 = vmatpush.xpose.msra.mxu3 %v667_v1  ;;  %v685_v63 = vld [vmem:[%s5712_s1 + $0x14e8] sm:$0xff]  ;;  %v687_v1 = vld [vmem:[%s5712_s1 + $0x14f8] sm:$0xff] }
 0x2be   :  { %1876 = vmatpush.xpose.msra.mxu0 %v656_v2  ;;  %1916 = vmatpush.xpose.msra.mxu2 %v658_v3  ;;  %v676_v2 = vld [vmem:[%s5712_s1 + $0x14a0] sm:$0xff]  ;;  %v678_v3 = vld [vmem:[%s5712_s1 + $0x14b0] sm:$0xff] }
 0x2bf   :  { %1896 = vmatpush.xpose.msra.mxu1 %v657_v6  ;;  %1936 = vmatpush.xpose.msra.mxu3 %v659_v7  ;;  %v668_v6 = vld [vmem:[%s5712_s1 + $0x1460] sm:$0xff]  ;;  %v670_v7 = vld [vmem:[%s5712_s1 + $0x1470] sm:$0xff] }
 0x2c1   :  { %1917 = vmatmul.f32.vlgmr.msra.gmra.mxu2 %v4728_v13  ;;  %1877 = vmatmul.f32.vlgmr.msra.gmra.mxu0 %v4740_v18 }
 0x2c2   :  { %1941 = vmatpush.xpose.msrb.mxu0 %v780_v0  ;;  %1981 = vmatpush.xpose.msrb.mxu2 %v782_v4  ;;  %v677_v0 = vld [vmem:[%s5712_s1 + $0x14a8] sm:$0xff]  ;;  %v679_v4 = vld [vmem:[%s5712_s1 + $0x14b8] sm:$0xff] }
 0x2c3   :  { %1961 = vmatpush.xpose.msrb.mxu1 %v781_v51  ;;  %2001 = vmatpush.xpose.msrb.mxu3 %v783_v31  ;;  %v669_v51 = vld [vmem:[%s5712_s1 + $0x1468] sm:$0xff]  ;;  %v671_v31 = vld [vmem:[%s5712_s1 + $0x1478] sm:$0xff] }
 0x2c4   :  { %1897 = vmatmul.f32.vlgmr.msra.gmra.mxu1 %v4734_v5  ;;  %1937 = vmatmul.f32.vlgmr.msra.gmra.mxu3 %v4746_v54 }
 0x2c6   :  { %1942 = vmatpush.xpose.msrb.mxu0 %v772_v8  ;;  %1982 = vmatpush.xpose.msrb.mxu2 %v774_v9  ;;  %v660_v8 = vld [vmem:[%s5712_s1 + $0x1420] sm:$0xff]  ;;  %v662_v9 = vld [vmem:[%s5712_s1 + $0x1430] sm:$0xff] }
 0x2c7   :  { %1962 = vmatpush.xpose.msrb.mxu1 %v773_v12  ;;  %2002 = vmatpush.xpose.msrb.mxu3 %v775_v16  ;;  %v904_v12 = vld [vmem:[%s5712_s1 + $0x1bc0] sm:$0xff]  ;;  %v906_v16 = vld [vmem:[%s5712_s1 + $0x1bd0] sm:$0xff] }
 0x2ca   :  { %1943 = vmatpush.xpose.msrb.mxu0 %v764_v17  ;;  %1983 = vmatpush.xpose.msrb.mxu2 %v766_v19  ;;  %v661_v17 = vld [vmem:[%s5712_s1 + $0x1428] sm:$0xff]  ;;  %v663_v19 = vld [vmem:[%s5712_s1 + $0x1438] sm:$0xff] }
 0x2cb   :  { %1963 = vmatpush.xpose.msrb.mxu1 %v765_v20  ;;  %2003 = vmatpush.xpose.msrb.mxu3 %v767_v21  ;;  %v905_v20 = vld [vmem:[%s5712_s1 + $0x1bc8] sm:$0xff]  ;;  %v907_v21 = vld [vmem:[%s5712_s1 + $0x1bd8] sm:$0xff] }
 0x2ce   :  { %1944 = vmatpush.xpose.msrb.mxu0 %v756_v22  ;;  %1984 = vmatpush.xpose.msrb.mxu2 %v758_v23  ;;  %v896_v22 = vld [vmem:[%s5712_s1 + $0x1b80] sm:$0xff]  ;;  %v898_v23 = vld [vmem:[%s5712_s1 + $0x1b90] sm:$0xff] }
 0x2cf   :  { %1964 = vmatpush.xpose.msrb.mxu1 %v757_v25  ;;  %2004 = vmatpush.xpose.msrb.mxu3 %v759_v26  ;;  %v897_v25 = vld [vmem:[%s5712_s1 + $0x1b88] sm:$0xff]  ;;  %v899_v26 = vld [vmem:[%s5712_s1 + $0x1b98] sm:$0xff] }
 0x2d2   :  { %1945 = vmatpush.xpose.msrb.mxu0 %v748_v27  ;;  %1985 = vmatpush.xpose.msrb.mxu2 %v750_v28  ;;  %v880_v27 = vld [vmem:[%s5712_s1 + $0x1b00] sm:$0xff]  ;;  %v882_v28 = vld [vmem:[%s5712_s1 + $0x1b10] sm:$0xff] }
 0x2d3   :  { %1965 = vmatpush.xpose.msrb.mxu1 %v749_v29  ;;  %2005 = vmatpush.xpose.msrb.mxu3 %v751_v41  ;;  %v881_v29 = vld [vmem:[%s5712_s1 + $0x1b08] sm:$0xff]  ;;  %v883_v41 = vld [vmem:[%s5712_s1 + $0x1b18] sm:$0xff] }
 0x2d6   :  { %1946 = vmatpush.xpose.msrb.mxu0 %v740_v32  ;;  %1986 = vmatpush.xpose.msrb.mxu2 %v742_v33  ;;  %v872_v32 = vld [vmem:[%s5712_s1 + $0x1ac0] sm:$0xff]  ;;  %v874_v33 = vld [vmem:[%s5712_s1 + $0x1ad0] sm:$0xff] }
 0x2d7   :  { %1966 = vmatpush.xpose.msrb.mxu1 %v741_v34  ;;  %2006 = vmatpush.xpose.msrb.mxu3 %v743_v10  ;;  %v873_v34 = vld [vmem:[%s5712_s1 + $0x1ac8] sm:$0xff]  ;;  %v875_v10 = vld [vmem:[%s5712_s1 + $0x1ad8] sm:$0xff] }
 0x2da   :  { %1947 = vmatpush.xpose.msrb.mxu0 %v732_v37  ;;  %1987 = vmatpush.xpose.msrb.mxu2 %v734_v15  ;;  %v864_v37 = vld [vmem:[%s5712_s1 + $0x1a80] sm:$0xff]  ;;  %v866_v15 = vld [vmem:[%s5712_s1 + $0x1a90] sm:$0xff] }
 0x2db   :  { %1967 = vmatpush.xpose.msrb.mxu1 %v733_v24  ;;  %2007 = vmatpush.xpose.msrb.mxu3 %v735_v39  ;;  %v865_v24 = vld [vmem:[%s5712_s1 + $0x1a88] sm:$0xff]  ;;  %v867_v39 = vld [vmem:[%s5712_s1 + $0x1a98] sm:$0xff] }
 0x2de   :  { %1948 = vmatpush.xpose.msrb.mxu0 %v724_v40  ;;  %1988 = vmatpush.xpose.msrb.mxu2 %v726_v61  ;;  %v856_v40 = vld [vmem:[%s5712_s1 + $0x1a40] sm:$0xff]  ;;  %v858_v61 = vld [vmem:[%s5712_s1 + $0x1a50] sm:$0xff] }
 0x2df   :  { %1968 = vmatpush.xpose.msrb.mxu1 %v725_v42  ;;  %2008 = vmatpush.xpose.msrb.mxu3 %v727_v48  ;;  %v857_v42 = vld [vmem:[%s5712_s1 + $0x1a48] sm:$0xff]  ;;  %v859_v48 = vld [vmem:[%s5712_s1 + $0x1a58] sm:$0xff] }
 0x2e2   :  { %1949 = vmatpush.xpose.msrb.mxu0 %v716_v30  ;;  %1989 = vmatpush.xpose.msrb.mxu2 %v718_v49  ;;  %v848_v30 = vld [vmem:[%s5712_s1 + $0x1a00] sm:$0xff]  ;;  %v850_v49 = vld [vmem:[%s5712_s1 + $0x1a10] sm:$0xff] }
 0x2e3   :  { %1969 = vmatpush.xpose.msrb.mxu1 %v717_v50  ;;  %2009 = vmatpush.xpose.msrb.mxu3 %v719_v53  ;;  %v849_v50 = vld [vmem:[%s5712_s1 + $0x1a08] sm:$0xff]  ;;  %v851_v53 = vld [vmem:[%s5712_s1 + $0x1a18] sm:$0xff] }
 0x2e6   :  { %1950 = vmatpush.xpose.msrb.mxu0 %v708_v14  ;;  %1990 = vmatpush.xpose.msrb.mxu2 %v710_v38  ;;  %v840_v14 = vld [vmem:[%s5712_s1 + $0x19c0] sm:$0xff]  ;;  %v842_v38 = vld [vmem:[%s5712_s1 + $0x19d0] sm:$0xff] }
 0x2e7   :  { %1970 = vmatpush.xpose.msrb.mxu1 %v709_v35  ;;  %2010 = vmatpush.xpose.msrb.mxu3 %v711_v45  ;;  %v841_v35 = vld [vmem:[%s5712_s1 + $0x19c8] sm:$0xff]  ;;  %v843_v45 = vld [vmem:[%s5712_s1 + $0x19d8] sm:$0xff] }
 0x2ea   :  { %1951 = vmatpush.xpose.msrb.mxu0 %v700_v55  ;;  %1991 = vmatpush.xpose.msrb.mxu2 %v702_v56  ;;  %v832_v55 = vld [vmem:[%s5712_s1 + $0x1980] sm:$0xff]  ;;  %v834_v56 = vld [vmem:[%s5712_s1 + $0x1990] sm:$0xff] }
 0x2eb   :  { %1971 = vmatpush.xpose.msrb.mxu1 %v701_v57  ;;  %2011 = vmatpush.xpose.msrb.mxu3 %v703_v58  ;;  %v833_v57 = vld [vmem:[%s5712_s1 + $0x1988] sm:$0xff]  ;;  %v835_v58 = vld [vmem:[%s5712_s1 + $0x1998] sm:$0xff] }
 0x2ee   :  { %1952 = vmatpush.xpose.msrb.mxu0 %v692_v43  ;;  %1992 = vmatpush.xpose.msrb.mxu2 %v694_v59  ;;  %v824_v43 = vld [vmem:[%s5712_s1 + $0x1940] sm:$0xff]  ;;  %v826_v59 = vld [vmem:[%s5712_s1 + $0x1950] sm:$0xff] }
 0x2ef   :  { %1972 = vmatpush.xpose.msrb.mxu1 %v693_v60  ;;  %2012 = vmatpush.xpose.msrb.mxu3 %v695_v47  ;;  %v825_v60 = vld [vmem:[%s5712_s1 + $0x1948] sm:$0xff]  ;;  %v827_v47 = vld [vmem:[%s5712_s1 + $0x1958] sm:$0xff] }
 0x2f2   :  { %1953 = vmatpush.xpose.msrb.mxu0 %v684_v11  ;;  %1993 = vmatpush.xpose.msrb.mxu2 %v686_v62  ;;  %v816_v11 = vld [vmem:[%s5712_s1 + $0x1900] sm:$0xff]  ;;  %v818_v62 = vld [vmem:[%s5712_s1 + $0x1910] sm:$0xff] }
 0x2f3   :  { %1973 = vmatpush.xpose.msrb.mxu1 %v685_v63  ;;  %2013 = vmatpush.xpose.msrb.mxu3 %v687_v1  ;;  %v817_v63 = vld [vmem:[%s5712_s1 + $0x1908] sm:$0xff]  ;;  %v819_v1 = vld [vmem:[%s5712_s1 + $0x1918] sm:$0xff] }
 0x2f6   :  { %1954 = vmatpush.xpose.msrb.mxu0 %v676_v2  ;;  %1994 = vmatpush.xpose.msrb.mxu2 %v678_v3  ;;  %v808_v2 = vld [vmem:[%s5712_s1 + $0x18c0] sm:$0xff]  ;;  %v810_v3 = vld [vmem:[%s5712_s1 + $0x18d0] sm:$0xff] }
 0x2f7   :  { %1974 = vmatpush.xpose.msrb.mxu1 %v677_v0  ;;  %2014 = vmatpush.xpose.msrb.mxu3 %v679_v4  ;;  %v809_v0 = vld [vmem:[%s5712_s1 + $0x18c8] sm:$0xff]  ;;  %v811_v4 = vld [vmem:[%s5712_s1 + $0x18d8] sm:$0xff] }
 0x2fa   :  { %1955 = vmatpush.xpose.msrb.mxu0 %v668_v6  ;;  %1995 = vmatpush.xpose.msrb.mxu2 %v670_v7  ;;  %v800_v6 = vld [vmem:[%s5712_s1 + $0x1880] sm:$0xff]  ;;  %v802_v7 = vld [vmem:[%s5712_s1 + $0x1890] sm:$0xff] }
 0x2fb   :  { %1975 = vmatpush.xpose.msrb.mxu1 %v669_v51  ;;  %2015 = vmatpush.xpose.msrb.mxu3 %v671_v31  ;;  %v801_v51 = vld [vmem:[%s5712_s1 + $0x1888] sm:$0xff]  ;;  %v803_v31 = vld [vmem:[%s5712_s1 + $0x1898] sm:$0xff] }
 0x2fe   :  { %1956 = vmatpush.xpose.msrb.mxu0 %v660_v8  ;;  %1996 = vmatpush.xpose.msrb.mxu2 %v662_v9  ;;  %v792_v8 = vld [vmem:[%s5712_s1 + $0x1840] sm:$0xff]  ;;  %v794_v9 = vld [vmem:[%s5712_s1 + $0x1850] sm:$0xff] }
 0x2ff   :  { %1976 = vmatpush.xpose.msrb.mxu1 %v661_v17  ;;  %2016 = vmatpush.xpose.msrb.mxu3 %v663_v19  ;;  %v784_v17 = vld [vmem:[%s5712_s1 + $0x1800] sm:$0xff]  ;;  %v786_v19 = vld [vmem:[%s5712_s1 + $0x1810] sm:$0xff] }
 0x301   :  { %1997 = vmatmul.f32.vlgmr.msrb.gmra.mxu2 %v4505_v36  ;;  %1957 = vmatmul.f32.vlgmr.msrb.gmra.mxu0 %v4518_v46  ;;  %v888_v36 = vld [vmem:[%s5712_s1 + $0x1b40] sm:$0xff]  ;;  %v890_v46 = vld [vmem:[%s5712_s1 + $0x1b50] sm:$0xff] }
 0x302   :  { %2021 = vmatpush.xpose.msra.mxu0 %v904_v12  ;;  %2061 = vmatpush.xpose.msra.mxu2 %v906_v16  ;;  %v793_v12 = vld [vmem:[%s5712_s1 + $0x1848] sm:$0xff]  ;;  %v795_v16 = vld [vmem:[%s5712_s1 + $0x1858] sm:$0xff] }
 0x303   :  { %2041 = vmatpush.xpose.msra.mxu1 %v905_v20  ;;  %2081 = vmatpush.xpose.msra.mxu3 %v907_v21  ;;  %v908_v20 = vld [vmem:[%s5712_s1 + $0x1be0] sm:$0xff]  ;;  %v910_v21 = vld [vmem:[%s5712_s1 + $0x1bf0] sm:$0xff] }
 0x304   :  { %1977 = vmatmul.f32.vlgmr.msrb.gmra.mxu1 %v4515_v44  ;;  %2017 = vmatmul.f32.vlgmr.msrb.gmra.mxu3 %v4526_v52  ;;  %v889_v44 = vld [vmem:[%s5712_s1 + $0x1b48] sm:$0xff]  ;;  %v891_v52 = vld [vmem:[%s5712_s1 + $0x1b58] sm:$0xff] }
 0x306   :  { %2022 = vmatpush.xpose.msra.mxu0 %v896_v22  ;;  %2062 = vmatpush.xpose.msra.mxu2 %v898_v23  ;;  %v785_v22 = vld [vmem:[%s5712_s1 + $0x1808] sm:$0xff]  ;;  %v787_v23 = vld [vmem:[%s5712_s1 + $0x1818] sm:$0xff] }
 0x307   :  { %2042 = vmatpush.xpose.msra.mxu1 %v897_v25  ;;  %2082 = vmatpush.xpose.msra.mxu3 %v899_v26  ;;  %v909_v25 = vld [vmem:[%s5712_s1 + $0x1be8] sm:$0xff]  ;;  %v911_v26 = vld [vmem:[%s5712_s1 + $0x1bf8] sm:$0xff] }
 0x30a   :  { %2023 = vmatpush.xpose.msra.mxu0 %v888_v36  ;;  %2063 = vmatpush.xpose.msra.mxu2 %v890_v46  ;;  %v900_v36 = vld [vmem:[%s5712_s1 + $0x1ba0] sm:$0xff]  ;;  %v902_v46 = vld [vmem:[%s5712_s1 + $0x1bb0] sm:$0xff] }
 0x30b   :  { %2043 = vmatpush.xpose.msra.mxu1 %v889_v44  ;;  %2083 = vmatpush.xpose.msra.mxu3 %v891_v52  ;;  %v901_v44 = vld [vmem:[%s5712_s1 + $0x1ba8] sm:$0xff]  ;;  %v903_v52 = vld [vmem:[%s5712_s1 + $0x1bb8] sm:$0xff] }
 0x30e   :  { %2024 = vmatpush.xpose.msra.mxu0 %v880_v27  ;;  %2064 = vmatpush.xpose.msra.mxu2 %v882_v28  ;;  %v892_v27 = vld [vmem:[%s5712_s1 + $0x1b60] sm:$0xff]  ;;  %v894_v28 = vld [vmem:[%s5712_s1 + $0x1b70] sm:$0xff] }
 0x30f   :  { %2044 = vmatpush.xpose.msra.mxu1 %v881_v29  ;;  %2084 = vmatpush.xpose.msra.mxu3 %v883_v41  ;;  %v885_v29 = vld [vmem:[%s5712_s1 + $0x1b28] sm:$0xff]  ;;  %v887_v41 = vld [vmem:[%s5712_s1 + $0x1b38] sm:$0xff] }
 0x312   :  { %2025 = vmatpush.xpose.msra.mxu0 %v872_v32  ;;  %2065 = vmatpush.xpose.msra.mxu2 %v874_v33  ;;  %v876_v32 = vld [vmem:[%s5712_s1 + $0x1ae0] sm:$0xff]  ;;  %v878_v33 = vld [vmem:[%s5712_s1 + $0x1af0] sm:$0xff] }
 0x313   :  { %2045 = vmatpush.xpose.msra.mxu1 %v873_v34  ;;  %2085 = vmatpush.xpose.msra.mxu3 %v875_v10  ;;  %v877_v34 = vld [vmem:[%s5712_s1 + $0x1ae8] sm:$0xff]  ;;  %v879_v10 = vld [vmem:[%s5712_s1 + $0x1af8] sm:$0xff] }
 0x316   :  { %2026 = vmatpush.xpose.msra.mxu0 %v864_v37  ;;  %2066 = vmatpush.xpose.msra.mxu2 %v866_v15  ;;  %v868_v37 = vld [vmem:[%s5712_s1 + $0x1aa0] sm:$0xff]  ;;  %v870_v15 = vld [vmem:[%s5712_s1 + $0x1ab0] sm:$0xff] }
 0x317   :  { %2046 = vmatpush.xpose.msra.mxu1 %v865_v24  ;;  %2086 = vmatpush.xpose.msra.mxu3 %v867_v39  ;;  %v869_v24 = vld [vmem:[%s5712_s1 + $0x1aa8] sm:$0xff]  ;;  %v871_v39 = vld [vmem:[%s5712_s1 + $0x1ab8] sm:$0xff] }
 0x31a   :  { %2027 = vmatpush.xpose.msra.mxu0 %v856_v40  ;;  %2067 = vmatpush.xpose.msra.mxu2 %v858_v61  ;;  %v860_v40 = vld [vmem:[%s5712_s1 + $0x1a60] sm:$0xff]  ;;  %v862_v61 = vld [vmem:[%s5712_s1 + $0x1a70] sm:$0xff] }
 0x31b   :  { %2047 = vmatpush.xpose.msra.mxu1 %v857_v42  ;;  %2087 = vmatpush.xpose.msra.mxu3 %v859_v48  ;;  %v861_v42 = vld [vmem:[%s5712_s1 + $0x1a68] sm:$0xff]  ;;  %v863_v48 = vld [vmem:[%s5712_s1 + $0x1a78] sm:$0xff] }
 0x31e   :  { %2028 = vmatpush.xpose.msra.mxu0 %v848_v30  ;;  %2068 = vmatpush.xpose.msra.mxu2 %v850_v49  ;;  %v852_v30 = vld [vmem:[%s5712_s1 + $0x1a20] sm:$0xff]  ;;  %v854_v49 = vld [vmem:[%s5712_s1 + $0x1a30] sm:$0xff] }
 0x31f   :  { %2048 = vmatpush.xpose.msra.mxu1 %v849_v50  ;;  %2088 = vmatpush.xpose.msra.mxu3 %v851_v53  ;;  %v853_v50 = vld [vmem:[%s5712_s1 + $0x1a28] sm:$0xff]  ;;  %v855_v53 = vld [vmem:[%s5712_s1 + $0x1a38] sm:$0xff] }
 0x322   :  { %2029 = vmatpush.xpose.msra.mxu0 %v840_v14  ;;  %2069 = vmatpush.xpose.msra.mxu2 %v842_v38  ;;  %v844_v14 = vld [vmem:[%s5712_s1 + $0x19e0] sm:$0xff]  ;;  %v846_v38 = vld [vmem:[%s5712_s1 + $0x19f0] sm:$0xff] }
 0x323   :  { %2049 = vmatpush.xpose.msra.mxu1 %v841_v35  ;;  %2089 = vmatpush.xpose.msra.mxu3 %v843_v45  ;;  %v845_v35 = vld [vmem:[%s5712_s1 + $0x19e8] sm:$0xff]  ;;  %v847_v45 = vld [vmem:[%s5712_s1 + $0x19f8] sm:$0xff] }
 0x326   :  { %2030 = vmatpush.xpose.msra.mxu0 %v832_v55  ;;  %2070 = vmatpush.xpose.msra.mxu2 %v834_v56  ;;  %v836_v55 = vld [vmem:[%s5712_s1 + $0x19a0] sm:$0xff]  ;;  %v838_v56 = vld [vmem:[%s5712_s1 + $0x19b0] sm:$0xff] }
 0x327   :  { %2050 = vmatpush.xpose.msra.mxu1 %v833_v57  ;;  %2090 = vmatpush.xpose.msra.mxu3 %v835_v58  ;;  %v837_v57 = vld [vmem:[%s5712_s1 + $0x19a8] sm:$0xff]  ;;  %v839_v58 = vld [vmem:[%s5712_s1 + $0x19b8] sm:$0xff] }
 0x32a   :  { %2031 = vmatpush.xpose.msra.mxu0 %v824_v43  ;;  %2071 = vmatpush.xpose.msra.mxu2 %v826_v59  ;;  %v828_v43 = vld [vmem:[%s5712_s1 + $0x1960] sm:$0xff]  ;;  %v830_v59 = vld [vmem:[%s5712_s1 + $0x1970] sm:$0xff] }
 0x32b   :  { %2051 = vmatpush.xpose.msra.mxu1 %v825_v60  ;;  %2091 = vmatpush.xpose.msra.mxu3 %v827_v47  ;;  %v829_v60 = vld [vmem:[%s5712_s1 + $0x1968] sm:$0xff]  ;;  %v831_v47 = vld [vmem:[%s5712_s1 + $0x1978] sm:$0xff] }
 0x32e   :  { %2032 = vmatpush.xpose.msra.mxu0 %v816_v11  ;;  %2072 = vmatpush.xpose.msra.mxu2 %v818_v62  ;;  %v820_v11 = vld [vmem:[%s5712_s1 + $0x1920] sm:$0xff]  ;;  %v822_v62 = vld [vmem:[%s5712_s1 + $0x1930] sm:$0xff] }
 0x32f   :  { %2052 = vmatpush.xpose.msra.mxu1 %v817_v63  ;;  %2092 = vmatpush.xpose.msra.mxu3 %v819_v1  ;;  %v821_v63 = vld [vmem:[%s5712_s1 + $0x1928] sm:$0xff]  ;;  %v823_v1 = vld [vmem:[%s5712_s1 + $0x1938] sm:$0xff] }
 0x332   :  { %2033 = vmatpush.xpose.msra.mxu0 %v808_v2  ;;  %2073 = vmatpush.xpose.msra.mxu2 %v810_v3  ;;  %v812_v2 = vld [vmem:[%s5712_s1 + $0x18e0] sm:$0xff]  ;;  %v814_v3 = vld [vmem:[%s5712_s1 + $0x18f0] sm:$0xff] }
 0x333   :  { %2053 = vmatpush.xpose.msra.mxu1 %v809_v0  ;;  %2093 = vmatpush.xpose.msra.mxu3 %v811_v4  ;;  %v813_v0 = vld [vmem:[%s5712_s1 + $0x18e8] sm:$0xff]  ;;  %v815_v4 = vld [vmem:[%s5712_s1 + $0x18f8] sm:$0xff] }
 0x336   :  { %2034 = vmatpush.xpose.msra.mxu0 %v800_v6  ;;  %2074 = vmatpush.xpose.msra.mxu2 %v802_v7  ;;  %v804_v6 = vld [vmem:[%s5712_s1 + $0x18a0] sm:$0xff]  ;;  %v806_v7 = vld [vmem:[%s5712_s1 + $0x18b0] sm:$0xff] }
 0x337   :  { %2054 = vmatpush.xpose.msra.mxu1 %v801_v51  ;;  %2094 = vmatpush.xpose.msra.mxu3 %v803_v31  ;;  %v805_v51 = vld [vmem:[%s5712_s1 + $0x18a8] sm:$0xff]  ;;  %v807_v31 = vld [vmem:[%s5712_s1 + $0x18b8] sm:$0xff] }
 0x33a   :  { %2035 = vmatpush.xpose.msra.mxu0 %v792_v8  ;;  %2075 = vmatpush.xpose.msra.mxu2 %v794_v9  ;;  %v796_v8 = vld [vmem:[%s5712_s1 + $0x1860] sm:$0xff]  ;;  %v798_v9 = vld [vmem:[%s5712_s1 + $0x1870] sm:$0xff] }
 0x33b   :  { %2055 = vmatpush.xpose.msra.mxu1 %v793_v12  ;;  %2095 = vmatpush.xpose.msra.mxu3 %v795_v16  ;;  %v797_v12 = vld [vmem:[%s5712_s1 + $0x1868] sm:$0xff]  ;;  %v799_v16 = vld [vmem:[%s5712_s1 + $0x1878] sm:$0xff] }
 0x33e   :  { %2036 = vmatpush.xpose.msra.mxu0 %v784_v17  ;;  %2076 = vmatpush.xpose.msra.mxu2 %v786_v19  ;;  %v788_v17 = vld [vmem:[%s5712_s1 + $0x1820] sm:$0xff]  ;;  %v790_v19 = vld [vmem:[%s5712_s1 + $0x1830] sm:$0xff] }
 0x33f   :  { %2056 = vmatpush.xpose.msra.mxu1 %v785_v22  ;;  %2096 = vmatpush.xpose.msra.mxu3 %v787_v23  ;;  %v789_v22 = vld [vmem:[%s5712_s1 + $0x1828] sm:$0xff]  ;;  %v791_v23 = vld [vmem:[%s5712_s1 + $0x1838] sm:$0xff] }
 0x341   :  { %2077 = vmatmul.f32.vlgmr.msra.gmra.mxu2 %v4728_v13  ;;  %2037 = vmatmul.f32.vlgmr.msra.gmra.mxu0 %v4740_v18  ;;  %v893_v13 = vld [vmem:[%s5712_s1 + $0x1b68] sm:$0xff]  ;;  %v884_v18 = vld [vmem:[%s5712_s1 + $0x1b20] sm:$0xff] }
 0x342   :  { %2101 = vmatpush.xpose.msrb.mxu0 %v908_v20  ;;  %2141 = vmatpush.xpose.msrb.mxu2 %v910_v21  ;;  %v1032_v20 = vld [vmem:[%s5712_s1 + $0x1fc0] sm:$0xff]  ;;  %v1034_v21 = vld [vmem:[%s5712_s1 + $0x1fd0] sm:$0xff] }
 0x343   :  { %2121 = vmatpush.xpose.msrb.mxu1 %v909_v25  ;;  %2161 = vmatpush.xpose.msrb.mxu3 %v911_v26  ;;  %v1033_v25 = vld [vmem:[%s5712_s1 + $0x1fc8] sm:$0xff]  ;;  %v1035_v26 = vld [vmem:[%s5712_s1 + $0x1fd8] sm:$0xff] }
 0x344   :  { %2057 = vmatmul.f32.vlgmr.msra.gmra.mxu1 %v4734_v5  ;;  %2097 = vmatmul.f32.vlgmr.msra.gmra.mxu3 %v4746_v54  ;;  %v895_v5 = vld [vmem:[%s5712_s1 + $0x1b78] sm:$0xff]  ;;  %v886_v54 = vld [vmem:[%s5712_s1 + $0x1b30] sm:$0xff] }
 0x346   :  { %2102 = vmatpush.xpose.msrb.mxu0 %v900_v36  ;;  %2142 = vmatpush.xpose.msrb.mxu2 %v902_v46  ;;  %v1024_v36 = vld [vmem:[%s5712_s1 + $0x1f80] sm:$0xff]  ;;  %v1026_v46 = vld [vmem:[%s5712_s1 + $0x1f90] sm:$0xff] }
 0x347   :  { %2122 = vmatpush.xpose.msrb.mxu1 %v901_v44  ;;  %2162 = vmatpush.xpose.msrb.mxu3 %v903_v52  ;;  %v5321_v44 = vld.sshfl [vmem:[#allocation1 + $0x30] sm:$0xff pattern:$0x73625140]  ;;  %v1025_v52 = vld [vmem:[%s5712_s1 + $0x1f88] sm:$0xff] }
 0x34a   :  { %2103 = vmatpush.xpose.msrb.mxu0 %v892_v27  ;;  %2143 = vmatpush.xpose.msrb.mxu2 %v894_v28  ;;  %v1027_v27 = vld [vmem:[%s5712_s1 + $0x1f98] sm:$0xff]  ;;  %v5330_v28 = vld.sshfl [vmem:[#allocation1 + $0x28] sm:$0xff pattern:$0x73625140] }
 0x34b   :  { %2123 = vmatpush.xpose.msrb.mxu1 %v893_v13  ;;  %2163 = vmatpush.xpose.msrb.mxu3 %v895_v5  ;;  %v5333_v13 = vld.sshfl [vmem:[#allocation1 + $0x20] sm:$0xff pattern:$0x73625140] }
 0x34c   :  { %v1016_v5 = vld [vmem:[%s5712_s1 + $0x1f40] sm:$0xff] }
 0x34e   :  { %2104 = vmatpush.xpose.msrb.mxu0 %v884_v18  ;;  %2144 = vmatpush.xpose.msrb.mxu2 %v886_v54  ;;  %v5339_v18 = vld.sshfl [vmem:[#allocation1 + $0x38] sm:$0xff pattern:$0x73625140]  ;;  %v1018_v54 = vld [vmem:[%s5712_s1 + $0x1f50] sm:$0xff] }
 0x34f   :  { %2124 = vmatpush.xpose.msrb.mxu1 %v885_v29  ;;  %2164 = vmatpush.xpose.msrb.mxu3 %v887_v41  ;;  %v1017_v29 = vld [vmem:[%s5712_s1 + $0x1f48] sm:$0xff]  ;;  %v1019_v41 = vld [vmem:[%s5712_s1 + $0x1f58] sm:$0xff] }
 0x352   :  { %2105 = vmatpush.xpose.msrb.mxu0 %v876_v32  ;;  %2145 = vmatpush.xpose.msrb.mxu2 %v878_v33  ;;  %v1008_v32 = vld [vmem:[%s5712_s1 + $0x1f00] sm:$0xff]  ;;  %v1010_v33 = vld [vmem:[%s5712_s1 + $0x1f10] sm:$0xff] }
 0x353   :  { %2125 = vmatpush.xpose.msrb.mxu1 %v877_v34  ;;  %2165 = vmatpush.xpose.msrb.mxu3 %v879_v10  ;;  %v1009_v34 = vld [vmem:[%s5712_s1 + $0x1f08] sm:$0xff]  ;;  %v1011_v10 = vld [vmem:[%s5712_s1 + $0x1f18] sm:$0xff] }
 0x356   :  { %2106 = vmatpush.xpose.msrb.mxu0 %v868_v37  ;;  %2146 = vmatpush.xpose.msrb.mxu2 %v870_v15  ;;  %v1000_v37 = vld [vmem:[%s5712_s1 + $0x1ec0] sm:$0xff]  ;;  %v1002_v15 = vld [vmem:[%s5712_s1 + $0x1ed0] sm:$0xff] }
 0x357   :  { %2126 = vmatpush.xpose.msrb.mxu1 %v869_v24  ;;  %2166 = vmatpush.xpose.msrb.mxu3 %v871_v39  ;;  %v1001_v24 = vld [vmem:[%s5712_s1 + $0x1ec8] sm:$0xff]  ;;  %v1003_v39 = vld [vmem:[%s5712_s1 + $0x1ed8] sm:$0xff] }
 0x35a   :  { %2107 = vmatpush.xpose.msrb.mxu0 %v860_v40  ;;  %2147 = vmatpush.xpose.msrb.mxu2 %v862_v61  ;;  %v992_v40 = vld [vmem:[%s5712_s1 + $0x1e80] sm:$0xff]  ;;  %v994_v61 = vld [vmem:[%s5712_s1 + $0x1e90] sm:$0xff] }
 0x35b   :  { %2127 = vmatpush.xpose.msrb.mxu1 %v861_v42  ;;  %2167 = vmatpush.xpose.msrb.mxu3 %v863_v48  ;;  %v993_v42 = vld [vmem:[%s5712_s1 + $0x1e88] sm:$0xff]  ;;  %v995_v48 = vld [vmem:[%s5712_s1 + $0x1e98] sm:$0xff] }
 0x35e   :  { %2108 = vmatpush.xpose.msrb.mxu0 %v852_v30  ;;  %2148 = vmatpush.xpose.msrb.mxu2 %v854_v49  ;;  %v984_v30 = vld [vmem:[%s5712_s1 + $0x1e40] sm:$0xff]  ;;  %v986_v49 = vld [vmem:[%s5712_s1 + $0x1e50] sm:$0xff] }
 0x35f   :  { %2128 = vmatpush.xpose.msrb.mxu1 %v853_v50  ;;  %2168 = vmatpush.xpose.msrb.mxu3 %v855_v53  ;;  %v985_v50 = vld [vmem:[%s5712_s1 + $0x1e48] sm:$0xff]  ;;  %v987_v53 = vld [vmem:[%s5712_s1 + $0x1e58] sm:$0xff] }
 0x362   :  { %2109 = vmatpush.xpose.msrb.mxu0 %v844_v14  ;;  %2149 = vmatpush.xpose.msrb.mxu2 %v846_v38  ;;  %v976_v14 = vld [vmem:[%s5712_s1 + $0x1e00] sm:$0xff]  ;;  %v978_v38 = vld [vmem:[%s5712_s1 + $0x1e10] sm:$0xff] }
 0x363   :  { %2129 = vmatpush.xpose.msrb.mxu1 %v845_v35  ;;  %2169 = vmatpush.xpose.msrb.mxu3 %v847_v45  ;;  %v977_v35 = vld [vmem:[%s5712_s1 + $0x1e08] sm:$0xff]  ;;  %v979_v45 = vld [vmem:[%s5712_s1 + $0x1e18] sm:$0xff] }
 0x366   :  { %2110 = vmatpush.xpose.msrb.mxu0 %v836_v55  ;;  %2150 = vmatpush.xpose.msrb.mxu2 %v838_v56  ;;  %v968_v55 = vld [vmem:[%s5712_s1 + $0x1dc0] sm:$0xff]  ;;  %v970_v56 = vld [vmem:[%s5712_s1 + $0x1dd0] sm:$0xff] }
 0x367   :  { %2130 = vmatpush.xpose.msrb.mxu1 %v837_v57  ;;  %2170 = vmatpush.xpose.msrb.mxu3 %v839_v58  ;;  %v969_v57 = vld [vmem:[%s5712_s1 + $0x1dc8] sm:$0xff]  ;;  %v971_v58 = vld [vmem:[%s5712_s1 + $0x1dd8] sm:$0xff] }
 0x36a   :  { %2111 = vmatpush.xpose.msrb.mxu0 %v828_v43  ;;  %2151 = vmatpush.xpose.msrb.mxu2 %v830_v59  ;;  %v960_v43 = vld [vmem:[%s5712_s1 + $0x1d80] sm:$0xff]  ;;  %v962_v59 = vld [vmem:[%s5712_s1 + $0x1d90] sm:$0xff] }
 0x36b   :  { %2131 = vmatpush.xpose.msrb.mxu1 %v829_v60  ;;  %2171 = vmatpush.xpose.msrb.mxu3 %v831_v47  ;;  %v961_v60 = vld [vmem:[%s5712_s1 + $0x1d88] sm:$0xff]  ;;  %v963_v47 = vld [vmem:[%s5712_s1 + $0x1d98] sm:$0xff] }
 0x36e   :  { %2112 = vmatpush.xpose.msrb.mxu0 %v820_v11  ;;  %2152 = vmatpush.xpose.msrb.mxu2 %v822_v62  ;;  %v952_v11 = vld [vmem:[%s5712_s1 + $0x1d40] sm:$0xff]  ;;  %v954_v62 = vld [vmem:[%s5712_s1 + $0x1d50] sm:$0xff] }
 0x36f   :  { %2132 = vmatpush.xpose.msrb.mxu1 %v821_v63  ;;  %2172 = vmatpush.xpose.msrb.mxu3 %v823_v1  ;;  %v953_v63 = vld [vmem:[%s5712_s1 + $0x1d48] sm:$0xff]  ;;  %v955_v1 = vld [vmem:[%s5712_s1 + $0x1d58] sm:$0xff] }
 0x372   :  { %2113 = vmatpush.xpose.msrb.mxu0 %v812_v2  ;;  %2153 = vmatpush.xpose.msrb.mxu2 %v814_v3  ;;  %v944_v2 = vld [vmem:[%s5712_s1 + $0x1d00] sm:$0xff]  ;;  %v946_v3 = vld [vmem:[%s5712_s1 + $0x1d10] sm:$0xff] }
 0x373   :  { %2133 = vmatpush.xpose.msrb.mxu1 %v813_v0  ;;  %2173 = vmatpush.xpose.msrb.mxu3 %v815_v4  ;;  %v945_v0 = vld [vmem:[%s5712_s1 + $0x1d08] sm:$0xff]  ;;  %v947_v4 = vld [vmem:[%s5712_s1 + $0x1d18] sm:$0xff] }
 0x376   :  { %2114 = vmatpush.xpose.msrb.mxu0 %v804_v6  ;;  %2154 = vmatpush.xpose.msrb.mxu2 %v806_v7  ;;  %v936_v6 = vld [vmem:[%s5712_s1 + $0x1cc0] sm:$0xff]  ;;  %v938_v7 = vld [vmem:[%s5712_s1 + $0x1cd0] sm:$0xff] }
 0x377   :  { %2134 = vmatpush.xpose.msrb.mxu1 %v805_v51  ;;  %2174 = vmatpush.xpose.msrb.mxu3 %v807_v31  ;;  %v937_v51 = vld [vmem:[%s5712_s1 + $0x1cc8] sm:$0xff]  ;;  %v939_v31 = vld [vmem:[%s5712_s1 + $0x1cd8] sm:$0xff] }
 0x37a   :  { %2115 = vmatpush.xpose.msrb.mxu0 %v796_v8  ;;  %2155 = vmatpush.xpose.msrb.mxu2 %v798_v9  ;;  %v928_v8 = vld [vmem:[%s5712_s1 + $0x1c80] sm:$0xff]  ;;  %v930_v9 = vld [vmem:[%s5712_s1 + $0x1c90] sm:$0xff] }
 0x37b   :  { %2135 = vmatpush.xpose.msrb.mxu1 %v797_v12  ;;  %2175 = vmatpush.xpose.msrb.mxu3 %v799_v16  ;;  %v929_v12 = vld [vmem:[%s5712_s1 + $0x1c88] sm:$0xff]  ;;  %v931_v16 = vld [vmem:[%s5712_s1 + $0x1c98] sm:$0xff] }
 0x37e   :  { %2116 = vmatpush.xpose.msrb.mxu0 %v788_v17  ;;  %2156 = vmatpush.xpose.msrb.mxu2 %v790_v19  ;;  %v920_v17 = vld [vmem:[%s5712_s1 + $0x1c40] sm:$0xff]  ;;  %v922_v19 = vld [vmem:[%s5712_s1 + $0x1c50] sm:$0xff] }
 0x37f   :  { %2136 = vmatpush.xpose.msrb.mxu1 %v789_v22  ;;  %2176 = vmatpush.xpose.msrb.mxu3 %v791_v23  ;;  %v912_v22 = vld [vmem:[%s5712_s1 + $0x1c00] sm:$0xff]  ;;  %v914_v23 = vld [vmem:[%s5712_s1 + $0x1c10] sm:$0xff] }
 0x381   :  { %2157 = vmatmul.f32.vlgmr.msrb.gmra.mxu2 %v5321_v44  ;;  %2117 = vmatmul.f32.vlgmr.msrb.gmra.mxu0 %v5333_v13 }
 0x382   :  { %2181 = vmatpush.xpose.msra.mxu0 %v1032_v20  ;;  %2221 = vmatpush.xpose.msra.mxu2 %v1034_v21  ;;  %v921_v20 = vld [vmem:[%s5712_s1 + $0x1c48] sm:$0xff]  ;;  %v923_v21 = vld [vmem:[%s5712_s1 + $0x1c58] sm:$0xff] }
 0x383   :  { %2201 = vmatpush.xpose.msra.mxu1 %v1033_v25  ;;  %2241 = vmatpush.xpose.msra.mxu3 %v1035_v26  ;;  %v1036_v25 = vld [vmem:[%s5712_s1 + $0x1fe0] sm:$0xff]  ;;  %v1038_v26 = vld [vmem:[%s5712_s1 + $0x1ff0] sm:$0xff] }
 0x384   :  { %2137 = vmatmul.f32.vlgmr.msrb.gmra.mxu1 %v5330_v28  ;;  %2177 = vmatmul.f32.vlgmr.msrb.gmra.mxu3 %v5339_v18 }
 0x386   :  { %2182 = vmatpush.xpose.msra.mxu0 %v1024_v36  ;;  %2222 = vmatpush.xpose.msra.mxu2 %v1026_v46  ;;  %v913_v36 = vld [vmem:[%s5712_s1 + $0x1c08] sm:$0xff]  ;;  %v915_v46 = vld [vmem:[%s5712_s1 + $0x1c18] sm:$0xff] }
 0x387   :  { %2202 = vmatpush.xpose.msra.mxu1 %v1025_v52  ;;  %2242 = vmatpush.xpose.msra.mxu3 %v1027_v27  ;;  %v1037_v52 = vld [vmem:[%s5712_s1 + $0x1fe8] sm:$0xff]  ;;  %v1039_v27 = vld [vmem:[%s5712_s1 + $0x1ff8] sm:$0xff] }
 0x38a   :  { %2183 = vmatpush.xpose.msra.mxu0 %v1016_v5  ;;  %2223 = vmatpush.xpose.msra.mxu2 %v1018_v54  ;;  %v1028_v5 = vld [vmem:[%s5712_s1 + $0x1fa0] sm:$0xff]  ;;  %v1030_v54 = vld [vmem:[%s5712_s1 + $0x1fb0] sm:$0xff] }
 0x38b   :  { %2203 = vmatpush.xpose.msra.mxu1 %v1017_v29  ;;  %2243 = vmatpush.xpose.msra.mxu3 %v1019_v41  ;;  %v1029_v29 = vld [vmem:[%s5712_s1 + $0x1fa8] sm:$0xff]  ;;  %v2418_v41 = vld.sshfl [vmem:[#allocation1 + $0x10] sm:$0xff pattern:$0x73625140] }
 0x38e   :  { %2184 = vmatpush.xpose.msra.mxu0 %v1008_v32  ;;  %2224 = vmatpush.xpose.msra.mxu2 %v1010_v33  ;;  %v1031_v32 = vld [vmem:[%s5712_s1 + $0x1fb8] sm:$0xff]  ;;  %v2419_v33 = vld.sshfl [vmem:[#allocation1 + $0x8] sm:$0xff pattern:$0x73625140] }
 0x38f   :  { %2204 = vmatpush.xpose.msra.mxu1 %v1009_v34  ;;  %2244 = vmatpush.xpose.msra.mxu3 %v1011_v10  ;;  %v1020_v34 = vld [vmem:[%s5712_s1 + $0x1f60] sm:$0xff] }
 0x390   :  { %v2420_v10 = vld.sshfl [vmem:[#allocation1] sm:$0xff pattern:$0x73625140] }
 0x392   :  { %2185 = vmatpush.xpose.msra.mxu0 %v1000_v37  ;;  %2225 = vmatpush.xpose.msra.mxu2 %v1002_v15  ;;  %v1022_v37 = vld [vmem:[%s5712_s1 + $0x1f70] sm:$0xff]  ;;  %v2421_v15 = vld.sshfl [vmem:[#allocation1 + $0x18] sm:$0xff pattern:$0x73625140] }
 0x393   :  { %2205 = vmatpush.xpose.msra.mxu1 %v1001_v24  ;;  %2245 = vmatpush.xpose.msra.mxu3 %v1003_v39  ;;  %v1021_v24 = vld [vmem:[%s5712_s1 + $0x1f68] sm:$0xff]  ;;  %v1023_v39 = vld [vmem:[%s5712_s1 + $0x1f78] sm:$0xff] }
 0x396   :  { %2186 = vmatpush.xpose.msra.mxu0 %v992_v40  ;;  %2226 = vmatpush.xpose.msra.mxu2 %v994_v61  ;;  %v1012_v40 = vld [vmem:[%s5712_s1 + $0x1f20] sm:$0xff]  ;;  %v1014_v61 = vld [vmem:[%s5712_s1 + $0x1f30] sm:$0xff] }
 0x397   :  { %2206 = vmatpush.xpose.msra.mxu1 %v993_v42  ;;  %2246 = vmatpush.xpose.msra.mxu3 %v995_v48  ;;  %v1013_v42 = vld [vmem:[%s5712_s1 + $0x1f28] sm:$0xff]  ;;  %v1015_v48 = vld [vmem:[%s5712_s1 + $0x1f38] sm:$0xff] }
 0x39a   :  { %2187 = vmatpush.xpose.msra.mxu0 %v984_v30  ;;  %2227 = vmatpush.xpose.msra.mxu2 %v986_v49  ;;  %v1004_v30 = vld [vmem:[%s5712_s1 + $0x1ee0] sm:$0xff]  ;;  %v1006_v49 = vld [vmem:[%s5712_s1 + $0x1ef0] sm:$0xff] }
 0x39b   :  { %2207 = vmatpush.xpose.msra.mxu1 %v985_v50  ;;  %2247 = vmatpush.xpose.msra.mxu3 %v987_v53  ;;  %v1005_v50 = vld [vmem:[%s5712_s1 + $0x1ee8] sm:$0xff]  ;;  %v1007_v53 = vld [vmem:[%s5712_s1 + $0x1ef8] sm:$0xff] }
 0x39e   :  { %2188 = vmatpush.xpose.msra.mxu0 %v976_v14  ;;  %2228 = vmatpush.xpose.msra.mxu2 %v978_v38  ;;  %v996_v14 = vld [vmem:[%s5712_s1 + $0x1ea0] sm:$0xff]  ;;  %v998_v38 = vld [vmem:[%s5712_s1 + $0x1eb0] sm:$0xff] }
 0x39f   :  { %2208 = vmatpush.xpose.msra.mxu1 %v977_v35  ;;  %2248 = vmatpush.xpose.msra.mxu3 %v979_v45  ;;  %v997_v35 = vld [vmem:[%s5712_s1 + $0x1ea8] sm:$0xff]  ;;  %v999_v45 = vld [vmem:[%s5712_s1 + $0x1eb8] sm:$0xff] }
 0x3a2   :  { %2189 = vmatpush.xpose.msra.mxu0 %v968_v55  ;;  %2229 = vmatpush.xpose.msra.mxu2 %v970_v56  ;;  %v988_v55 = vld [vmem:[%s5712_s1 + $0x1e60] sm:$0xff]  ;;  %v990_v56 = vld [vmem:[%s5712_s1 + $0x1e70] sm:$0xff] }
 0x3a3   :  { %2209 = vmatpush.xpose.msra.mxu1 %v969_v57  ;;  %2249 = vmatpush.xpose.msra.mxu3 %v971_v58  ;;  %v989_v57 = vld [vmem:[%s5712_s1 + $0x1e68] sm:$0xff]  ;;  %v991_v58 = vld [vmem:[%s5712_s1 + $0x1e78] sm:$0xff] }
 0x3a6   :  { %2190 = vmatpush.xpose.msra.mxu0 %v960_v43  ;;  %2230 = vmatpush.xpose.msra.mxu2 %v962_v59  ;;  %v980_v43 = vld [vmem:[%s5712_s1 + $0x1e20] sm:$0xff]  ;;  %v982_v59 = vld [vmem:[%s5712_s1 + $0x1e30] sm:$0xff] }
 0x3a7   :  { %2210 = vmatpush.xpose.msra.mxu1 %v961_v60  ;;  %2250 = vmatpush.xpose.msra.mxu3 %v963_v47  ;;  %v981_v60 = vld [vmem:[%s5712_s1 + $0x1e28] sm:$0xff]  ;;  %v983_v47 = vld [vmem:[%s5712_s1 + $0x1e38] sm:$0xff] }
 0x3aa   :  { %2191 = vmatpush.xpose.msra.mxu0 %v952_v11  ;;  %2231 = vmatpush.xpose.msra.mxu2 %v954_v62  ;;  %v972_v11 = vld [vmem:[%s5712_s1 + $0x1de0] sm:$0xff]  ;;  %v974_v62 = vld [vmem:[%s5712_s1 + $0x1df0] sm:$0xff] }
 0x3ab   :  { %2211 = vmatpush.xpose.msra.mxu1 %v953_v63  ;;  %2251 = vmatpush.xpose.msra.mxu3 %v955_v1  ;;  %v973_v63 = vld [vmem:[%s5712_s1 + $0x1de8] sm:$0xff]  ;;  %v975_v1 = vld [vmem:[%s5712_s1 + $0x1df8] sm:$0xff] }
 0x3ae   :  { %2192 = vmatpush.xpose.msra.mxu0 %v944_v2  ;;  %2232 = vmatpush.xpose.msra.mxu2 %v946_v3  ;;  %v964_v2 = vld [vmem:[%s5712_s1 + $0x1da0] sm:$0xff]  ;;  %v966_v3 = vld [vmem:[%s5712_s1 + $0x1db0] sm:$0xff] }
 0x3af   :  { %2212 = vmatpush.xpose.msra.mxu1 %v945_v0  ;;  %2252 = vmatpush.xpose.msra.mxu3 %v947_v4  ;;  %v965_v0 = vld [vmem:[%s5712_s1 + $0x1da8] sm:$0xff]  ;;  %v967_v4 = vld [vmem:[%s5712_s1 + $0x1db8] sm:$0xff] }
 0x3b2   :  { %2193 = vmatpush.xpose.msra.mxu0 %v936_v6  ;;  %2233 = vmatpush.xpose.msra.mxu2 %v938_v7  ;;  %v956_v6 = vld [vmem:[%s5712_s1 + $0x1d60] sm:$0xff]  ;;  %v958_v7 = vld [vmem:[%s5712_s1 + $0x1d70] sm:$0xff] }
 0x3b3   :  { %2213 = vmatpush.xpose.msra.mxu1 %v937_v51  ;;  %2253 = vmatpush.xpose.msra.mxu3 %v939_v31  ;;  %v957_v51 = vld [vmem:[%s5712_s1 + $0x1d68] sm:$0xff]  ;;  %v959_v31 = vld [vmem:[%s5712_s1 + $0x1d78] sm:$0xff] }
 0x3b6   :  { %2194 = vmatpush.xpose.msra.mxu0 %v928_v8  ;;  %2234 = vmatpush.xpose.msra.mxu2 %v930_v9  ;;  %v948_v8 = vld [vmem:[%s5712_s1 + $0x1d20] sm:$0xff]  ;;  %v950_v9 = vld [vmem:[%s5712_s1 + $0x1d30] sm:$0xff] }
 0x3b7   :  { %2214 = vmatpush.xpose.msra.mxu1 %v929_v12  ;;  %2254 = vmatpush.xpose.msra.mxu3 %v931_v16  ;;  %v949_v12 = vld [vmem:[%s5712_s1 + $0x1d28] sm:$0xff]  ;;  %v951_v16 = vld [vmem:[%s5712_s1 + $0x1d38] sm:$0xff] }
 0x3ba   :  { %2195 = vmatpush.xpose.msra.mxu0 %v920_v17  ;;  %2235 = vmatpush.xpose.msra.mxu2 %v922_v19  ;;  %v940_v17 = vld [vmem:[%s5712_s1 + $0x1ce0] sm:$0xff]  ;;  %v942_v19 = vld [vmem:[%s5712_s1 + $0x1cf0] sm:$0xff] }
 0x3bb   :  { %2215 = vmatpush.xpose.msra.mxu1 %v921_v20  ;;  %2255 = vmatpush.xpose.msra.mxu3 %v923_v21  ;;  %v941_v20 = vld [vmem:[%s5712_s1 + $0x1ce8] sm:$0xff]  ;;  %v943_v21 = vld [vmem:[%s5712_s1 + $0x1cf8] sm:$0xff] }
 0x3be   :  { %2196 = vmatpush.xpose.msra.mxu0 %v912_v22  ;;  %2236 = vmatpush.xpose.msra.mxu2 %v914_v23  ;;  %v932_v22 = vld [vmem:[%s5712_s1 + $0x1ca0] sm:$0xff]  ;;  %v934_v23 = vld [vmem:[%s5712_s1 + $0x1cb0] sm:$0xff] }
 0x3bf   :  { %2216 = vmatpush.xpose.msra.mxu1 %v913_v36  ;;  %2256 = vmatpush.xpose.msra.mxu3 %v915_v46  ;;  %v924_v36 = vld [vmem:[%s5712_s1 + $0x1c60] sm:$0xff]  ;;  %v926_v46 = vld [vmem:[%s5712_s1 + $0x1c70] sm:$0xff] }
 0x3c1   :  { %2237 = vmatmul.f32.vlgmr.msra.gmra.mxu2 %v2418_v41  ;;  %2197 = vmatmul.f32.vlgmr.msra.gmra.mxu0 %v2420_v10  ;;  %v919_v41 = vld [vmem:[%s5712_s1 + $0x1c38] sm:$0xff]  ;;  %v1778_v10 = vpop.f32.mrf.mxu3 }
 0x3c2   :  { %2261 = vmatpush.xpose.msrb.mxu0 %v1036_v25  ;;  %2301 = vmatpush.xpose.msrb.mxu2 %v1038_v26  ;;  %v933_v25 = vld [vmem:[%s5712_s1 + $0x1ca8] sm:$0xff]  ;;  %v935_v26 = vld [vmem:[%s5712_s1 + $0x1cb8] sm:$0xff] }
 0x3c3   :  { %2281 = vmatpush.xpose.msrb.mxu1 %v1037_v52  ;;  %2321 = vmatpush.xpose.msrb.mxu3 %v1039_v27  ;;  %v925_v52 = vld [vmem:[%s5712_s1 + $0x1c68] sm:$0xff]  ;;  %v927_v27 = vld [vmem:[%s5712_s1 + $0x1c78] sm:$0xff] }
 0x3c4   :  { %2217 = vmatmul.f32.vlgmr.msra.gmra.mxu1 %v2419_v33  ;;  %2257 = vmatmul.f32.vlgmr.msra.gmra.mxu3 %v2421_v15  ;;  %v1718_v33 = vpop.f32.mrf.mxu0 }
 0x3c6   :  { %2262 = vmatpush.xpose.msrb.mxu0 %v1028_v5  ;;  %2302 = vmatpush.xpose.msrb.mxu2 %v1030_v54  ;;  %v916_v5 = vld [vmem:[%s5712_s1 + $0x1c20] sm:$0xff]  ;;  %v918_v54 = vld [vmem:[%s5712_s1 + $0x1c30] sm:$0xff] }
 0x3c7   :  { %2282 = vmatpush.xpose.msrb.mxu1 %v1029_v29  ;;  %2322 = vmatpush.xpose.msrb.mxu3 %v1031_v32  ;;  %v917_v29 = vld [vmem:[%s5712_s1 + $0x1c28] sm:$0xff]  ;;  %v1738_v32 = vpop.f32.mrf.mxu1 }
 0x3ca   :  { %2263 = vmatpush.xpose.msrb.mxu0 %v1020_v34  ;;  %2303 = vmatpush.xpose.msrb.mxu2 %v1022_v37  ;;  %v1758_v34 = vpop.f32.mrf.mxu2 }
 0x3cb   :  { %2283 = vmatpush.xpose.msrb.mxu1 %v1021_v24  ;;  %2323 = vmatpush.xpose.msrb.mxu3 %v1023_v39  ;;  %v1858_v39 = vpop.f32.mrf.mxu3 }
 0x3cc   :  { %v1798_v15 = vpop.f32.mrf.mxu0 }
 0x3ce   :  { %2264 = vmatpush.xpose.msrb.mxu0 %v1012_v40  ;;  %2304 = vmatpush.xpose.msrb.mxu2 %v1014_v61 }
 0x3cf   :  { %2284 = vmatpush.xpose.msrb.mxu1 %v1013_v42  ;;  %2324 = vmatpush.xpose.msrb.mxu3 %v1015_v48  ;;  %v1818_v37 = vpop.f32.mrf.mxu1 }
 0x3d2   :  { %2265 = vmatpush.xpose.msrb.mxu0 %v1004_v30  ;;  %2305 = vmatpush.xpose.msrb.mxu2 %v1006_v49  ;;  %v1838_v24 = vpop.f32.mrf.mxu2 }
 0x3d3   :  { %2285 = vmatpush.xpose.msrb.mxu1 %v1005_v50  ;;  %2325 = vmatpush.xpose.msrb.mxu3 %v1007_v53  ;;  %v1938_v48 = vpop.f32.mrf.mxu3 }
 0x3d4   :  { %v1878_v61 = vpop.f32.mrf.mxu0 }
 0x3d6   :  { %2266 = vmatpush.xpose.msrb.mxu0 %v996_v14  ;;  %2306 = vmatpush.xpose.msrb.mxu2 %v998_v38 }
 0x3d7   :  { %2286 = vmatpush.xpose.msrb.mxu1 %v997_v35  ;;  %2326 = vmatpush.xpose.msrb.mxu3 %v999_v45  ;;  %v1898_v40 = vpop.f32.mrf.mxu1 }
 0x3d8   :  { %v1899_v38 = vadd.f32 %v1898_v40, %v1878_v61 }
 0x3da   :  { %2267 = vmatpush.xpose.msrb.mxu0 %v988_v55  ;;  %2307 = vmatpush.xpose.msrb.mxu2 %v990_v56  ;;  %v1918_v42 = vpop.f32.mrf.mxu2 }
 0x3db   :  { %2287 = vmatpush.xpose.msrb.mxu1 %v989_v57  ;;  %2327 = vmatpush.xpose.msrb.mxu3 %v991_v58  ;;  %v1919_v56 = vadd.f32 %v1918_v42, %v1899_v38  ;;  %v1739_v57 = vadd.f32 %v1738_v32, %v1718_v33 }
 0x3de   :  { %2268 = vmatpush.xpose.msrb.mxu0 %v980_v43  ;;  %2308 = vmatpush.xpose.msrb.mxu2 %v982_v59 }
 0x3df   :  { %2288 = vmatpush.xpose.msrb.mxu1 %v981_v60  ;;  %2328 = vmatpush.xpose.msrb.mxu3 %v983_v47  ;;  %v1978_v30 = vpop.f32.mrf.mxu1  ;;  %v1939_v60 = vadd.f32 %v1938_v48, %v1919_v56 }
 0x3e2   :  { %2269 = vmatpush.xpose.msrb.mxu0 %v972_v11  ;;  %2309 = vmatpush.xpose.msrb.mxu2 %v974_v62  ;;  %v1998_v49 = vpop.f32.mrf.mxu2  ;;  %v1759_v11 = vadd.f32 %v1758_v34, %v1739_v57 }
 0x3e3   :  { %2289 = vmatpush.xpose.msrb.mxu1 %v973_v63  ;;  %2329 = vmatpush.xpose.msrb.mxu3 %v975_v1 }
 0x3e6   :  { %2270 = vmatpush.xpose.msrb.mxu0 %v964_v2  ;;  %2310 = vmatpush.xpose.msrb.mxu2 %v966_v3  ;;  %v1779_v3 = vadd.f32 %v1778_v10, %v1759_v11 }
 0x3e7   :  { %2290 = vmatpush.xpose.msrb.mxu1 %v965_v0  ;;  %2330 = vmatpush.xpose.msrb.mxu3 %v967_v4  ;;  %v2058_v50 = vpop.f32.mrf.mxu1 }
 0x3ea   :  { %2271 = vmatpush.xpose.msrb.mxu0 %v956_v6  ;;  %2311 = vmatpush.xpose.msrb.mxu2 %v958_v7  ;;  %v2078_v53 = vpop.f32.mrf.mxu2 }
 0x3eb   :  { %2291 = vmatpush.xpose.msrb.mxu1 %v957_v51  ;;  %2331 = vmatpush.xpose.msrb.mxu3 %v959_v31  ;;  %v1799_v51 = vadd.f32 %v1798_v15, %v1779_v3 }
 0x3ee   :  { %2272 = vmatpush.xpose.msrb.mxu0 %v948_v8  ;;  %2312 = vmatpush.xpose.msrb.mxu2 %v950_v9 }
 0x3ef   :  { %2292 = vmatpush.xpose.msrb.mxu1 %v949_v12  ;;  %2332 = vmatpush.xpose.msrb.mxu3 %v951_v16  ;;  %v1819_v16 = vadd.f32 %v1818_v37, %v1799_v51 }
 0x3f2   :  { %2273 = vmatpush.xpose.msrb.mxu0 %v940_v17  ;;  %2313 = vmatpush.xpose.msrb.mxu2 %v942_v19 }
 0x3f3   :  { %2293 = vmatpush.xpose.msrb.mxu1 %v941_v20  ;;  %2333 = vmatpush.xpose.msrb.mxu3 %v943_v21 }
 0x3f6   :  { %2274 = vmatpush.xpose.msrb.mxu0 %v932_v22  ;;  %2314 = vmatpush.xpose.msrb.mxu2 %v934_v23  ;;  %v2422_v22 = vld [vmem:[%s5714_s2] sm:$0xff] }
 0x3f7   :  { %2294 = vmatpush.xpose.msrb.mxu1 %v933_v25  ;;  %2334 = vmatpush.xpose.msrb.mxu3 %v935_v26  ;;  %v2348_v23 = vperm.slane %v2422_v22, 5  ;;  %v1839_v25 = vadd.f32 %v1838_v24, %v1819_v16  ;;  %v2347_v32 = vperm.slane %v2422_v22, 4 }
 0x3fa   :  { %2275 = vmatpush.xpose.msrb.mxu0 %v924_v36  ;;  %2315 = vmatpush.xpose.msrb.mxu2 %v926_v46  ;;  %v2349_v36 = vperm.slane %v2422_v22, 6 }
 0x3fb   :  { %2295 = vmatpush.xpose.msrb.mxu1 %v925_v52  ;;  %2335 = vmatpush.xpose.msrb.mxu3 %v927_v27 }
 0x3fe   :  { %2276 = vmatpush.xpose.msrb.mxu0 %v916_v5  ;;  %2316 = vmatpush.xpose.msrb.mxu2 %v918_v54  ;;  %v2350_v54 = vperm.slane %v2422_v22, 7 }
 0x3ff   :  { %2296 = vmatpush.xpose.msrb.mxu1 %v917_v29  ;;  %2336 = vmatpush.xpose.msrb.mxu3 %v919_v41  ;;  %v1859_v41 = vadd.f32 %v1858_v39, %v1839_v25 }
 0x401   :  { %2277 = vmatmul.f32.vlgmr.msrb.gmra.mxu0 %v5333_v13  ;;  %2317 = vmatmul.f32.vlgmr.msrb.gmra.mxu2 %v5321_v44  ;;  %v1958_v13 = vpop.f32.mrf.mxu0  ;;  %v2018_v44 = vpop.f32.mrf.mxu3  ;;  %v2363_v15 = vsub.f32 %v1859_v41, %v2347_v32 }
 0x402   :  { %2297 = vmatmul.f32.vlgmr.msrb.gmra.mxu1 %v5330_v28  ;;  %2337 = vmatmul.f32.vlgmr.msrb.gmra.mxu3 %v5339_v18  ;;  %v2138_v14 = vpop.f32.mrf.mxu1  ;;  %v1959_v2 = vadd.f32 %v1958_v13, %v1939_v60 }
 0x404   :  { %v2158_v55 = vpop.f32.mrf.mxu2  ;;  %v1979_v7 = vadd.f32 %v1978_v30, %v1959_v2 }
 0x406   :  { %v1999_v9 = vadd.f32 %v1998_v49, %v1979_v7 }
 0x408   :  { %v2019_v21 = vadd.f32 %v2018_v44, %v1999_v9 }
 0x409   :  { %v2038_v28 = vpop.f32.mrf.mxu0  ;;  %v2098_v18 = vpop.f32.mrf.mxu3 }
 0x40a   :  { %v2059_v45 = vadd.f32 %v2058_v50, %v2038_v28  ;;  %v2364_v27 = vsub.f32 %v2019_v21, %v2348_v23 }
 0x40c   :  { %v2079_v58 = vadd.f32 %v2078_v53, %v2059_v45  ;;  %v2378_v10 = vrot.slane %v2364_v27, 6 }
 0x40e   :  { %v2099_v62 = vadd.f32 %v2098_v18, %v2079_v58  ;;  %v2387_v42 = vsel %vm2381_vm0, %v2363_v15, %v2378_v10 }
 0x411   :  { %v2118_v35 = vpop.f32.mrf.mxu0  ;;  %v2178_v43 = vpop.f32.mrf.mxu3 }
 0x412   :  { %v2119_v0 = vadd.f32 %v2118_v35, %v2099_v62 }
 0x414   :  { %v2139_v31 = vadd.f32 %v2138_v14, %v2119_v0 }
 0x416   :  { %v2159_v17 = vadd.f32 %v2158_v55, %v2139_v31 }
 0x418   :  { %v2179_v26 = vadd.f32 %v2178_v43, %v2159_v17 }
 0x41a   :  { %v2365_v33 = vsub.f32 %v2179_v26, %v2349_v36 }
 0x41c   :  { %v2379_v40 = vrot.slane %v2365_v33, 4 }
 0x43e   :  { %v2198_v47 = vpop.f32.mrf.mxu0 }
 0x441   :  { %v2218_v59 = vpop.f32.mrf.mxu1 }
 0x442   :  { %v2219_v63 = vadd.f32 %v2218_v59, %v2198_v47 }
 0x444   :  { %v2238_v1 = vpop.f32.mrf.mxu2 }
 0x445   :  { %v2239_v4 = vadd.f32 %v2238_v1, %v2219_v63 }
 0x447   :  { %v2258_v6 = vpop.f32.mrf.mxu3 }
 0x448   :  { %v2259_v8 = vadd.f32 %v2258_v6, %v2239_v4 }
 0x47e   :  { %v2278_v12 = vpop.f32.mrf.mxu0 }
 0x47f   :  { %v2279_v19 = vadd.f32 %v2278_v12, %v2259_v8  ;;  %v2298_v20 = vpop.f32.mrf.mxu1 }
 0x481   :  { %v2299_v46 = vadd.f32 %v2298_v20, %v2279_v19 }
 0x484   :  { %v2318_v52 = vpop.f32.mrf.mxu2 }
 0x485   :  { %v2319_v5 = vadd.f32 %v2318_v52, %v2299_v46  ;;  %v2338_v29 = vpop.f32.mrf.mxu3 }
 0x487   :  { %v2339_v34 = vadd.f32 %v2338_v29, %v2319_v5 }
 0x489   :  { %v2366_v37 = vsub.f32 %v2339_v34, %v2350_v54 }
 0x48b   :  { %v2380_v61 = vrot.slane %v2366_v37, 2 }
 0x48d   :  { %v2388_v24 = vsel %vm2383_vm1, %v2379_v40, %v2380_v61 }
 0x48e   :  { %v2389_v48 = vsel %vm2385_vm2, %v2387_v42, %v2388_v24 }
 0x48f   :  { %2393 = vst [vmem:[%s5715_s3 + $0x8] sm:$0xff] %v2389_v48 }

</bundles_post_ra>
